<compile_context>
chip_gen: v5e
topology: v5e:2x2
jax: 0.10.0
libtpu: 0.0.40
codegen_flags: <defaults>
</compile_context>

<pallas_src>
import functools

import numpy as np
import jax
import jax.numpy as jnp
from jax import lax
from jax.experimental import pallas as pl
from jax.experimental.pallas import tpu as pltpu


# ----------------------------------------------------------------------------
# bilinear (align_corners=True) interpolation matrix, built on host
# ----------------------------------------------------------------------------
def _interp_matrix(out_size, in_size):
    R = np.zeros((out_size, in_size), dtype=np.float32)
    if out_size == 1:
        src = np.zeros((1,), dtype=np.float64)
    else:
        src = np.arange(out_size, dtype=np.float64) * (in_size - 1) / (out_size - 1)
    i0 = np.clip(np.floor(src).astype(np.int64), 0, in_size - 1)
    i1 = np.minimum(i0 + 1, in_size - 1)
    w1 = (src - i0).astype(np.float32)
    w0 = 1.0 - w1
    rows = np.arange(out_size)
    np.add.at(R, (rows, i0), w0)
    np.add.at(R, (rows, i1), w1)
    return jnp.asarray(R)


# ----------------------------------------------------------------------------
# Kernel 1: patch-embed "backbone" (linear projection + ReLU), tiled over M
# ----------------------------------------------------------------------------
def _patch_embed_kernel(x_ref, w_ref, b_ref, o_ref):
    y = jnp.dot(x_ref[...], w_ref[...], preferred_element_type=jnp.float32)
    y = jnp.maximum(y + b_ref[...], 0.0)
    o_ref[...] = y.astype(o_ref.dtype)


def patch_embed_backbone(imgs, w, b, patch=4):
    """imgs: (Bt, 3, H, W) f32 -> features (Bt, N, C) bf16, plus (fh, fw)."""
    Bt, Cin, H, W = imgs.shape
    fh, fw = H // patch, W // patch
    N = fh * fw
    Pd = Cin * patch * patch
    C = w.shape[1]
    # space-to-depth (row-major over (fh, fw)), fold batch into M
    x = imgs.reshape(Bt, Cin, fh, patch, fw, patch)
    x = x.transpose(0, 2, 4, 1, 3, 5).reshape(Bt * N, Pd)
    # zero-pad K to a lane-aligned 128, bf16 MXU operands
    Kp = max(128, ((Pd + 127) // 128) * 128)
    xb = jnp.pad(x, ((0, 0), (0, Kp - Pd))).astype(jnp.bfloat16)
    wb = jnp.pad(w, ((0, Kp - Pd), (0, 0))).astype(jnp.bfloat16)
    M = Bt * N
    tm = N  # divides M; (S+1)*B >= 2 blocks -> v7x core sharding + pipelined writeback
    out = pl.pallas_call(
        _patch_embed_kernel,
        out_shape=jax.ShapeDtypeStruct((M, C), jnp.bfloat16),
        grid=(M // tm,),
        in_specs=[pl.BlockSpec((tm, Kp), lambda i: (i, 0)),
                  pl.BlockSpec((Kp, C), lambda i: (0, 0)),
                  pl.BlockSpec((1, C), lambda i: (0, 0))],
        out_specs=pl.BlockSpec((tm, C), lambda i: (i, 0)),
        compiler_params=pltpu.CompilerParams(dimension_semantics=("parallel",)),
    )(xb, wb, b)
    return out.reshape(Bt, N, C), (fh, fw)


# ----------------------------------------------------------------------------
# Kernel 2: masked average pooling over all shots in one call (grid = (B, S))
#   output block (1, 2, C) is resident across the shot axis -> accumulator.
# ----------------------------------------------------------------------------
def _masked_pool_kernel(f_ref, m_ref, o_ref, *, inv_shots):
    @pl.when(pl.program_id(1) == 0)
    def _():
        o_ref[...] = jnp.zeros_like(o_ref)

    x = f_ref[0, 0]                                    # (N, C) bf16
    m = m_ref[0, 0]                                    # (2, N) f32: row0=fg, row1=bg
    num = jnp.dot(m.astype(jnp.bfloat16), x,
                  preferred_element_type=jnp.float32)  # (2, C)
    den = jnp.sum(m, axis=-1, keepdims=True) + 1e-5    # (2, 1)
    o_ref[...] += ((num / den) * inv_shots)[None]


def masked_average_pooling(feature_s, mask_rows):
    """feature_s: (B, S, N, C) bf16; mask_rows: (B, S, 2, N) f32 -> (B, 2, C) f32."""
    B, S, N, C = feature_s.shape
    kern = functools.partial(_masked_pool_kernel, inv_shots=1.0 / S)
    return pl.pallas_call(
        kern,
        out_shape=jax.ShapeDtypeStruct((B, 2, C), jnp.float32),
        grid=(B, S),
        in_specs=[pl.BlockSpec((1, 1, N, C), lambda b, s: (b, s, 0, 0)),
                  pl.BlockSpec((1, 1, 2, N), lambda b, s: (b, s, 0, 0))],
        out_specs=pl.BlockSpec((1, 2, C), lambda b, s: (b, 0, 0)),
        compiler_params=pltpu.CompilerParams(
            dimension_semantics=("parallel", "arbitrary")),
    )(feature_s, mask_rows)


# ----------------------------------------------------------------------------
# Kernel 3: fused similarity #1 + class softmax + threshold/top-12 selection +
#           SSP (global + local-bg prototypes) + prototype mixing + similarity #2.
#   One call per batch element; output is lane-dense (2, N).
# ----------------------------------------------------------------------------
def _fused_ssp_kernel(q_ref, p_ref, o_ref):
    x = q_ref[0]                                       # (N, C) bf16
    p = p_ref[0]                                       # (2, C) f32: row0=FP(fg), row1=BP(bg)
    N = x.shape[0]

    # Gram matrix <x_i, x_j> on the MXU (bf16 operands, f32 accumulation).
    raw = lax.dot_general(x, x, (((1,), (1,)), ((), ())),
                          preferred_element_type=jnp.float32)       # (N, N)

    # per-position squared norms in both layouts, read off the diagonal
    rid_nn = lax.broadcasted_iota(jnp.int32, (N, N), 0)
    cid_nn = lax.broadcasted_iota(jnp.int32, (N, N), 1)
    eye = rid_nn == cid_nn
    diag = jnp.where(eye, raw, 0.0)
    qq_row = jnp.sum(diag, axis=0, keepdims=True)                   # (1, N)
    qq_col = jnp.sum(diag, axis=1, keepdims=True)                   # (N, 1)

    def col_to_row(v):                                              # (N,1) -> (1,N)
        return jnp.sum(jnp.where(eye, v, 0.0), axis=0, keepdims=True)

    # ---- similarity #1 against the global prototypes (lane-dense (2, N)) ----
    qp = lax.dot_general(p.astype(jnp.bfloat16), x, (((1,), (1,)), ((), ())),
                         preferred_element_type=jnp.float32)        # (2, N)
    ps = jnp.sum(p * p, axis=-1, keepdims=True)                     # (2, 1)
    cos0 = qp * lax.rsqrt(jnp.maximum(ps * qq_row, 1e-16))          # (2, N)

    # ---- 2-class softmax -> pred_fg / pred_bg rows ----
    d = 10.0 * (cos0[0:1] - cos0[1:2])                              # (1, N) fg - bg logits
    pred_fg = 1.0 / (1.0 + jnp.exp(-d))
    rid2 = lax.broadcasted_iota(jnp.int32, (2, N), 0)
    scores = jnp.where(rid2 == 0, pred_fg, 1.0 - pred_fg)           # (2, N): row0=fg, row1=bg
    thres = jnp.where(lax.broadcasted_iota(jnp.int32, (2, 1), 0) == 0, 0.7, 0.6)

    # ---- selection: threshold with in-kernel iterative top-12 fallback ----
    thres_mask = scores > thres                                     # (2, N)
    has = jnp.sum(jnp.where(thres_mask, 1.0, 0.0),
                  axis=-1, keepdims=True) > 0.0                     # (2, 1)
    idx = lax.broadcasted_iota(jnp.int32, (2, N), 1)
    rem = scores
    topk = jnp.zeros((2, N), jnp.float32)
    for _ in range(min(12, N)):                                     # 12 max-and-mask passes
        row_max = jnp.max(rem, axis=-1, keepdims=True)              # (2, 1)
        first = jnp.min(jnp.where(rem == row_max, idx, N),
                        axis=-1, keepdims=True)                     # (2, 1)
        pick = idx == first
        topk = jnp.where(pick, 1.0, topk)
        rem = jnp.where(pick, -jnp.inf, rem)
    w = jnp.where(has, jnp.where(thres_mask, 1.0, 0.0), topk)       # (2, N)
    cnt = jnp.sum(w, axis=-1, keepdims=True)                        # (2, 1), >= 1

    # ---- global self-support prototypes (SSFP, SSBP) ----
    ss = jnp.dot(w.astype(jnp.bfloat16), x,
                 preferred_element_type=jnp.float32) / cnt          # (2, C)

    # ---- local bg prototype (ASBP) via masked softmax over bg-selected cols ----
    # NOTE: ASFP (fg local prototype) is dead for eval / refine=False and skipped.
    inv_col = lax.rsqrt(jnp.maximum(qq_col, 1e-12))                 # (N, 1)
    inv_row = lax.rsqrt(jnp.maximum(qq_row, 1e-12))                 # (1, N)
    sim = raw * (2.0 * inv_col) * inv_row                           # (N, N)
    sel_bg = w[1:2] > 0.0                                           # (1, N)
    logits = jnp.where(sel_bg, sim, -1e30)
    mx = jnp.max(logits, axis=-1, keepdims=True)                    # (N, 1)
    e = jnp.exp(logits - mx)                                        # masked cols underflow to 0
    a = e * pl.reciprocal(jnp.sum(e, axis=-1, keepdims=True), approx=True)
    asbp = jnp.dot(a.astype(jnp.bfloat16), x,
                   preferred_element_type=jnp.float32)              # (N, C)

    # ---- prototype mixing ----
    fp1 = 0.5 * p[0:1] + 0.5 * ss[0:1]                              # (1, C)
    bp1 = 0.3 * ss[1:2] + 0.7 * asbp                                # (N, C)

    # ---- similarity #2 ----
    qpf = lax.dot_general(fp1.astype(jnp.bfloat16), x, (((1,), (1,)), ((), ())),
                          preferred_element_type=jnp.float32)       # (1, N)
    fsq = jnp.sum(fp1 * fp1, axis=-1, keepdims=True)                # (1, 1)
    cos_fg = qpf * lax.rsqrt(jnp.maximum(fsq * qq_row, 1e-16))      # (1, N)

    qpb = jnp.sum(x.astype(jnp.float32) * bp1, axis=-1, keepdims=True)  # (N, 1)
    bsq = jnp.sum(bp1 * bp1, axis=-1, keepdims=True)                    # (N, 1)
    cos_bg = col_to_row(qpb * lax.rsqrt(jnp.maximum(bsq * qq_col, 1e-16)))  # (1, N)

    # channel order matches torch: row0 = bg, row1 = fg
    o_ref[...] = (10.0 * jnp.where(rid2 == 0, cos_bg, cos_fg))[None]


def fused_ssp_similarity(feature_q, proto):
    """feature_q: (B, N, C) bf16; proto: (B, 2, C) f32 [fg, bg] -> (B, 2, N) f32."""
    B, N, C = feature_q.shape
    return pl.pallas_call(
        _fused_ssp_kernel,
        out_shape=jax.ShapeDtypeStruct((B, 2, N), jnp.float32),
        grid=(B,),
        in_specs=[pl.BlockSpec((1, N, C), lambda b: (b, 0, 0)),
                  pl.BlockSpec((1, 2, C), lambda b: (b, 0, 0))],
        out_specs=pl.BlockSpec((1, 2, N), lambda b: (b, 0, 0)),
        compiler_params=pltpu.CompilerParams(dimension_semantics=("parallel",)),
    )(feature_q, proto)


# ----------------------------------------------------------------------------
# Full forward pass (eval mode, refine=False)
# ----------------------------------------------------------------------------
def ssp_matching_forward(params, img_s_list, mask_s_list, img_q, mask_q):
    S = len(img_s_list)
    B, _, H, W = img_q.shape

    # ---- backbone: all support + query images in ONE tiled patch-embed ----
    all_imgs = jnp.concatenate(img_s_list + [img_q], axis=0)    # ((S+1)*B, 3, H, W)
    feats, (fh, fw) = patch_embed_backbone(all_imgs, params["w"], params["b"])
    N, C = fh * fw, feats.shape[-1]
    feats = feats.reshape(S + 1, B, N, C)                       # bf16
    feature_s = jnp.transpose(feats[:S], (1, 0, 2, 3))          # (B, S, N, C)
    feature_q = feats[S]                                        # (B, N, C)

    # ---- support mask downsample (bilinear, align_corners=True), tiny XLA einsum ----
    Rh = _interp_matrix(fh, H)
    Rw = _interp_matrix(fw, W)
    m_pairs = jnp.stack(
        [jnp.stack([(ms == 1).astype(jnp.float32),
                    (ms == 0).astype(jnp.float32)], axis=1)
         for ms in mask_s_list], axis=1)                        # (B, S, 2, H, W)
    mask_rows = jnp.einsum('oh,pw,bskhw->bskop', Rh, Rw,
                           m_pairs).reshape(B, S, 2, N)

    # ---- masked average pooling over all shots in one call ----
    proto = masked_average_pooling(feature_s, mask_rows)        # (B, 2, C) [fg, bg]

    # ---- fused similarity#1 + selection + SSP + mixing + similarity#2 ----
    out_1 = fused_ssp_similarity(feature_q, proto)              # (B, 2, N)

    # ---- final bilinear upsample to (64,64), align_corners=True (XLA einsum) ----
    Ru_h = _interp_matrix(64, fh)
    Ru_w = _interp_matrix(64, fw)
    out_1 = jnp.einsum('oh,pw,bchw->bcop', Ru_h, Ru_w,
                       out_1.reshape(B, 2, fh, fw))             # (B, 2, 64, 64)
    return [out_1]


# ----------------------------------------------------------------------------
if __name__ == "__main__":
    B, H, W = 2, 32, 32        # small images; feature map = 8x8 (N = 64)
    C = 1024                   # SSP_func hard-codes 1024 feature channels
    patch = 4
    Pd = 3 * patch * patch

    key = jax.random.PRNGKey(0)
    k0, k1, k2, k3 = jax.random.split(key, 4)
    img_q = jax.random.normal(k0, (B, 3, H, W), jnp.float32)
    img_s = jax.random.normal(k1, (B, 3, H, W), jnp.float32)
    mask_q = (jax.random.uniform(k2, (B, H, W)) > 0.5).astype(jnp.float32)
    mask_s = (jax.random.uniform(k3, (B, H, W)) > 0.5).astype(jnp.float32)

    # deterministic synthetic backbone parameters
    wkey = jax.random.PRNGKey(42)
    params = {"w": jax.random.normal(wkey, (Pd, C), jnp.float32) * 0.05,
              "b": jnp.zeros((1, C), jnp.float32)}

    fwd = jax.jit(lambda p, s, ms, q, mq:
                  ssp_matching_forward(p, [s], [ms], q, mq))
    out_ls = fwd(params, img_s, mask_s, img_q, mask_q)
    out_ls = jax.block_until_ready(out_ls)

    assert out_ls[0].shape == (B, 2, 64, 64)
    assert bool(jnp.all(jnp.isfinite(out_ls[0])))
    print("KERNEL_OK")
</pallas_src>

<mosaic_0001>
module attributes {stable_mosaic.version = 11 : i64} {
  func.func @_patch_embed_kernel(%arg0: i32, %arg1: memref<64x128xbf16, #tpu.memory_space<vmem>>, %arg2: memref<128x1024xbf16, #tpu.memory_space<vmem>>, %arg3: memref<1x1024xf32, #tpu.memory_space<vmem>>, %arg4: memref<64x1024xbf16, #tpu.memory_space<vmem>>) attributes {dimension_semantics = [#tpu.dimension_semantics<parallel>], iteration_bounds = array<i64: 4>, scalar_prefetch = 0 : i64, scratch_operands = 0 : i64, tpu.core_type = #tpu.core_type<tc>, window_params = [{transform_indices = @transform_0, window_bounds = array<i64: 64, 128>}, {pipeline_mode = #tpu.pipeline_mode<synchronous>, transform_indices = @transform_1, window_bounds = array<i64: 128, 1024>}, {pipeline_mode = #tpu.pipeline_mode<synchronous>, transform_indices = @transform_2, window_bounds = array<i64: 1, 1024>}, {transform_indices = @transform_3, window_bounds = array<i64: 64, 1024>}]} {
    %c0 = arith.constant 0 : index
    %c0_0 = arith.constant 0 : index
    %0 = vector.load %arg1[%c0, %c0_0] : memref<64x128xbf16, #tpu.memory_space<vmem>>, vector<64x128xbf16>
    %c0_1 = arith.constant 0 : index
    %c0_2 = arith.constant 0 : index
    %1 = vector.load %arg2[%c0_1, %c0_2] : memref<128x1024xbf16, #tpu.memory_space<vmem>>, vector<128x1024xbf16>
    %cst = arith.constant dense<0.000000e+00> : vector<64x1024xf32>
    %2 = tpu.matmul %0, %1, %cst {dimension_numbers = #tpu.dot_dimension_numbers<[1], [0], [0], [1], [0, 0, 1, 1], [], []>} : vector<64x128xbf16>, vector<128x1024xbf16>, vector<64x1024xf32> -> vector<64x1024xf32>
    %c0_3 = arith.constant 0 : index
    %c0_4 = arith.constant 0 : index
    %3 = vector.load %arg3[%c0_3, %c0_4] : memref<1x1024xf32, #tpu.memory_space<vmem>>, vector<1x1024xf32>
    %4 = vector.broadcast %3 : vector<1x1024xf32> to vector<64x1024xf32>
    %5 = arith.addf %2, %4 : vector<64x1024xf32>
    %cst_5 = arith.constant 0.000000e+00 : f32
    %6 = vector.broadcast %cst_5 : f32 to vector<64x1024xf32>
    %7 = arith.maximumf %5, %6 : vector<64x1024xf32>
    %8 = arith.truncf %7 : vector<64x1024xf32> to vector<64x1024xbf16>
    %c0_6 = arith.constant 0 : index
    %c0_7 = arith.constant 0 : index
    %9 = vector.load %arg4[%c0_6, %c0_7] : memref<64x1024xbf16, #tpu.memory_space<vmem>>, vector<64x1024xbf16>
    tpu.vector_store %arg4[%c0_6, %c0_7], %8 {strides = array<i32>} : memref<64x1024xbf16, #tpu.memory_space<vmem>>, vector<64x1024xbf16>,
    return
  }
  func.func @transform_0(%arg0: i32) -> (i32, i32) {
    %c0_i32 = arith.constant 0 : i32
    %c0_i32_0 = arith.constant 0 : i32
    return %arg0, %c0_i32 : i32, i32
  }
  func.func @transform_1(%arg0: i32) -> (i32, i32) {
    %c0_i32 = arith.constant 0 : i32
    %c0_i32_0 = arith.constant 0 : i32
    %c0_i32_1 = arith.constant 0 : i32
    return %c0_i32, %c0_i32_0 : i32, i32
  }
  func.func @transform_2(%arg0: i32) -> (i32, i32) {
    %c0_i32 = arith.constant 0 : i32
    %c0_i32_0 = arith.constant 0 : i32
    %c0_i32_1 = arith.constant 0 : i32
    return %c0_i32, %c0_i32_0 : i32, i32
  }
  func.func @transform_3(%arg0: i32) -> (i32, i32) {
    %c0_i32 = arith.constant 0 : i32
    %c0_i32_0 = arith.constant 0 : i32
    return %arg0, %c0_i32 : i32, i32
  }
}

module attributes {stable_mosaic.version = 11 : i64} {
  func.func @_masked_pool_kernel(%arg0: i32, %arg1: i32, %arg2: memref<1x1x64x1024xbf16, #tpu.memory_space<vmem>>, %arg3: memref<1x1x2x64xf32, #tpu.memory_space<vmem>>, %arg4: memref<1x2x1024xf32, #tpu.memory_space<vmem>>) attributes {dimension_semantics = [#tpu.dimension_semantics<parallel>, #tpu.dimension_semantics<arbitrary>], iteration_bounds = array<i64: 2, 1>, scalar_prefetch = 0 : i64, scratch_operands = 0 : i64, tpu.core_type = #tpu.core_type<tc>, window_params = [{transform_indices = @transform_0, window_bounds = array<i64: 1, 1, 64, 1024>}, {transform_indices = @transform_1, window_bounds = array<i64: 1, 1, 2, 64>}, {transform_indices = @transform_2, window_bounds = array<i64: 1, 2, 1024>}]} {
    %c0_i32 = arith.constant 0 : i32
    %0 = arith.cmpi eq, %arg1, %c0_i32 : i32
    %1 = arith.extui %0 : i1 to i32
    %c0_i32_0 = arith.constant 0 : i32
    %2 = arith.cmpi ne, %1, %c0_i32_0 : i32
    scf.if %2 {
      %cst_17 = arith.constant 0.000000e+00 : f32
      %21 = vector.broadcast %cst_17 : f32 to vector<1x2x1024xf32>
      %c0_18 = arith.constant 0 : index
      %c0_19 = arith.constant 0 : index
      %c0_20 = arith.constant 0 : index
      %22 = vector.load %arg4[%c0_18, %c0_19, %c0_20] : memref<1x2x1024xf32, #tpu.memory_space<vmem>>, vector<1x2x1024xf32>
      tpu.vector_store %arg4[%c0_18, %c0_19, %c0_20], %21 {strides = array<i32>} : memref<1x2x1024xf32, #tpu.memory_space<vmem>>, vector<1x2x1024xf32>,
    } else {
    }
    %c0 = arith.constant 0 : index
    %c0_1 = arith.constant 0 : index
    %c0_2 = arith.constant 0 : index
    %c0_3 = arith.constant 0 : index
    %3 = vector.load %arg2[%c0, %c0_1, %c0_2, %c0_3] : memref<1x1x64x1024xbf16, #tpu.memory_space<vmem>>, vector<1x1x64x1024xbf16>
    %4 = vector.shape_cast %3 : vector<1x1x64x1024xbf16> to vector<64x1024xbf16>
    %c0_4 = arith.constant 0 : index
    %c0_5 = arith.constant 0 : index
    %c0_6 = arith.constant 0 : index
    %c0_7 = arith.constant 0 : index
    %5 = vector.load %arg3[%c0_4, %c0_5, %c0_6, %c0_7] : memref<1x1x2x64xf32, #tpu.memory_space<vmem>>, vector<1x1x2x64xf32>
    %6 = vector.shape_cast %5 : vector<1x1x2x64xf32> to vector<2x64xf32>
    %7 = arith.truncf %6 : vector<2x64xf32> to vector<2x64xbf16>
    %cst = arith.constant dense<0.000000e+00> : vector<2x1024xf32>
    %8 = tpu.matmul %7, %4, %cst {dimension_numbers = #tpu.dot_dimension_numbers<[1], [0], [0], [1], [0, 0, 1, 1], [], []>} : vector<2x64xbf16>, vector<64x1024xbf16>, vector<2x1024xf32> -> vector<2x1024xf32>
    %cst_8 = arith.constant dense<0.000000e+00> : vector<2xf32>
    %9 = vector.multi_reduction <add>, %6, %cst_8 [1] : vector<2x64xf32> to vector<2xf32>
    %10 = vector.shape_cast %9 : vector<2xf32> to vector<2x1xf32>
    %cst_9 = arith.constant 9.99999974E-6 : f32
    %11 = vector.broadcast %cst_9 : f32 to vector<2x1xf32>
    %12 = arith.addf %10, %11 : vector<2x1xf32>
    %c0_10 = arith.constant 0 : index
    %c0_11 = arith.constant 0 : index
    %c0_12 = arith.constant 0 : index
    %13 = vector.load %arg4[%c0_10, %c0_11, %c0_12] : memref<1x2x1024xf32, #tpu.memory_space<vmem>>, vector<1x2x1024xf32>
    %14 = vector.broadcast %12 : vector<2x1xf32> to vector<2x1024xf32>
    %15 = arith.divf %8, %14 : vector<2x1024xf32>
    %cst_13 = arith.constant 1.000000e+00 : f32
    %16 = vector.broadcast %cst_13 : f32 to vector<2x1024xf32>
    %17 = arith.mulf %15, %16 : vector<2x1024xf32>
    %18 = vector.shape_cast %17 : vector<2x1024xf32> to vector<1x2x1024xf32>
    %19 = arith.addf %13, %18 : vector<1x2x1024xf32>
    %c0_14 = arith.constant 0 : index
    %c0_15 = arith.constant 0 : index
    %c0_16 = arith.constant 0 : index
    %20 = vector.load %arg4[%c0_14, %c0_15, %c0_16] : memref<1x2x1024xf32, #tpu.memory_space<vmem>>, vector<1x2x1024xf32>
    tpu.vector_store %arg4[%c0_14, %c0_15, %c0_16], %19 {strides = array<i32>} : memref<1x2x1024xf32, #tpu.memory_space<vmem>>, vector<1x2x1024xf32>,
    return
  }
  func.func @transform_0(%arg0: i32, %arg1: i32) -> (i32, i32, i32, i32) {
    %c0_i32 = arith.constant 0 : i32
    %c0_i32_0 = arith.constant 0 : i32
    %c0_i32_1 = arith.constant 0 : i32
    return %arg0, %arg1, %c0_i32, %c0_i32_0 : i32, i32, i32, i32
  }
  func.func @transform_1(%arg0: i32, %arg1: i32) -> (i32, i32, i32, i32) {
    %c0_i32 = arith.constant 0 : i32
    %c0_i32_0 = arith.constant 0 : i32
    %c0_i32_1 = arith.constant 0 : i32
    return %arg0, %arg1, %c0_i32, %c0_i32_0 : i32, i32, i32, i32
  }
  func.func @transform_2(%arg0: i32, %arg1: i32) -> (i32, i32, i32) {
    %c0_i32 = arith.constant 0 : i32
    %c0_i32_0 = arith.constant 0 : i32
    %c0_i32_1 = arith.constant 0 : i32
    return %arg0, %c0_i32, %c0_i32_0 : i32, i32, i32
  }
}

module attributes {stable_mosaic.version = 11 : i64} {
  func.func @_fused_ssp_kernel(%arg0: i32, %arg1: memref<1x64x1024xbf16, #tpu.memory_space<vmem>>, %arg2: memref<1x2x1024xf32, #tpu.memory_space<vmem>>, %arg3: memref<1x2x64xf32, #tpu.memory_space<vmem>>) attributes {dimension_semantics = [#tpu.dimension_semantics<parallel>], iteration_bounds = array<i64: 2>, scalar_prefetch = 0 : i64, scratch_operands = 0 : i64, tpu.core_type = #tpu.core_type<tc>, window_params = [{transform_indices = @transform_0, window_bounds = array<i64: 1, 64, 1024>}, {transform_indices = @transform_1, window_bounds = array<i64: 1, 2, 1024>}, {transform_indices = @transform_2, window_bounds = array<i64: 1, 2, 64>}]} {
    %c0 = arith.constant 0 : index
    %c0_0 = arith.constant 0 : index
    %c0_1 = arith.constant 0 : index
    %0 = vector.load %arg1[%c0, %c0_0, %c0_1] : memref<1x64x1024xbf16, #tpu.memory_space<vmem>>, vector<1x64x1024xbf16>
    %1 = vector.shape_cast %0 : vector<1x64x1024xbf16> to vector<64x1024xbf16>
    %c0_2 = arith.constant 0 : index
    %c0_3 = arith.constant 0 : index
    %c0_4 = arith.constant 0 : index
    %2 = vector.load %arg2[%c0_2, %c0_3, %c0_4] : memref<1x2x1024xf32, #tpu.memory_space<vmem>>, vector<1x2x1024xf32>
    %3 = vector.shape_cast %2 : vector<1x2x1024xf32> to vector<2x1024xf32>
    %cst = arith.constant dense<0.000000e+00> : vector<64x64xf32>
    %4 = tpu.matmul %1, %1, %cst {dimension_numbers = #tpu.dot_dimension_numbers<[1], [1], [0], [0], [0, 0, 1, 0], [], []>} : vector<64x1024xbf16>, vector<64x1024xbf16>, vector<64x64xf32> -> vector<64x64xf32>
    %5 = tpu.iota {dimensions = array<i32: 0>} : vector<64x64xi32>
    %6 = tpu.iota {dimensions = array<i32: 1>} : vector<64x64xi32>
    %7 = arith.cmpi eq, %5, %6 : vector<64x64xi32>
    %cst_5 = arith.constant 0.000000e+00 : f32
    %8 = vector.broadcast %cst_5 : f32 to vector<64x64xf32>
    %9 = arith.select %7, %4, %8 : vector<64x64xi1>, vector<64x64xf32>
    %cst_6 = arith.constant dense<0.000000e+00> : vector<64xf32>
    %10 = vector.multi_reduction <add>, %9, %cst_6 [0] : vector<64x64xf32> to vector<64xf32>
    %11 = vector.shape_cast %10 : vector<64xf32> to vector<1x64xf32>
    %cst_7 = arith.constant dense<0.000000e+00> : vector<64xf32>
    %12 = vector.multi_reduction <add>, %9, %cst_7 [1] : vector<64x64xf32> to vector<64xf32>
    %13 = vector.shape_cast %12 : vector<64xf32> to vector<64x1xf32>
    %14 = arith.truncf %3 : vector<2x1024xf32> to vector<2x1024xbf16>
    %cst_8 = arith.constant dense<0.000000e+00> : vector<2x64xf32>
    %15 = tpu.matmul %14, %1, %cst_8 {dimension_numbers = #tpu.dot_dimension_numbers<[1], [1], [0], [0], [0, 0, 1, 0], [], []>} : vector<2x1024xbf16>, vector<64x1024xbf16>, vector<2x64xf32> -> vector<2x64xf32>
    %16 = arith.mulf %3, %3 : vector<2x1024xf32>
    %cst_9 = arith.constant dense<0.000000e+00> : vector<2xf32>
    %17 = vector.multi_reduction <add>, %16, %cst_9 [1] : vector<2x1024xf32> to vector<2xf32>
    %18 = vector.shape_cast %17 : vector<2xf32> to vector<2x1xf32>
    %19 = vector.broadcast %18 : vector<2x1xf32> to vector<2x64xf32>
    %20 = vector.broadcast %11 : vector<1x64xf32> to vector<2x64xf32>
    %21 = arith.mulf %19, %20 : vector<2x64xf32>
    %cst_10 = arith.constant 1.000000e-16 : f32
    %22 = vector.broadcast %cst_10 : f32 to vector<2x64xf32>
    %23 = arith.maximumf %21, %22 : vector<2x64xf32>
    %24 = math.rsqrt %23 : vector<2x64xf32>
    %25 = arith.mulf %15, %24 : vector<2x64xf32>
    %26 = vector.extract_strided_slice %25 {offsets = [0, 0], sizes = [1, 64], strides = [1, 1]} : vector<2x64xf32> to vector<1x64xf32>
    %27 = vector.extract_strided_slice %25 {offsets = [1, 0], sizes = [1, 64], strides = [1, 1]} : vector<2x64xf32> to vector<1x64xf32>
    %28 = arith.subf %26, %27 : vector<1x64xf32>
    %cst_11 = arith.constant 1.000000e+01 : f32
    %29 = vector.broadcast %cst_11 : f32 to vector<1x64xf32>
    %30 = arith.mulf %29, %28 : vector<1x64xf32>
    %cst_12 = arith.constant 0.000000e+00 : f32
    %31 = vector.broadcast %cst_12 : f32 to vector<1x64xf32>
    %32 = arith.subf %31, %30 : vector<1x64xf32>
    %33 = math.exp %32 : vector<1x64xf32>
    %cst_13 = arith.constant 1.000000e+00 : f32
    %34 = vector.broadcast %cst_13 : f32 to vector<1x64xf32>
    %35 = arith.addf %34, %33 : vector<1x64xf32>
    %cst_14 = arith.constant 1.000000e+00 : f32
    %36 = vector.broadcast %cst_14 : f32 to vector<1x64xf32>
    %37 = arith.divf %36, %35 : vector<1x64xf32>
    %38 = tpu.iota {dimensions = array<i32: 0>} : vector<2x64xi32>
    %c0_i32 = arith.constant 0 : i32
    %39 = vector.broadcast %c0_i32 : i32 to vector<2x64xi32>
    %40 = arith.cmpi eq, %38, %39 : vector<2x64xi32>
    %cst_15 = arith.constant 1.000000e+00 : f32
    %41 = vector.broadcast %cst_15 : f32 to vector<1x64xf32>
    %42 = arith.subf %41, %37 : vector<1x64xf32>
    %43 = vector.shape_cast %37 : vector<1x64xf32> to vector<1x64xf32>
    %44 = vector.broadcast %43 : vector<1x64xf32> to vector<2x64xf32>
    %45 = vector.shape_cast %42 : vector<1x64xf32> to vector<1x64xf32>
    %46 = vector.broadcast %45 : vector<1x64xf32> to vector<2x64xf32>
    %47 = arith.select %40, %44, %46 : vector<2x64xi1>, vector<2x64xf32>
    %48 = tpu.iota {dimensions = array<i32: 0>} : vector<2x1xi32>
    %c0_i32_16 = arith.constant 0 : i32
    %49 = vector.broadcast %c0_i32_16 : i32 to vector<2x1xi32>
    %50 = arith.cmpi eq, %48, %49 : vector<2x1xi32>
    %cst_17 = arith.constant 0.699999988 : f32
    %cst_18 = arith.constant 6.000000e-01 : f32
    %51 = vector.broadcast %cst_17 : f32 to vector<2x1xf32>
    %52 = vector.broadcast %cst_18 : f32 to vector<2x1xf32>
    %53 = arith.select %50, %51, %52 : vector<2x1xi1>, vector<2x1xf32>
    %54 = vector.broadcast %53 : vector<2x1xf32> to vector<2x64xf32>
    %55 = arith.cmpf ogt, %47, %54 : vector<2x64xf32>
    %cst_19 = arith.constant 1.000000e+00 : f32
    %cst_20 = arith.constant 0.000000e+00 : f32
    %56 = vector.broadcast %cst_19 : f32 to vector<2x64xf32>
    %57 = vector.broadcast %cst_20 : f32 to vector<2x64xf32>
    %58 = arith.select %55, %56, %57 : vector<2x64xi1>, vector<2x64xf32>
    %cst_21 = arith.constant dense<0.000000e+00> : vector<2xf32>
    %59 = vector.multi_reduction <add>, %58, %cst_21 [1] : vector<2x64xf32> to vector<2xf32>
    %60 = vector.shape_cast %59 : vector<2xf32> to vector<2x1xf32>
    %cst_22 = arith.constant 0.000000e+00 : f32
    %61 = vector.broadcast %cst_22 : f32 to vector<2x1xf32>
    %62 = arith.cmpf ogt, %60, %61 : vector<2x1xf32>
    %63 = tpu.iota {dimensions = array<i32: 1>} : vector<2x64xi32>
    %cst_23 = arith.constant 0.000000e+00 : f32
    %64 = vector.broadcast %cst_23 : f32 to vector<2x64xf32>
    %cst_24 = arith.constant dense<0xFF800000> : vector<2xf32>
    %65 = vector.multi_reduction <maximumf>, %47, %cst_24 [1] : vector<2x64xf32> to vector<2xf32>
    %66 = vector.shape_cast %65 : vector<2xf32> to vector<2x1xf32>
    %67 = vector.broadcast %66 : vector<2x1xf32> to vector<2x64xf32>
    %68 = arith.cmpf oeq, %47, %67 : vector<2x64xf32>
    %c64_i32 = arith.constant 64 : i32
    %69 = vector.broadcast %c64_i32 : i32 to vector<2x64xi32>
    %70 = arith.select %68, %63, %69 : vector<2x64xi1>, vector<2x64xi32>
    %cst_25 = arith.constant dense<2147483647> : vector<2xi32>
    %71 = vector.multi_reduction <minsi>, %70, %cst_25 [1] : vector<2x64xi32> to vector<2xi32>
    %72 = vector.shape_cast %71 : vector<2xi32> to vector<2x1xi32>
    %73 = vector.broadcast %72 : vector<2x1xi32> to vector<2x64xi32>
    %74 = arith.cmpi eq, %63, %73 : vector<2x64xi32>
    %cst_26 = arith.constant 1.000000e+00 : f32
    %75 = vector.broadcast %cst_26 : f32 to vector<2x64xf32>
    %76 = arith.select %74, %75, %64 : vector<2x64xi1>, vector<2x64xf32>
    %cst_27 = arith.constant 0xFF800000 : f32
    %77 = vector.broadcast %cst_27 : f32 to vector<2x64xf32>
    %78 = arith.select %74, %77, %47 : vector<2x64xi1>, vector<2x64xf32>
    %cst_28 = arith.constant dense<0xFF800000> : vector<2xf32>
    %79 = vector.multi_reduction <maximumf>, %78, %cst_28 [1] : vector<2x64xf32> to vector<2xf32>
    %80 = vector.shape_cast %79 : vector<2xf32> to vector<2x1xf32>
    %81 = vector.broadcast %80 : vector<2x1xf32> to vector<2x64xf32>
    %82 = arith.cmpf oeq, %78, %81 : vector<2x64xf32>
    %c64_i32_29 = arith.constant 64 : i32
    %83 = vector.broadcast %c64_i32_29 : i32 to vector<2x64xi32>
    %84 = arith.select %82, %63, %83 : vector<2x64xi1>, vector<2x64xi32>
    %cst_30 = arith.constant dense<2147483647> : vector<2xi32>
    %85 = vector.multi_reduction <minsi>, %84, %cst_30 [1] : vector<2x64xi32> to vector<2xi32>
    %86 = vector.shape_cast %85 : vector<2xi32> to vector<2x1xi32>
    %87 = vector.broadcast %86 : vector<2x1xi32> to vector<2x64xi32>
    %88 = arith.cmpi eq, %63, %87 : vector<2x64xi32>
    %cst_31 = arith.constant 1.000000e+00 : f32
    %89 = vector.broadcast %cst_31 : f32 to vector<2x64xf32>
    %90 = arith.select %88, %89, %76 : vector<2x64xi1>, vector<2x64xf32>
    %cst_32 = arith.constant 0xFF800000 : f32
    %91 = vector.broadcast %cst_32 : f32 to vector<2x64xf32>
    %92 = arith.select %88, %91, %78 : vector<2x64xi1>, vector<2x64xf32>
    %cst_33 = arith.constant dense<0xFF800000> : vector<2xf32>
    %93 = vector.multi_reduction <maximumf>, %92, %cst_33 [1] : vector<2x64xf32> to vector<2xf32>
    %94 = vector.shape_cast %93 : vector<2xf32> to vector<2x1xf32>
    %95 = vector.broadcast %94 : vector<2x1xf32> to vector<2x64xf32>
    %96 = arith.cmpf oeq, %92, %95 : vector<2x64xf32>
    %c64_i32_34 = arith.constant 64 : i32
    %97 = vector.broadcast %c64_i32_34 : i32 to vector<2x64xi32>
    %98 = arith.select %96, %63, %97 : vector<2x64xi1>, vector<2x64xi32>
    %cst_35 = arith.constant dense<2147483647> : vector<2xi32>
    %99 = vector.multi_reduction <minsi>, %98, %cst_35 [1] : vector<2x64xi32> to vector<2xi32>
    %100 = vector.shape_cast %99 : vector<2xi32> to vector<2x1xi32>
    %101 = vector.broadcast %100 : vector<2x1xi32> to vector<2x64xi32>
    %102 = arith.cmpi eq, %63, %101 : vector<2x64xi32>
    %cst_36 = arith.constant 1.000000e+00 : f32
    %103 = vector.broadcast %cst_36 : f32 to vector<2x64xf32>
    %104 = arith.select %102, %103, %90 : vector<2x64xi1>, vector<2x64xf32>
    %cst_37 = arith.constant 0xFF800000 : f32
    %105 = vector.broadcast %cst_37 : f32 to vector<2x64xf32>
    %106 = arith.select %102, %105, %92 : vector<2x64xi1>, vector<2x64xf32>
    %cst_38 = arith.constant dense<0xFF800000> : vector<2xf32>
    %107 = vector.multi_reduction <maximumf>, %106, %cst_38 [1] : vector<2x64xf32> to vector<2xf32>
    %108 = vector.shape_cast %107 : vector<2xf32> to vector<2x1xf32>
    %109 = vector.broadcast %108 : vector<2x1xf32> to vector<2x64xf32>
    %110 = arith.cmpf oeq, %106, %109 : vector<2x64xf32>
    %c64_i32_39 = arith.constant 64 : i32
    %111 = vector.broadcast %c64_i32_39 : i32 to vector<2x64xi32>
    %112 = arith.select %110, %63, %111 : vector<2x64xi1>, vector<2x64xi32>
    %cst_40 = arith.constant dense<2147483647> : vector<2xi32>
    %113 = vector.multi_reduction <minsi>, %112, %cst_40 [1] : vector<2x64xi32> to vector<2xi32>
    %114 = vector.shape_cast %113 : vector<2xi32> to vector<2x1xi32>
    %115 = vector.broadcast %114 : vector<2x1xi32> to vector<2x64xi32>
    %116 = arith.cmpi eq, %63, %115 : vector<2x64xi32>
    %cst_41 = arith.constant 1.000000e+00 : f32
    %117 = vector.broadcast %cst_41 : f32 to vector<2x64xf32>
    %118 = arith.select %116, %117, %104 : vector<2x64xi1>, vector<2x64xf32>
    %cst_42 = arith.constant 0xFF800000 : f32
    %119 = vector.broadcast %cst_42 : f32 to vector<2x64xf32>
    %120 = arith.select %116, %119, %106 : vector<2x64xi1>, vector<2x64xf32>
    %cst_43 = arith.constant dense<0xFF800000> : vector<2xf32>
    %121 = vector.multi_reduction <maximumf>, %120, %cst_43 [1] : vector<2x64xf32> to vector<2xf32>
    %122 = vector.shape_cast %121 : vector<2xf32> to vector<2x1xf32>
    %123 = vector.broadcast %122 : vector<2x1xf32> to vector<2x64xf32>
    %124 = arith.cmpf oeq, %120, %123 : vector<2x64xf32>
    %c64_i32_44 = arith.constant 64 : i32
    %125 = vector.broadcast %c64_i32_44 : i32 to vector<2x64xi32>
    %126 = arith.select %124, %63, %125 : vector<2x64xi1>, vector<2x64xi32>
    %cst_45 = arith.constant dense<2147483647> : vector<2xi32>
    %127 = vector.multi_reduction <minsi>, %126, %cst_45 [1] : vector<2x64xi32> to vector<2xi32>
    %128 = vector.shape_cast %127 : vector<2xi32> to vector<2x1xi32>
    %129 = vector.broadcast %128 : vector<2x1xi32> to vector<2x64xi32>
    %130 = arith.cmpi eq, %63, %129 : vector<2x64xi32>
    %cst_46 = arith.constant 1.000000e+00 : f32
    %131 = vector.broadcast %cst_46 : f32 to vector<2x64xf32>
    %132 = arith.select %130, %131, %118 : vector<2x64xi1>, vector<2x64xf32>
    %cst_47 = arith.constant 0xFF800000 : f32
    %133 = vector.broadcast %cst_47 : f32 to vector<2x64xf32>
    %134 = arith.select %130, %133, %120 : vector<2x64xi1>, vector<2x64xf32>
    %cst_48 = arith.constant dense<0xFF800000> : vector<2xf32>
    %135 = vector.multi_reduction <maximumf>, %134, %cst_48 [1] : vector<2x64xf32> to vector<2xf32>
    %136 = vector.shape_cast %135 : vector<2xf32> to vector<2x1xf32>
    %137 = vector.broadcast %136 : vector<2x1xf32> to vector<2x64xf32>
    %138 = arith.cmpf oeq, %134, %137 : vector<2x64xf32>
    %c64_i32_49 = arith.constant 64 : i32
    %139 = vector.broadcast %c64_i32_49 : i32 to vector<2x64xi32>
    %140 = arith.select %138, %63, %139 : vector<2x64xi1>, vector<2x64xi32>
    %cst_50 = arith.constant dense<2147483647> : vector<2xi32>
    %141 = vector.multi_reduction <minsi>, %140, %cst_50 [1] : vector<2x64xi32> to vector<2xi32>
    %142 = vector.shape_cast %141 : vector<2xi32> to vector<2x1xi32>
    %143 = vector.broadcast %142 : vector<2x1xi32> to vector<2x64xi32>
    %144 = arith.cmpi eq, %63, %143 : vector<2x64xi32>
    %cst_51 = arith.constant 1.000000e+00 : f32
    %145 = vector.broadcast %cst_51 : f32 to vector<2x64xf32>
    %146 = arith.select %144, %145, %132 : vector<2x64xi1>, vector<2x64xf32>
    %cst_52 = arith.constant 0xFF800000 : f32
    %147 = vector.broadcast %cst_52 : f32 to vector<2x64xf32>
    %148 = arith.select %144, %147, %134 : vector<2x64xi1>, vector<2x64xf32>
    %cst_53 = arith.constant dense<0xFF800000> : vector<2xf32>
    %149 = vector.multi_reduction <maximumf>, %148, %cst_53 [1] : vector<2x64xf32> to vector<2xf32>
    %150 = vector.shape_cast %149 : vector<2xf32> to vector<2x1xf32>
    %151 = vector.broadcast %150 : vector<2x1xf32> to vector<2x64xf32>
    %152 = arith.cmpf oeq, %148, %151 : vector<2x64xf32>
    %c64_i32_54 = arith.constant 64 : i32
    %153 = vector.broadcast %c64_i32_54 : i32 to vector<2x64xi32>
    %154 = arith.select %152, %63, %153 : vector<2x64xi1>, vector<2x64xi32>
    %cst_55 = arith.constant dense<2147483647> : vector<2xi32>
    %155 = vector.multi_reduction <minsi>, %154, %cst_55 [1] : vector<2x64xi32> to vector<2xi32>
    %156 = vector.shape_cast %155 : vector<2xi32> to vector<2x1xi32>
    %157 = vector.broadcast %156 : vector<2x1xi32> to vector<2x64xi32>
    %158 = arith.cmpi eq, %63, %157 : vector<2x64xi32>
    %cst_56 = arith.constant 1.000000e+00 : f32
    %159 = vector.broadcast %cst_56 : f32 to vector<2x64xf32>
    %160 = arith.select %158, %159, %146 : vector<2x64xi1>, vector<2x64xf32>
    %cst_57 = arith.constant 0xFF800000 : f32
    %161 = vector.broadcast %cst_57 : f32 to vector<2x64xf32>
    %162 = arith.select %158, %161, %148 : vector<2x64xi1>, vector<2x64xf32>
    %cst_58 = arith.constant dense<0xFF800000> : vector<2xf32>
    %163 = vector.multi_reduction <maximumf>, %162, %cst_58 [1] : vector<2x64xf32> to vector<2xf32>
    %164 = vector.shape_cast %163 : vector<2xf32> to vector<2x1xf32>
    %165 = vector.broadcast %164 : vector<2x1xf32> to vector<2x64xf32>
    %166 = arith.cmpf oeq, %162, %165 : vector<2x64xf32>
    %c64_i32_59 = arith.constant 64 : i32
    %167 = vector.broadcast %c64_i32_59 : i32 to vector<2x64xi32>
    %168 = arith.select %166, %63, %167 : vector<2x64xi1>, vector<2x64xi32>
    %cst_60 = arith.constant dense<2147483647> : vector<2xi32>
    %169 = vector.multi_reduction <minsi>, %168, %cst_60 [1] : vector<2x64xi32> to vector<2xi32>
    %170 = vector.shape_cast %169 : vector<2xi32> to vector<2x1xi32>
    %171 = vector.broadcast %170 : vector<2x1xi32> to vector<2x64xi32>
    %172 = arith.cmpi eq, %63, %171 : vector<2x64xi32>
    %cst_61 = arith.constant 1.000000e+00 : f32
    %173 = vector.broadcast %cst_61 : f32 to vector<2x64xf32>
    %174 = arith.select %172, %173, %160 : vector<2x64xi1>, vector<2x64xf32>
    %cst_62 = arith.constant 0xFF800000 : f32
    %175 = vector.broadcast %cst_62 : f32 to vector<2x64xf32>
    %176 = arith.select %172, %175, %162 : vector<2x64xi1>, vector<2x64xf32>
    %cst_63 = arith.constant dense<0xFF800000> : vector<2xf32>
    %177 = vector.multi_reduction <maximumf>, %176, %cst_63 [1] : vector<2x64xf32> to vector<2xf32>
    %178 = vector.shape_cast %177 : vector<2xf32> to vector<2x1xf32>
    %179 = vector.broadcast %178 : vector<2x1xf32> to vector<2x64xf32>
    %180 = arith.cmpf oeq, %176, %179 : vector<2x64xf32>
    %c64_i32_64 = arith.constant 64 : i32
    %181 = vector.broadcast %c64_i32_64 : i32 to vector<2x64xi32>
    %182 = arith.select %180, %63, %181 : vector<2x64xi1>, vector<2x64xi32>
    %cst_65 = arith.constant dense<2147483647> : vector<2xi32>
    %183 = vector.multi_reduction <minsi>, %182, %cst_65 [1] : vector<2x64xi32> to vector<2xi32>
    %184 = vector.shape_cast %183 : vector<2xi32> to vector<2x1xi32>
    %185 = vector.broadcast %184 : vector<2x1xi32> to vector<2x64xi32>
    %186 = arith.cmpi eq, %63, %185 : vector<2x64xi32>
    %cst_66 = arith.constant 1.000000e+00 : f32
    %187 = vector.broadcast %cst_66 : f32 to vector<2x64xf32>
    %188 = arith.select %186, %187, %174 : vector<2x64xi1>, vector<2x64xf32>
    %cst_67 = arith.constant 0xFF800000 : f32
    %189 = vector.broadcast %cst_67 : f32 to vector<2x64xf32>
    %190 = arith.select %186, %189, %176 : vector<2x64xi1>, vector<2x64xf32>
    %cst_68 = arith.constant dense<0xFF800000> : vector<2xf32>
    %191 = vector.multi_reduction <maximumf>, %190, %cst_68 [1] : vector<2x64xf32> to vector<2xf32>
    %192 = vector.shape_cast %191 : vector<2xf32> to vector<2x1xf32>
    %193 = vector.broadcast %192 : vector<2x1xf32> to vector<2x64xf32>
    %194 = arith.cmpf oeq, %190, %193 : vector<2x64xf32>
    %c64_i32_69 = arith.constant 64 : i32
    %195 = vector.broadcast %c64_i32_69 : i32 to vector<2x64xi32>
    %196 = arith.select %194, %63, %195 : vector<2x64xi1>, vector<2x64xi32>
    %cst_70 = arith.constant dense<2147483647> : vector<2xi32>
    %197 = vector.multi_reduction <minsi>, %196, %cst_70 [1] : vector<2x64xi32> to vector<2xi32>
    %198 = vector.shape_cast %197 : vector<2xi32> to vector<2x1xi32>
    %199 = vector.broadcast %198 : vector<2x1xi32> to vector<2x64xi32>
    %200 = arith.cmpi eq, %63, %199 : vector<2x64xi32>
    %cst_71 = arith.constant 1.000000e+00 : f32
    %201 = vector.broadcast %cst_71 : f32 to vector<2x64xf32>
    %202 = arith.select %200, %201, %188 : vector<2x64xi1>, vector<2x64xf32>
    %cst_72 = arith.constant 0xFF800000 : f32
    %203 = vector.broadcast %cst_72 : f32 to vector<2x64xf32>
    %204 = arith.select %200, %203, %190 : vector<2x64xi1>, vector<2x64xf32>
    %cst_73 = arith.constant dense<0xFF800000> : vector<2xf32>
    %205 = vector.multi_reduction <maximumf>, %204, %cst_73 [1] : vector<2x64xf32> to vector<2xf32>
    %206 = vector.shape_cast %205 : vector<2xf32> to vector<2x1xf32>
    %207 = vector.broadcast %206 : vector<2x1xf32> to vector<2x64xf32>
    %208 = arith.cmpf oeq, %204, %207 : vector<2x64xf32>
    %c64_i32_74 = arith.constant 64 : i32
    %209 = vector.broadcast %c64_i32_74 : i32 to vector<2x64xi32>
    %210 = arith.select %208, %63, %209 : vector<2x64xi1>, vector<2x64xi32>
    %cst_75 = arith.constant dense<2147483647> : vector<2xi32>
    %211 = vector.multi_reduction <minsi>, %210, %cst_75 [1] : vector<2x64xi32> to vector<2xi32>
    %212 = vector.shape_cast %211 : vector<2xi32> to vector<2x1xi32>
    %213 = vector.broadcast %212 : vector<2x1xi32> to vector<2x64xi32>
    %214 = arith.cmpi eq, %63, %213 : vector<2x64xi32>
    %cst_76 = arith.constant 1.000000e+00 : f32
    %215 = vector.broadcast %cst_76 : f32 to vector<2x64xf32>
    %216 = arith.select %214, %215, %202 : vector<2x64xi1>, vector<2x64xf32>
    %cst_77 = arith.constant 0xFF800000 : f32
    %217 = vector.broadcast %cst_77 : f32 to vector<2x64xf32>
    %218 = arith.select %214, %217, %204 : vector<2x64xi1>, vector<2x64xf32>
    %cst_78 = arith.constant dense<0xFF800000> : vector<2xf32>
    %219 = vector.multi_reduction <maximumf>, %218, %cst_78 [1] : vector<2x64xf32> to vector<2xf32>
    %220 = vector.shape_cast %219 : vector<2xf32> to vector<2x1xf32>
    %221 = vector.broadcast %220 : vector<2x1xf32> to vector<2x64xf32>
    %222 = arith.cmpf oeq, %218, %221 : vector<2x64xf32>
    %c64_i32_79 = arith.constant 64 : i32
    %223 = vector.broadcast %c64_i32_79 : i32 to vector<2x64xi32>
    %224 = arith.select %222, %63, %223 : vector<2x64xi1>, vector<2x64xi32>
    %cst_80 = arith.constant dense<2147483647> : vector<2xi32>
    %225 = vector.multi_reduction <minsi>, %224, %cst_80 [1] : vector<2x64xi32> to vector<2xi32>
    %226 = vector.shape_cast %225 : vector<2xi32> to vector<2x1xi32>
    %227 = vector.broadcast %226 : vector<2x1xi32> to vector<2x64xi32>
    %228 = arith.cmpi eq, %63, %227 : vector<2x64xi32>
    %cst_81 = arith.constant 1.000000e+00 : f32
    %229 = vector.broadcast %cst_81 : f32 to vector<2x64xf32>
    %230 = arith.select %228, %229, %216 : vector<2x64xi1>, vector<2x64xf32>
    %cst_82 = arith.constant 1.000000e+00 : f32
    %cst_83 = arith.constant 0.000000e+00 : f32
    %231 = vector.broadcast %cst_82 : f32 to vector<2x64xf32>
    %232 = vector.broadcast %cst_83 : f32 to vector<2x64xf32>
    %233 = arith.select %55, %231, %232 : vector<2x64xi1>, vector<2x64xf32>
    %234 = vector.shape_cast %62 : vector<2x1xi1> to vector<2x1xi1>
    %235 = vector.broadcast %234 : vector<2x1xi1> to vector<2x64xi1>
    %236 = arith.select %235, %233, %230 : vector<2x64xi1>, vector<2x64xf32>
    %cst_84 = arith.constant dense<0.000000e+00> : vector<2xf32>
    %237 = vector.multi_reduction <add>, %236, %cst_84 [1] : vector<2x64xf32> to vector<2xf32>
    %238 = vector.shape_cast %237 : vector<2xf32> to vector<2x1xf32>
    %239 = arith.truncf %236 : vector<2x64xf32> to vector<2x64xbf16>
    %cst_85 = arith.constant dense<0.000000e+00> : vector<2x1024xf32>
    %240 = tpu.matmul %239, %1, %cst_85 {dimension_numbers = #tpu.dot_dimension_numbers<[1], [0], [0], [1], [0, 0, 1, 1], [], []>} : vector<2x64xbf16>, vector<64x1024xbf16>, vector<2x1024xf32> -> vector<2x1024xf32>
    %241 = vector.broadcast %238 : vector<2x1xf32> to vector<2x1024xf32>
    %242 = arith.divf %240, %241 : vector<2x1024xf32>
    %cst_86 = arith.constant 9.99999996E-13 : f32
    %243 = vector.broadcast %cst_86 : f32 to vector<64x1xf32>
    %244 = arith.maximumf %13, %243 : vector<64x1xf32>
    %245 = math.rsqrt %244 : vector<64x1xf32>
    %cst_87 = arith.constant 9.99999996E-13 : f32
    %246 = vector.broadcast %cst_87 : f32 to vector<1x64xf32>
    %247 = arith.maximumf %11, %246 : vector<1x64xf32>
    %248 = math.rsqrt %247 : vector<1x64xf32>
    %cst_88 = arith.constant 2.000000e+00 : f32
    %249 = vector.broadcast %cst_88 : f32 to vector<64x1xf32>
    %250 = arith.mulf %249, %245 : vector<64x1xf32>
    %251 = vector.broadcast %250 : vector<64x1xf32> to vector<64x64xf32>
    %252 = arith.mulf %4, %251 : vector<64x64xf32>
    %253 = vector.broadcast %248 : vector<1x64xf32> to vector<64x64xf32>
    %254 = arith.mulf %252, %253 : vector<64x64xf32>
    %255 = vector.extract_strided_slice %236 {offsets = [1, 0], sizes = [1, 64], strides = [1, 1]} : vector<2x64xf32> to vector<1x64xf32>
    %cst_89 = arith.constant 0.000000e+00 : f32
    %256 = vector.broadcast %cst_89 : f32 to vector<1x64xf32>
    %257 = arith.cmpf ogt, %255, %256 : vector<1x64xf32>
    %cst_90 = arith.constant -1.000000e+30 : f32
    %258 = vector.shape_cast %257 : vector<1x64xi1> to vector<1x64xi1>
    %259 = vector.broadcast %258 : vector<1x64xi1> to vector<64x64xi1>
    %260 = vector.broadcast %cst_90 : f32 to vector<64x64xf32>
    %261 = arith.select %259, %254, %260 : vector<64x64xi1>, vector<64x64xf32>
    %cst_91 = arith.constant dense<0xFF800000> : vector<64xf32>
    %262 = vector.multi_reduction <maximumf>, %261, %cst_91 [1] : vector<64x64xf32> to vector<64xf32>
    %263 = vector.shape_cast %262 : vector<64xf32> to vector<64x1xf32>
    %264 = vector.broadcast %263 : vector<64x1xf32> to vector<64x64xf32>
    %265 = arith.subf %261, %264 : vector<64x64xf32>
    %266 = math.exp %265 : vector<64x64xf32>
    %cst_92 = arith.constant dense<0.000000e+00> : vector<64xf32>
    %267 = vector.multi_reduction <add>, %266, %cst_92 [1] : vector<64x64xf32> to vector<64xf32>
    %268 = vector.shape_cast %267 : vector<64xf32> to vector<64x1xf32>
    %269 = tpu.reciprocal %268 {approx = true} : vector<64x1xf32> -> vector<64x1xf32>
    %270 = vector.broadcast %269 : vector<64x1xf32> to vector<64x64xf32>
    %271 = arith.mulf %266, %270 : vector<64x64xf32>
    %272 = arith.truncf %271 : vector<64x64xf32> to vector<64x64xbf16>
    %cst_93 = arith.constant dense<0.000000e+00> : vector<64x1024xf32>
    %273 = tpu.matmul %272, %1, %cst_93 {dimension_numbers = #tpu.dot_dimension_numbers<[1], [0], [0], [1], [0, 0, 1, 1], [], []>} : vector<64x64xbf16>, vector<64x1024xbf16>, vector<64x1024xf32> -> vector<64x1024xf32>
    %274 = vector.extract_strided_slice %3 {offsets = [0, 0], sizes = [1, 1024], strides = [1, 1]} : vector<2x1024xf32> to vector<1x1024xf32>
    %cst_94 = arith.constant 5.000000e-01 : f32
    %275 = vector.broadcast %cst_94 : f32 to vector<1x1024xf32>
    %276 = arith.mulf %275, %274 : vector<1x1024xf32>
    %277 = vector.extract_strided_slice %242 {offsets = [0, 0], sizes = [1, 1024], strides = [1, 1]} : vector<2x1024xf32> to vector<1x1024xf32>
    %cst_95 = arith.constant 5.000000e-01 : f32
    %278 = vector.broadcast %cst_95 : f32 to vector<1x1024xf32>
    %279 = arith.mulf %278, %277 : vector<1x1024xf32>
    %280 = arith.addf %276, %279 : vector<1x1024xf32>
    %281 = vector.extract_strided_slice %242 {offsets = [1, 0], sizes = [1, 1024], strides = [1, 1]} : vector<2x1024xf32> to vector<1x1024xf32>
    %cst_96 = arith.constant 3.000000e-01 : f32
    %282 = vector.broadcast %cst_96 : f32 to vector<1x1024xf32>
    %283 = arith.mulf %282, %281 : vector<1x1024xf32>
    %cst_97 = arith.constant 0.699999988 : f32
    %284 = vector.broadcast %cst_97 : f32 to vector<64x1024xf32>
    %285 = arith.mulf %284, %273 : vector<64x1024xf32>
    %286 = vector.broadcast %283 : vector<1x1024xf32> to vector<64x1024xf32>
    %287 = arith.addf %286, %285 : vector<64x1024xf32>
    %288 = arith.truncf %280 : vector<1x1024xf32> to vector<1x1024xbf16>
    %cst_98 = arith.constant dense<0.000000e+00> : vector<1x64xf32>
    %289 = tpu.matmul %288, %1, %cst_98 {dimension_numbers = #tpu.dot_dimension_numbers<[1], [1], [0], [0], [0, 0, 1, 0], [], []>} : vector<1x1024xbf16>, vector<64x1024xbf16>, vector<1x64xf32> -> vector<1x64xf32>
    %290 = arith.mulf %280, %280 : vector<1x1024xf32>
    %cst_99 = arith.constant dense<0.000000e+00> : vector<1xf32>
    %291 = vector.multi_reduction <add>, %290, %cst_99 [1] : vector<1x1024xf32> to vector<1xf32>
    %292 = vector.shape_cast %291 : vector<1xf32> to vector<1x1xf32>
    %293 = vector.broadcast %292 : vector<1x1xf32> to vector<1x64xf32>
    %294 = arith.mulf %293, %11 : vector<1x64xf32>
    %cst_100 = arith.constant 1.000000e-16 : f32
    %295 = vector.broadcast %cst_100 : f32 to vector<1x64xf32>
    %296 = arith.maximumf %294, %295 : vector<1x64xf32>
    %297 = math.rsqrt %296 : vector<1x64xf32>
    %298 = arith.mulf %289, %297 : vector<1x64xf32>
    %299 = arith.extf %1 : vector<64x1024xbf16> to vector<64x1024xf32>
    %300 = arith.mulf %299, %287 : vector<64x1024xf32>
    %cst_101 = arith.constant dense<0.000000e+00> : vector<64xf32>
    %301 = vector.multi_reduction <add>, %300, %cst_101 [1] : vector<64x1024xf32> to vector<64xf32>
    %302 = vector.shape_cast %301 : vector<64xf32> to vector<64x1xf32>
    %303 = arith.mulf %287, %287 : vector<64x1024xf32>
    %cst_102 = arith.constant dense<0.000000e+00> : vector<64xf32>
    %304 = vector.multi_reduction <add>, %303, %cst_102 [1] : vector<64x1024xf32> to vector<64xf32>
    %305 = vector.shape_cast %304 : vector<64xf32> to vector<64x1xf32>
    %306 = arith.mulf %305, %13 : vector<64x1xf32>
    %cst_103 = arith.constant 1.000000e-16 : f32
    %307 = vector.broadcast %cst_103 : f32 to vector<64x1xf32>
    %308 = arith.maximumf %306, %307 : vector<64x1xf32>
    %309 = math.rsqrt %308 : vector<64x1xf32>
    %310 = arith.mulf %302, %309 : vector<64x1xf32>
    %cst_104 = arith.constant 0.000000e+00 : f32
    %311 = vector.shape_cast %310 : vector<64x1xf32> to vector<64x1xf32>
    %312 = vector.broadcast %311 : vector<64x1xf32> to vector<64x64xf32>
    %313 = vector.broadcast %cst_104 : f32 to vector<64x64xf32>
    %314 = arith.select %7, %312, %313 : vector<64x64xi1>, vector<64x64xf32>
    %cst_105 = arith.constant dense<0.000000e+00> : vector<64xf32>
    %315 = vector.multi_reduction <add>, %314, %cst_105 [0] : vector<64x64xf32> to vector<64xf32>
    %316 = vector.shape_cast %315 : vector<64xf32> to vector<1x64xf32>
    %c0_i32_106 = arith.constant 0 : i32
    %317 = vector.broadcast %c0_i32_106 : i32 to vector<2x64xi32>
    %318 = arith.cmpi eq, %38, %317 : vector<2x64xi32>
    %319 = vector.shape_cast %316 : vector<1x64xf32> to vector<1x64xf32>
    %320 = vector.broadcast %319 : vector<1x64xf32> to vector<2x64xf32>
    %321 = vector.shape_cast %298 : vector<1x64xf32> to vector<1x64xf32>
    %322 = vector.broadcast %321 : vector<1x64xf32> to vector<2x64xf32>
    %323 = arith.select %318, %320, %322 : vector<2x64xi1>, vector<2x64xf32>
    %cst_107 = arith.constant 1.000000e+01 : f32
    %324 = vector.broadcast %cst_107 : f32 to vector<2x64xf32>
    %325 = arith.mulf %324, %323 : vector<2x64xf32>
    %326 = vector.shape_cast %325 : vector<2x64xf32> to vector<1x2x64xf32>
    %c0_108 = arith.constant 0 : index
    %c0_109 = arith.constant 0 : index
    %c0_110 = arith.constant 0 : index
    %327 = vector.load %arg3[%c0_108, %c0_109, %c0_110] : memref<1x2x64xf32, #tpu.memory_space<vmem>>, vector<1x2x64xf32>
    tpu.vector_store %arg3[%c0_108, %c0_109, %c0_110], %326 {strides = array<i32>} : memref<1x2x64xf32, #tpu.memory_space<vmem>>, vector<1x2x64xf32>,
    return
  }
  func.func @transform_0(%arg0: i32) -> (i32, i32, i32) {
    %c0_i32 = arith.constant 0 : i32
    %c0_i32_0 = arith.constant 0 : i32
    %c0_i32_1 = arith.constant 0 : i32
    return %arg0, %c0_i32, %c0_i32_0 : i32, i32, i32
  }
  func.func @transform_1(%arg0: i32) -> (i32, i32, i32) {
    %c0_i32 = arith.constant 0 : i32
    %c0_i32_0 = arith.constant 0 : i32
    %c0_i32_1 = arith.constant 0 : i32
    return %arg0, %c0_i32, %c0_i32_0 : i32, i32, i32
  }
  func.func @transform_2(%arg0: i32) -> (i32, i32, i32) {
    %c0_i32 = arith.constant 0 : i32
    %c0_i32_0 = arith.constant 0 : i32
    %c0_i32_1 = arith.constant 0 : i32
    return %arg0, %c0_i32, %c0_i32_0 : i32, i32, i32
  }
}

</mosaic_0001>

<bundles_post_ra>
// kernel: _lambda_.3
= control target key start
LH: loop header
LB: loop body
LE: loop exit
PB: predicated region body
PF: predicated region fallthrough
CT: control target
= control target key end

     0   :  { %s1417_s12 = smov 0   ;;  %s1977_s0 = inlined_call_operand.vmem [shape: bf16[256,128], index: 0, kind: input, shape index: {}]   ;;  %s1978_s1 = inlined_call_operand.vmem [shape: bf16[128,1024], index: 1, kind: input, shape index: {}]   ;;  %s1979_s2 = inlined_call_operand.vmem [shape: f32[1,1024], index: 2, kind: input, shape index: {}]   ;;  %s1980_s3 = inlined_call_operand.vmem [shape: bf16[256,1024], index: 3, kind: output, shape index: {}]  }
   0x1 LB: > { %s1028_s13 = sadd.s32 4294967295, %s1395_s12   ;;  %p1032_p0 = scmp.ge.s32.totalorder %s1395_s12, 1  ;;  %s1395_s12 = sphi %s1417_s12, %s13_s12  }
   0x2   : > { %p138_p1 = scmp.lt.s32.totalorder %s1395_s12, 5 }
   0x4   : > { %p139_p2 = pnand %p1032_p0, %p138_p1 }
   0x5   : > { %s1033_s22 = sshll.u32 (!%p139_p2), %s1028_s13, 3 }
   0x6   : > { %142 = sbr.rel (%p139_p2) target bundleno = 307 (0x133), region = 32  ;;  %p164_p3 = scmp.lt.s32.totalorder (!%p139_p2), %s1033_s22, 31 }
   0xb   : > { %v1280_v0 = vld [vmem:[%s1978_s1 + $0x1c0] sm:$0xf]  ;;  %v1373_v2 = vld [vmem:[%s1978_s1 + $0x1c4] sm:$0xf]  ;;  %v1288_v5 = vld [vmem:[%s1978_s1 + $0x1c8] sm:$0xf] }
   0xc   : > { %v1377_v1 = vld [vmem:[%s1978_s1 + $0x1dc] sm:$0xf0]  ;;  %v1282_v4 = vld [vmem:[%s1978_s1 + $0x1e0] sm:$0xf0]  ;;  %v1378_v6 = vld [vmem:[%s1978_s1 + $0x1e4] sm:$0xf0] }
   0xd   : > { %v1281_v3 = vor.u32 %v1377_v1, %v1280_v0  ;;  %v1285_v7 = vor.u32 %v1373_v2, %v1282_v4  ;;  %v1289_v8 = vor.u32 %v1378_v6, %v1288_v5  ;;  %v1374_v9 = vld [vmem:[%s1978_s1 + $0x1cc] sm:$0xf]  ;;  %v1248_v11 = vld [vmem:[%s1978_s1 + $0x180] sm:$0xf]  ;;  %v1365_v14 = vld [vmem:[%s1978_s1 + $0x184] sm:$0xf] }
   0xe   : > { %v1290_v10 = vld [vmem:[%s1978_s1 + $0x1e8] sm:$0xf0]  ;;  %v1369_v13 = vld [vmem:[%s1978_s1 + $0x19c] sm:$0xf0]  ;;  %v1250_v15 = vld [vmem:[%s1978_s1 + $0x1a0] sm:$0xf0] }
   0xf   : > { %610 = vmatpush.bf16.msra.mxu0 %v1281_v3  ;;  %v1293_v12 = vor.u32 %v1374_v9, %v1290_v10  ;;  %639 = vmatpush.bf16.msra.mxu1 %v1285_v7  ;;  %v1249_v16 = vor.u32 %v1369_v13, %v1248_v11  ;;  %v1253_v17 = vor.u32 %v1365_v14, %v1250_v15  ;;  %v1256_v18 = vld [vmem:[%s1978_s1 + $0x188] sm:$0xf]  ;;  %v1366_v20 = vld [vmem:[%s1978_s1 + $0x18c] sm:$0xf]  ;;  %v1216_v23 = vld [vmem:[%s1978_s1 + $0x140] sm:$0xf] }
  0x10   : > { %668 = vmatpush.bf16.msra.mxu2 %v1289_v8  ;;  %v1370_v19 = vld [vmem:[%s1978_s1 + $0x1a4] sm:$0xf0]  ;;  %v1258_v22 = vld [vmem:[%s1978_s1 + $0x1a8] sm:$0xf0]  ;;  %v1361_v24 = vld [vmem:[%s1978_s1 + $0x15c] sm:$0xf0] }
  0x11   : > { %697 = vmatpush.bf16.msra.mxu3 %v1293_v12  ;;  %v1257_v21 = vor.u32 %v1370_v19, %v1256_v18  ;;  %v1261_v25 = vor.u32 %v1366_v20, %v1258_v22  ;;  %v1357_v26 = vld [vmem:[%s1978_s1 + $0x144] sm:$0xf]  ;;  %v1224_v28 = vld [vmem:[%s1978_s1 + $0x148] sm:$0xf]  ;;  %v1217_v29 = vor.u32 %v1361_v24, %v1216_v23  ;;  %v1358_v31 = vld [vmem:[%s1978_s1 + $0x14c] sm:$0xf] }
  0x12   : > { %v1218_v27 = vld [vmem:[%s1978_s1 + $0x160] sm:$0xf0]  ;;  %v1362_v30 = vld [vmem:[%s1978_s1 + $0x164] sm:$0xf0]  ;;  %v1226_v32 = vld [vmem:[%s1978_s1 + $0x168] sm:$0xf0] }
  0x13   : > { %611 = vmatpush.bf16.msra.mxu0 %v1249_v16  ;;  %640 = vmatpush.bf16.msra.mxu1 %v1253_v17  ;;  %v1221_v33 = vor.u32 %v1357_v26, %v1218_v27  ;;  %v1225_v34 = vor.u32 %v1362_v30, %v1224_v28  ;;  %v1184_v35 = vld [vmem:[%s1978_s1 + $0x100] sm:$0xf]  ;;  %v1349_v37 = vld [vmem:[%s1978_s1 + $0x104] sm:$0xf]  ;;  %v1229_v38 = vor.u32 %v1358_v31, %v1226_v32  ;;  %v1192_v40 = vld [vmem:[%s1978_s1 + $0x108] sm:$0xf] }
  0x14   : > { %669 = vmatpush.bf16.msra.mxu2 %v1257_v21  ;;  %v1353_v36 = vld [vmem:[%s1978_s1 + $0x11c] sm:$0xf0]  ;;  %v1186_v39 = vld [vmem:[%s1978_s1 + $0x120] sm:$0xf0]  ;;  %v1354_v41 = vld [vmem:[%s1978_s1 + $0x124] sm:$0xf0] }
  0x15   : > { %698 = vmatpush.bf16.msra.mxu3 %v1261_v25  ;;  %v1350_v42 = vld [vmem:[%s1978_s1 + $0x10c] sm:$0xf]  ;;  %v1185_v44 = vor.u32 %v1353_v36, %v1184_v35  ;;  %v1189_v45 = vor.u32 %v1349_v37, %v1186_v39  ;;  %v1193_v46 = vor.u32 %v1354_v41, %v1192_v40  ;;  %v1152_v47 = vld [vmem:[%s1978_s1 + $0xc0] sm:$0xf]  ;;  %v1341_v49 = vld [vmem:[%s1978_s1 + $0xc4] sm:$0xf] }
  0x16   : > { %v1194_v43 = vld [vmem:[%s1978_s1 + $0x128] sm:$0xf0]  ;;  %v1345_v48 = vld [vmem:[%s1978_s1 + $0xdc] sm:$0xf0]  ;;  %v1154_v51 = vld [vmem:[%s1978_s1 + $0xe0] sm:$0xf0] }
  0x17   : > { %612 = vmatpush.bf16.msra.mxu0 %v1217_v29  ;;  %641 = vmatpush.bf16.msra.mxu1 %v1221_v33  ;;  %v1197_v50 = vor.u32 %v1350_v42, %v1194_v43  ;;  %v1160_v52 = vld [vmem:[%s1978_s1 + $0xc8] sm:$0xf]  ;;  %v1342_v54 = vld [vmem:[%s1978_s1 + $0xcc] sm:$0xf]  ;;  %v1153_v56 = vor.u32 %v1345_v48, %v1152_v47  ;;  %v1157_v57 = vor.u32 %v1341_v49, %v1154_v51  ;;  %v1120_v59 = vld [vmem:[%s1978_s1 + $0x80] sm:$0xf] }
  0x18   : > { %670 = vmatpush.bf16.msra.mxu2 %v1225_v34  ;;  %v1346_v53 = vld [vmem:[%s1978_s1 + $0xe4] sm:$0xf0]  ;;  %v1162_v55 = vld [vmem:[%s1978_s1 + $0xe8] sm:$0xf0]  ;;  %v1337_v60 = vld [vmem:[%s1978_s1 + $0x9c] sm:$0xf0] }
  0x19   : > { %699 = vmatpush.bf16.msra.mxu3 %v1229_v38  ;;  %v1161_v58 = vor.u32 %v1346_v53, %v1160_v52  ;;  %v1333_v61 = vld [vmem:[%s1978_s1 + $0x84] sm:$0xf]  ;;  %v1165_v62 = vor.u32 %v1342_v54, %v1162_v55  ;;  %v1128_v0 = vld [vmem:[%s1978_s1 + $0x88] sm:$0xf]  ;;  %v1334_v2 = vld [vmem:[%s1978_s1 + $0x8c] sm:$0xf]  ;;  %v1121_v4 = vor.u32 %v1337_v60, %v1120_v59 }
  0x1a   : > { %v1122_v63 = vld [vmem:[%s1978_s1 + $0xa0] sm:$0xf0]  ;;  %v1338_v1 = vld [vmem:[%s1978_s1 + $0xa4] sm:$0xf0]  ;;  %v1130_v3 = vld [vmem:[%s1978_s1 + $0xa8] sm:$0xf0] }
  0x1b   : > { %613 = vmatpush.bf16.msra.mxu0 %v1185_v44  ;;  %642 = vmatpush.bf16.msra.mxu1 %v1189_v45  ;;  %v1088_v5 = vld [vmem:[%s1978_s1 + $0x40] sm:$0xf]  ;;  %v1125_v6 = vor.u32 %v1333_v61, %v1122_v63  ;;  %v1129_v7 = vor.u32 %v1338_v1, %v1128_v0  ;;  %v1325_v9 = vld [vmem:[%s1978_s1 + $0x44] sm:$0xf]  ;;  %v1133_v11 = vor.u32 %v1334_v2, %v1130_v3  ;;  %v1096_v12 = vld [vmem:[%s1978_s1 + $0x48] sm:$0xf] }
  0x1c   : > { %671 = vmatpush.bf16.msra.mxu2 %v1193_v46  ;;  %v1329_v8 = vld [vmem:[%s1978_s1 + $0x5c] sm:$0xf0]  ;;  %v1090_v10 = vld [vmem:[%s1978_s1 + $0x60] sm:$0xf0]  ;;  %v1330_v13 = vld [vmem:[%s1978_s1 + $0x64] sm:$0xf0] }
  0x1d   : > { %700 = vmatpush.bf16.msra.mxu3 %v1197_v50  ;;  %v1326_v14 = vld [vmem:[%s1978_s1 + $0x4c] sm:$0xf]  ;;  %v1089_v16 = vor.u32 %v1329_v8, %v1088_v5  ;;  %v1056_v17 = vld [vmem:[%s1978_s1] sm:$0xf]  ;;  %v1317_v19 = vld [vmem:[%s1978_s1 + $0x4] sm:$0xf]  ;;  %v1093_v20 = vor.u32 %v1325_v9, %v1090_v10  ;;  %v1097_v21 = vor.u32 %v1330_v13, %v1096_v12 }
  0x1e   : > { %v1098_v15 = vld [vmem:[%s1978_s1 + $0x68] sm:$0xf0]  ;;  %v1321_v18 = vld [vmem:[%s1978_s1 + $0x1c] sm:$0xf0]  ;;  %v1058_v22 = vld [vmem:[%s1978_s1 + $0x20] sm:$0xf0] }
  0x1f   : > { %614 = vmatpush.bf16.msra.mxu0 %v1153_v56  ;;  %643 = vmatpush.bf16.msra.mxu1 %v1157_v57  ;;  %v1064_v23 = vld [vmem:[%s1978_s1 + $0x8] sm:$0xf]  ;;  %s1982_s22 = smov (!%p164_p3, %s1033_s22), 31  ;;  %v1101_v24 = vor.u32 %v1326_v14, %v1098_v15  ;;  %v1318_v26 = vld [vmem:[%s1978_s1 + $0xc] sm:$0xf]  ;;  %v1057_v30 = vor.u32 %v1321_v18, %v1056_v17  ;;  %v1061_v33 = vor.u32 %v1317_v19, %v1058_v22 }
  0x20   : > { %672 = vmatpush.bf16.msra.mxu2 %v1161_v58  ;;  %v1322_v25 = vld [vmem:[%s1978_s1 + $0x24] sm:$0xf0]  ;;  %v1066_v27 = vld [vmem:[%s1978_s1 + $0x28] sm:$0xf0]  ;;  %s1034_s17 = sshll.u32 %s1982_s22, 2  ;;  %s1312_s13 = sshll.u32 %s1982_s22, 5 }
  0x21   : > { %701 = vmatpush.bf16.msra.mxu3 %v1165_v62  ;;  %v1304_v28 = vld [vmem:[%s1978_s1 + $0x1d8] sm:$0xf]  ;;  %s1631_s25 = scalar_lea.vmem %s1977_s0, %s1034_s17  ;;  %v1376_v31 = vld [vmem:[%s1978_s1 + $0x1dc] sm:$0xf]  ;;  %v1065_v34 = vor.u32 %v1322_v25, %v1064_v23  ;;  %v1296_v35 = vld [vmem:[%s1978_s1 + $0x1d0] sm:$0xf]  ;;  %v1069_v36 = vor.u32 %v1318_v26, %v1066_v27  ;;  %s1863_s6 = scalar_lea.vmem %s1980_s3, %s1312_s13 }
  0x22   : > { %v1380_v29 = vld [vmem:[%s1978_s1 + $0x1f4] sm:$0xf0]  ;;  %v1306_v32 = vld [vmem:[%s1978_s1 + $0x1f8] sm:$0xf0]  ;;  %v1379_v38 = vld [vmem:[%s1978_s1 + $0x1ec] sm:$0xf0] }
  0x23   : > { %615 = vmatpush.bf16.msra.mxu0 %v1121_v4  ;;  %644 = vmatpush.bf16.msra.mxu1 %v1125_v6  ;;  %v1305_v37 = vor.u32 %v1380_v29, %v1304_v28  ;;  %v1375_v39 = vld [vmem:[%s1978_s1 + $0x1d4] sm:$0xf]  ;;  %v1652_v41 = vld [vmem:[%s1631_s25] sm:$0xff]  ;;  %v1309_v42 = vor.u32 %v1376_v31, %v1306_v32  ;;  %v1272_v43 = vld [vmem:[%s1978_s1 + $0x198] sm:$0xf]  ;;  %v1297_v47 = vor.u32 %v1379_v38, %v1296_v35 }
  0x24   : > { %673 = vmatpush.bf16.msra.mxu2 %v1129_v7  ;;  %v1298_v40 = vld [vmem:[%s1978_s1 + $0x1f0] sm:$0xf0]  ;;  %v1372_v44 = vld [vmem:[%s1978_s1 + $0x1b4] sm:$0xf0]  ;;  %v1368_v45 = vld [vmem:[%s1978_s1 + $0x19c] sm:$0xf] }
  0x25   : > { %702 = vmatpush.bf16.msra.mxu3 %v1133_v11  ;;  %v1274_v46 = vld [vmem:[%s1978_s1 + $0x1b8] sm:$0xf0]  ;;  %v1301_v48 = vor.u32 %v1375_v39, %v1298_v40  ;;  %v1273_v49 = vor.u32 %v1372_v44, %v1272_v43  ;;  %v1264_v50 = vld [vmem:[%s1978_s1 + $0x190] sm:$0xf]  ;;  %v1367_v52 = vld [vmem:[%s1978_s1 + $0x194] sm:$0xf] }
  0x26   : > { %v1371_v51 = vld [vmem:[%s1978_s1 + $0x1ac] sm:$0xf0]  ;;  %v1277_v53 = vor.u32 %v1368_v45, %v1274_v46  ;;  %v1266_v54 = vld [vmem:[%s1978_s1 + $0x1b0] sm:$0xf0]  ;;  %v1240_v55 = vld [vmem:[%s1978_s1 + $0x158] sm:$0xf] }
  0x27   : > { %616 = vmatpush.bf16.msra.mxu0 %v1089_v16  ;;  %645 = vmatpush.bf16.msra.mxu1 %v1093_v20  ;;  %v1364_v56 = vld [vmem:[%s1978_s1 + $0x174] sm:$0xf0]  ;;  %v1360_v57 = vld [vmem:[%s1978_s1 + $0x15c] sm:$0xf]  ;;  %v1265_v59 = vor.u32 %v1371_v51, %v1264_v50  ;;  %v1269_v60 = vor.u32 %v1367_v52, %v1266_v54  ;;  %v1232_v62 = vld [vmem:[%s1978_s1 + $0x150] sm:$0xf] }
  0x28   : > { %674 = vmatpush.bf16.msra.mxu2 %v1097_v21  ;;  %v1242_v58 = vld [vmem:[%s1978_s1 + $0x178] sm:$0xf0]  ;;  %v1241_v61 = vor.u32 %v1364_v56, %v1240_v55  ;;  %v1363_v63 = vld [vmem:[%s1978_s1 + $0x16c] sm:$0xf0]  ;;  %v1359_v0 = vld [vmem:[%s1978_s1 + $0x154] sm:$0xf] }
  0x29   : > { %703 = vmatpush.bf16.msra.mxu3 %v1101_v24  ;;  %v1245_v1 = vor.u32 %v1360_v57, %v1242_v58  ;;  %v1234_v2 = vld [vmem:[%s1978_s1 + $0x170] sm:$0xf0]  ;;  %v1208_v3 = vld [vmem:[%s1978_s1 + $0x118] sm:$0xf]  ;;  %v1352_v5 = vld [vmem:[%s1978_s1 + $0x11c] sm:$0xf]  ;;  %v1233_v7 = vor.u32 %v1363_v63, %v1232_v62 }
  0x2a   : > { %v1356_v4 = vld [vmem:[%s1978_s1 + $0x134] sm:$0xf0]  ;;  %v1210_v6 = vld [vmem:[%s1978_s1 + $0x138] sm:$0xf0]  ;;  %v1237_v8 = vor.u32 %v1359_v0, %v1234_v2  ;;  %v1200_v10 = vld [vmem:[%s1978_s1 + $0x110] sm:$0xf] }
  0x2b   : > { %617 = vmatpush.bf16.msra.mxu0 %v1057_v30  ;;  %646 = vmatpush.bf16.msra.mxu1 %v1061_v33  ;;  %v1209_v9 = vor.u32 %v1356_v4, %v1208_v3  ;;  %v1355_v11 = vld [vmem:[%s1978_s1 + $0x12c] sm:$0xf0]  ;;  %v1351_v12 = vld [vmem:[%s1978_s1 + $0x114] sm:$0xf]  ;;  %v1213_v13 = vor.u32 %v1352_v5, %v1210_v6  ;;  %v1176_v15 = vld [vmem:[%s1978_s1 + $0xd8] sm:$0xf] }
  0x2c   : > { %675 = vmatpush.bf16.msra.mxu2 %v1065_v34  ;;  %v1202_v14 = vld [vmem:[%s1978_s1 + $0x130] sm:$0xf0]  ;;  %v1348_v16 = vld [vmem:[%s1978_s1 + $0xf4] sm:$0xf0]  ;;  %v1344_v17 = vld [vmem:[%s1978_s1 + $0xdc] sm:$0xf]  ;;  %v1201_v20 = vor.u32 %v1355_v11, %v1200_v10 }
  0x2d   : > { %704 = vmatpush.bf16.msra.mxu3 %v1069_v36  ;;  %v1178_v18 = vld [vmem:[%s1978_s1 + $0xf8] sm:$0xf0]  ;;  %v1743_v19 = vld [vmem:[%s1631_s25 + $0x8] sm:$0xff]  ;;  %v1205_v21 = vor.u32 %v1351_v12, %v1202_v14  ;;  %v1177_v22 = vor.u32 %v1348_v16, %v1176_v15  ;;  %v1168_v23 = vld [vmem:[%s1978_s1 + $0xd0] sm:$0xf] }
  0x2e   : > { %618 = vmatmul.bf16.vlgmr.msra.gmra.mxu0 %v1652_v41  ;;  %647 = vmatmul.bf16.vlgmr.msra.gmra.mxu1 %v1652_v41  ;;  %v1347_v24 = vld [vmem:[%s1978_s1 + $0xec] sm:$0xf0]  ;;  %v1343_v25 = vld [vmem:[%s1978_s1 + $0xd4] sm:$0xf]  ;;  %v1181_v26 = vor.u32 %v1344_v17, %v1178_v18  ;;  %v1144_v28 = vld [vmem:[%s1978_s1 + $0x98] sm:$0xf] }
  0x2f   : > { %676 = vmatmul.bf16.vlgmr.msra.gmra.mxu2 %v1652_v41  ;;  %726 = vmatpush.bf16.msrb.mxu0 %v1297_v47  ;;  %v1170_v27 = vld [vmem:[%s1978_s1 + $0xf0] sm:$0xf0]  ;;  %v1340_v29 = vld [vmem:[%s1978_s1 + $0xb4] sm:$0xf0]  ;;  %v1336_v30 = vld [vmem:[%s1978_s1 + $0x9c] sm:$0xf]  ;;  %v1169_v32 = vor.u32 %v1347_v24, %v1168_v23 }
  0x30   : > { %784 = vmatpush.bf16.msrb.mxu2 %v1305_v37  ;;  %705 = vmatmul.bf16.vlgmr.msra.gmra.mxu3 %v1652_v41  ;;  %v1146_v31 = vld [vmem:[%s1978_s1 + $0xb8] sm:$0xf0]  ;;  %v1173_v33 = vor.u32 %v1343_v25, %v1170_v27  ;;  %v1145_v34 = vor.u32 %v1340_v29, %v1144_v28  ;;  %v1136_v35 = vld [vmem:[%s1978_s1 + $0x90] sm:$0xf]  ;;  %v1335_v38 = vld [vmem:[%s1978_s1 + $0x94] sm:$0xf] }
  0x31   : > { %813 = vmatpush.bf16.msrb.mxu3 %v1309_v42  ;;  %755 = vmatpush.bf16.msrb.mxu1 %v1301_v48  ;;  %v1339_v36 = vld [vmem:[%s1978_s1 + $0xac] sm:$0xf0]  ;;  %v1149_v37 = vor.u32 %v1336_v30, %v1146_v31  ;;  %v1138_v39 = vld [vmem:[%s1978_s1 + $0xb0] sm:$0xf0]  ;;  %v1112_v42 = vld [vmem:[%s1978_s1 + $0x58] sm:$0xf] }
  0x32   : > { %v1137_v40 = vor.u32 %v1339_v36, %v1136_v35  ;;  %v1332_v43 = vld [vmem:[%s1978_s1 + $0x74] sm:$0xf0]  ;;  %v1328_v44 = vld [vmem:[%s1978_s1 + $0x5c] sm:$0xf]  ;;  %v1141_v45 = vor.u32 %v1335_v38, %v1138_v39  ;;  %v1104_v48 = vld [vmem:[%s1978_s1 + $0x50] sm:$0xf] }
  0x33   : > { %727 = vmatpush.bf16.msrb.mxu0 %v1265_v59  ;;  %v1113_v46 = vor.u32 %v1332_v43, %v1112_v42  ;;  %v1114_v47 = vld [vmem:[%s1978_s1 + $0x78] sm:$0xf0]  ;;  %v1327_v51 = vld [vmem:[%s1978_s1 + $0x54] sm:$0xf]  ;;  %v1324_v54 = vld [vmem:[%s1978_s1 + $0x34] sm:$0xf0] }
  0x34   : > { %785 = vmatpush.bf16.msrb.mxu2 %v1273_v49  ;;  %v1331_v49 = vld [vmem:[%s1978_s1 + $0x6c] sm:$0xf0]  ;;  %v1117_v50 = vor.u32 %v1328_v44, %v1114_v47  ;;  %v1106_v52 = vld [vmem:[%s1978_s1 + $0x70] sm:$0xf0]  ;;  %v1320_v55 = vld [vmem:[%s1978_s1 + $0x1c] sm:$0xf] }
  0x35   : > { %814 = vmatpush.bf16.msrb.mxu3 %v1277_v53  ;;  %756 = vmatpush.bf16.msrb.mxu1 %v1269_v60  ;;  %v1080_v53 = vld [vmem:[%s1978_s1 + $0x18] sm:$0xf]  ;;  %v1082_v56 = vld [vmem:[%s1978_s1 + $0x38] sm:$0xf0]  ;;  %v1105_v57 = vor.u32 %v1331_v49, %v1104_v48  ;;  %v1109_v58 = vor.u32 %v1327_v51, %v1106_v52  ;;  %v1072_v60 = vld [vmem:[%s1978_s1 + $0x10] sm:$0xf] }
  0x36   : > { %v1081_v59 = vor.u32 %v1324_v54, %v1080_v53  ;;  %v1085_v62 = vor.u32 %v1320_v55, %v1082_v56  ;;  %v1319_v63 = vld [vmem:[%s1978_s1 + $0x14] sm:$0xf]  ;;  %v1316_v4 = vld [vmem:[%s1631_s25 + $0x18] sm:$0xff] }
  0x37   : > { %728 = vmatpush.bf16.msrb.mxu0 %v1233_v7  ;;  %v1074_v0 = vld [vmem:[%s1978_s1 + $0x30] sm:$0xf0] }
  0x38   : > { %786 = vmatpush.bf16.msrb.mxu2 %v1241_v61  ;;  %v1323_v61 = vld [vmem:[%s1978_s1 + $0x2c] sm:$0xf0]  ;;  %v1077_v2 = vor.u32 %v1319_v63, %v1074_v0 }
  0x39   : > { %815 = vmatpush.bf16.msrb.mxu3 %v1245_v1  ;;  %757 = vmatpush.bf16.msrb.mxu1 %v1237_v8  ;;  %v1073_v1 = vor.u32 %v1323_v61, %v1072_v60  ;;  %v1315_v3 = vld [vmem:[%s1631_s25 + $0x10] sm:$0xff] }
  0x3b   : > { %729 = vmatpush.bf16.msrb.mxu0 %v1201_v20 }
  0x3c   : > { %787 = vmatpush.bf16.msrb.mxu2 %v1209_v9 }
  0x3d   : > { %816 = vmatpush.bf16.msrb.mxu3 %v1213_v13  ;;  %758 = vmatpush.bf16.msrb.mxu1 %v1205_v21 }
  0x3e   : > { %623 = vmatmul.bf16.gmra.mxu0 %v1743_v19  ;;  %652 = vmatmul.bf16.gmra.mxu1 %v1743_v19 }
  0x3f   : > { %681 = vmatmul.bf16.gmra.mxu2 %v1743_v19  ;;  %730 = vmatpush.bf16.msrb.mxu0 %v1169_v32 }
  0x40   : > { %788 = vmatpush.bf16.msrb.mxu2 %v1177_v22  ;;  %710 = vmatmul.bf16.gmra.mxu3 %v1743_v19 }
  0x41   : > { %817 = vmatpush.bf16.msrb.mxu3 %v1181_v26  ;;  %759 = vmatpush.bf16.msrb.mxu1 %v1173_v33 }
  0x43   : > { %731 = vmatpush.bf16.msrb.mxu0 %v1137_v40 }
  0x44   : > { %789 = vmatpush.bf16.msrb.mxu2 %v1145_v34 }
  0x45   : > { %818 = vmatpush.bf16.msrb.mxu3 %v1149_v37  ;;  %760 = vmatpush.bf16.msrb.mxu1 %v1141_v45 }
  0x47   : > { %732 = vmatpush.bf16.msrb.mxu0 %v1105_v57 }
  0x48   : > { %790 = vmatpush.bf16.msrb.mxu2 %v1113_v46 }
  0x49   : > { %819 = vmatpush.bf16.msrb.mxu3 %v1117_v50  ;;  %761 = vmatpush.bf16.msrb.mxu1 %v1109_v58 }
  0x4b   : > { %733 = vmatpush.bf16.msrb.mxu0 %v1073_v1 }
  0x4c   : > { %791 = vmatpush.bf16.msrb.mxu2 %v1081_v59 }
  0x4d   : > { %820 = vmatpush.bf16.msrb.mxu3 %v1085_v62  ;;  %762 = vmatpush.bf16.msrb.mxu1 %v1077_v2 }
  0x4e   : > { %628 = vmatmul.bf16.gmra.mxu0 %v1315_v3  ;;  %657 = vmatmul.bf16.gmra.mxu1 %v1315_v3 }
  0x4f   : > { %686 = vmatmul.bf16.gmra.mxu2 %v1315_v3 }
  0x50   : > { %715 = vmatmul.bf16.gmra.mxu3 %v1315_v3 }
  0x5e   : > { %633 = vmatmul.bf16.gmra.mxu0 %v1316_v4  ;;  %662 = vmatmul.bf16.gmra.mxu1 %v1316_v4 }
  0x5f   : > { %691 = vmatmul.bf16.gmra.mxu2 %v1316_v4 }
  0x60   : > { %720 = vmatmul.bf16.gmra.mxu3 %v1316_v4 }
  0x6e   : > { %734 = vmatmul.bf16.vlgmr.msrb.gmra.mxu0 %v1652_v41  ;;  %763 = vmatmul.bf16.vlgmr.msrb.gmra.mxu1 %v1652_v41 }
  0x6f   : > { %792 = vmatmul.bf16.vlgmr.msrb.gmra.mxu2 %v1652_v41 }
  0x70   : > { %821 = vmatmul.bf16.vlgmr.msrb.gmra.mxu3 %v1652_v41  ;;  %v1846_v41 = vld [vmem:[%s1979_s2] sm:$0xff] }
  0x71   : > { %v1849_v5 = vperm.slane %v1846_v41, 0  ;;  %v1852_v6 = vperm.slane %v1846_v41, 1  ;;  %v1858_v13 = vperm.slane %v1846_v41, 2  ;;  %v1866_v14 = vperm.slane %v1846_v41, 3 }
  0x7e   : > { %739 = vmatmul.bf16.gmra.mxu0 %v1743_v19  ;;  %768 = vmatmul.bf16.gmra.mxu1 %v1743_v19 }
  0x7f   : > { %797 = vmatmul.bf16.gmra.mxu2 %v1743_v19 }
  0x80   : > { %826 = vmatmul.bf16.gmra.mxu3 %v1743_v19 }
  0x8e   : > { %744 = vmatmul.bf16.gmra.mxu0 %v1315_v3  ;;  %773 = vmatmul.bf16.gmra.mxu1 %v1315_v3 }
  0x8f   : > { %802 = vmatmul.bf16.gmra.mxu2 %v1315_v3 }
  0x90   : > { %831 = vmatmul.bf16.gmra.mxu3 %v1315_v3 }
  0x9e   : > { %749 = vmatmul.bf16.gmra.mxu0 %v1316_v4  ;;  %778 = vmatmul.bf16.gmra.mxu1 %v1316_v4 }
  0x9f   : > { %807 = vmatmul.bf16.gmra.mxu2 %v1316_v4 }
  0xa0   : > { %836 = vmatmul.bf16.gmra.mxu3 %v1316_v4 }
  0xab   : > { %v619_v7 = vpop.f32.mrf.mxu0  ;;  %v648_v9 = vpop.f32.mrf.mxu1 }
  0xac   : > { %v620_v8 = vadd.f32 %v619_v7, %v1849_v5  ;;  %v649_v10 = vadd.f32 %v648_v9, %v1852_v6 }
  0xae   : > { %v842_v11 = vmax.f32 %v620_v8, 0.0  ;;  %v843_v12 = vmax.f32 %v649_v10, 0.0 }
  0xb0   : > { %v906_v15 = vpack.c.bf16 %v843_v12, %v842_v11 }
  0xb2   : > { %v677_v16 = vpop.f32.mrf.mxu2  ;;  %938 = vst [vmem:[%s1863_s6] sm:$0xff] %v906_v15 }
  0xb3   : > { %v678_v17 = vadd.f32 %v677_v16, %v1858_v13  ;;  %v706_v18 = vpop.f32.mrf.mxu3  ;;  %v621_v19 = vpop.f32.mrf.mxu0 }
  0xb4   : > { %v707_v20 = vadd.f32 %v706_v18, %v1866_v14  ;;  %v622_v21 = vadd.f32 %v621_v19, %v1849_v5  ;;  %v650_v22 = vpop.f32.mrf.mxu1 }
  0xb5   : > { %v844_v23 = vmax.f32 %v678_v17, 0.0  ;;  %v651_v24 = vadd.f32 %v650_v22, %v1852_v6 }
  0xb6   : > { %v845_v25 = vmax.f32 %v707_v20, 0.0  ;;  %v850_v26 = vmax.f32 %v622_v21, 0.0 }
  0xb7   : > { %v851_v27 = vmax.f32 %v651_v24, 0.0 }
  0xb8   : > { %v907_v28 = vpack.c.bf16 %v845_v25, %v844_v23 }
  0xb9   : > { %v910_v29 = vpack.c.bf16 %v851_v27, %v850_v26 }
  0xba   : > { %939 = vst [vmem:[%s1863_s6 + $0x8] sm:$0xff] %v907_v28  ;;  %v679_v30 = vpop.f32.mrf.mxu2 }
  0xbb   : > { %942 = vst [vmem:[%s1863_s6 + $0x20] sm:$0xff] %v910_v29  ;;  %v680_v31 = vadd.f32 %v679_v30, %v1858_v13  ;;  %v708_v32 = vpop.f32.mrf.mxu3  ;;  %v624_v33 = vpop.f32.mrf.mxu0 }
  0xbc   : > { %v709_v34 = vadd.f32 %v708_v32, %v1866_v14  ;;  %v625_v35 = vadd.f32 %v624_v33, %v1849_v5  ;;  %v653_v36 = vpop.f32.mrf.mxu1 }
  0xbd   : > { %v852_v37 = vmax.f32 %v680_v31, 0.0  ;;  %v654_v38 = vadd.f32 %v653_v36, %v1852_v6 }
  0xbe   : > { %v853_v39 = vmax.f32 %v709_v34, 0.0  ;;  %v858_v40 = vmax.f32 %v625_v35, 0.0 }
  0xbf   : > { %v859_v42 = vmax.f32 %v654_v38, 0.0 }
  0xc0   : > { %v911_v43 = vpack.c.bf16 %v853_v39, %v852_v37 }
  0xc1   : > { %v914_v44 = vpack.c.bf16 %v859_v42, %v858_v40 }
  0xc2   : > { %943 = vst [vmem:[%s1863_s6 + $0x28] sm:$0xff] %v911_v43  ;;  %v682_v45 = vpop.f32.mrf.mxu2 }
  0xc3   : > { %946 = vst [vmem:[%s1863_s6 + $0x40] sm:$0xff] %v914_v44  ;;  %v683_v46 = vadd.f32 %v682_v45, %v1858_v13  ;;  %v711_v47 = vpop.f32.mrf.mxu3  ;;  %v626_v48 = vpop.f32.mrf.mxu0 }
  0xc4   : > { %v712_v49 = vadd.f32 %v711_v47, %v1866_v14  ;;  %v627_v50 = vadd.f32 %v626_v48, %v1849_v5  ;;  %v655_v51 = vpop.f32.mrf.mxu1 }
  0xc5   : > { %v860_v52 = vmax.f32 %v683_v46, 0.0  ;;  %v656_v53 = vadd.f32 %v655_v51, %v1852_v6 }
  0xc6   : > { %v861_v54 = vmax.f32 %v712_v49, 0.0  ;;  %v866_v55 = vmax.f32 %v627_v50, 0.0 }
  0xc7   : > { %v867_v56 = vmax.f32 %v656_v53, 0.0 }
  0xc8   : > { %v915_v57 = vpack.c.bf16 %v861_v54, %v860_v52 }
  0xc9   : > { %v918_v58 = vpack.c.bf16 %v867_v56, %v866_v55  ;;  %v1910_v55 = vperm.slane %v1846_v41, 4 }
  0xca   : > { %947 = vst [vmem:[%s1863_s6 + $0x48] sm:$0xff] %v915_v57  ;;  %v684_v59 = vpop.f32.mrf.mxu2  ;;  %v1913_v57 = vperm.slane %v1846_v41, 5 }
  0xcb   : > { %950 = vst [vmem:[%s1863_s6 + $0x60] sm:$0xff] %v918_v58  ;;  %v685_v60 = vadd.f32 %v684_v59, %v1858_v13  ;;  %v713_v61 = vpop.f32.mrf.mxu3  ;;  %v629_v62 = vpop.f32.mrf.mxu0 }
  0xcc   : > { %v714_v63 = vadd.f32 %v713_v61, %v1866_v14  ;;  %v630_v0 = vadd.f32 %v629_v62, %v1849_v5  ;;  %v658_v1 = vpop.f32.mrf.mxu1 }
  0xcd   : > { %v868_v2 = vmax.f32 %v685_v60, 0.0  ;;  %v659_v3 = vadd.f32 %v658_v1, %v1852_v6 }
  0xce   : > { %v869_v4 = vmax.f32 %v714_v63, 0.0  ;;  %v874_v7 = vmax.f32 %v630_v0, 0.0 }
  0xcf   : > { %v875_v8 = vmax.f32 %v659_v3, 0.0 }
  0xd0   : > { %v919_v9 = vpack.c.bf16 %v869_v4, %v868_v2  ;;  %v1922_v4 = vperm.slane %v1846_v41, 6 }
  0xd1   : > { %v922_v10 = vpack.c.bf16 %v875_v8, %v874_v7 }
  0xd2   : > { %951 = vst [vmem:[%s1863_s6 + $0x68] sm:$0xff] %v919_v9  ;;  %v687_v11 = vpop.f32.mrf.mxu2 }
  0xd3   : > { %954 = vst [vmem:[%s1863_s6 + $0x80] sm:$0xff] %v922_v10  ;;  %v688_v12 = vadd.f32 %v687_v11, %v1858_v13  ;;  %v716_v15 = vpop.f32.mrf.mxu3  ;;  %v631_v16 = vpop.f32.mrf.mxu0 }
  0xd4   : > { %v717_v17 = vadd.f32 %v716_v15, %v1866_v14  ;;  %v632_v18 = vadd.f32 %v631_v16, %v1849_v5  ;;  %v660_v19 = vpop.f32.mrf.mxu1 }
  0xd5   : > { %v876_v20 = vmax.f32 %v688_v12, 0.0  ;;  %v661_v21 = vadd.f32 %v660_v19, %v1852_v6 }
  0xd6   : > { %v877_v22 = vmax.f32 %v717_v17, 0.0  ;;  %v882_v23 = vmax.f32 %v632_v18, 0.0 }
  0xd7   : > { %v883_v24 = vmax.f32 %v661_v21, 0.0 }
  0xd8   : > { %v923_v25 = vpack.c.bf16 %v877_v22, %v876_v20 }
  0xd9   : > { %v926_v26 = vpack.c.bf16 %v883_v24, %v882_v23 }
  0xda   : > { %955 = vst [vmem:[%s1863_s6 + $0x88] sm:$0xff] %v923_v25  ;;  %v689_v27 = vpop.f32.mrf.mxu2 }
  0xdb   : > { %958 = vst [vmem:[%s1863_s6 + $0xa0] sm:$0xff] %v926_v26  ;;  %v690_v28 = vadd.f32 %v689_v27, %v1858_v13  ;;  %v718_v29 = vpop.f32.mrf.mxu3  ;;  %v634_v30 = vpop.f32.mrf.mxu0 }
  0xdc   : > { %v719_v31 = vadd.f32 %v718_v29, %v1866_v14  ;;  %v635_v32 = vadd.f32 %v634_v30, %v1849_v5  ;;  %v663_v33 = vpop.f32.mrf.mxu1 }
  0xdd   : > { %v884_v34 = vmax.f32 %v690_v28, 0.0  ;;  %v664_v35 = vadd.f32 %v663_v33, %v1852_v6 }
  0xde   : > { %v885_v36 = vmax.f32 %v719_v31, 0.0  ;;  %v890_v37 = vmax.f32 %v635_v32, 0.0 }
  0xdf   : > { %v891_v38 = vmax.f32 %v664_v35, 0.0 }
  0xe0   : > { %v927_v39 = vpack.c.bf16 %v885_v36, %v884_v34 }
  0xe1   : > { %v930_v40 = vpack.c.bf16 %v891_v38, %v890_v37 }
  0xe2   : > { %959 = vst [vmem:[%s1863_s6 + $0xa8] sm:$0xff] %v927_v39  ;;  %v692_v42 = vpop.f32.mrf.mxu2 }
  0xe3   : > { %962 = vst [vmem:[%s1863_s6 + $0xc0] sm:$0xff] %v930_v40  ;;  %v693_v43 = vadd.f32 %v692_v42, %v1858_v13  ;;  %v721_v44 = vpop.f32.mrf.mxu3  ;;  %v636_v45 = vpop.f32.mrf.mxu0 }
  0xe4   : > { %v722_v46 = vadd.f32 %v721_v44, %v1866_v14  ;;  %v637_v47 = vadd.f32 %v636_v45, %v1849_v5  ;;  %v665_v48 = vpop.f32.mrf.mxu1 }
  0xe5   : > { %v892_v49 = vmax.f32 %v693_v43, 0.0  ;;  %v666_v50 = vadd.f32 %v665_v48, %v1852_v6 }
  0xe6   : > { %v893_v51 = vmax.f32 %v722_v46, 0.0  ;;  %v898_v52 = vmax.f32 %v637_v47, 0.0 }
  0xe7   : > { %v899_v53 = vmax.f32 %v666_v50, 0.0 }
  0xe8   : > { %v931_v54 = vpack.c.bf16 %v893_v51, %v892_v49 }
  0xe9   : > { %v934_v56 = vpack.c.bf16 %v899_v53, %v898_v52 }
  0xea   : > { %963 = vst [vmem:[%s1863_s6 + $0xc8] sm:$0xff] %v931_v54  ;;  %v694_v58 = vpop.f32.mrf.mxu2 }
  0xeb   : > { %966 = vst [vmem:[%s1863_s6 + $0xe0] sm:$0xff] %v934_v56  ;;  %v695_v5 = vadd.f32 %v694_v58, %v1858_v13  ;;  %v723_v59 = vpop.f32.mrf.mxu3  ;;  %v735_v6 = vpop.f32.mrf.mxu0  ;;  %v1925_v13 = vperm.slane %v1846_v41, 7 }
  0xec   : > { %v724_v60 = vadd.f32 %v723_v59, %v1866_v14  ;;  %v736_v61 = vadd.f32 %v735_v6, %v1910_v55  ;;  %v764_v62 = vpop.f32.mrf.mxu1 }
  0xed   : > { %v900_v63 = vmax.f32 %v695_v5, 0.0  ;;  %v765_v0 = vadd.f32 %v764_v62, %v1913_v57 }
  0xee   : > { %v901_v1 = vmax.f32 %v724_v60, 0.0  ;;  %v846_v2 = vmax.f32 %v736_v61, 0.0 }
  0xef   : > { %v847_v3 = vmax.f32 %v765_v0, 0.0 }
  0xf0   : > { %v935_v7 = vpack.c.bf16 %v901_v1, %v900_v63 }
  0xf1   : > { %v908_v8 = vpack.c.bf16 %v847_v3, %v846_v2 }
  0xf2   : > { %967 = vst [vmem:[%s1863_s6 + $0xe8] sm:$0xff] %v935_v7  ;;  %v793_v14 = vpop.f32.mrf.mxu2 }
  0xf3   : > { %940 = vst [vmem:[%s1863_s6 + $0x10] sm:$0xff] %v908_v8  ;;  %v794_v9 = vadd.f32 %v793_v14, %v1922_v4  ;;  %v822_v10 = vpop.f32.mrf.mxu3  ;;  %v737_v11 = vpop.f32.mrf.mxu0 }
  0xf4   : > { %v823_v12 = vadd.f32 %v822_v10, %v1925_v13  ;;  %v738_v15 = vadd.f32 %v737_v11, %v1910_v55  ;;  %v766_v16 = vpop.f32.mrf.mxu1 }
  0xf5   : > { %v848_v17 = vmax.f32 %v794_v9, 0.0  ;;  %v767_v18 = vadd.f32 %v766_v16, %v1913_v57 }
  0xf6   : > { %v849_v41 = vmax.f32 %v823_v12, 0.0  ;;  %v854_v19 = vmax.f32 %v738_v15, 0.0 }
  0xf7   : > { %v855_v20 = vmax.f32 %v767_v18, 0.0 }
  0xf8   : > { %v909_v21 = vpack.c.bf16 %v849_v41, %v848_v17 }
  0xf9   : > { %v912_v22 = vpack.c.bf16 %v855_v20, %v854_v19 }
  0xfa   : > { %941 = vst [vmem:[%s1863_s6 + $0x18] sm:$0xff] %v909_v21  ;;  %v795_v23 = vpop.f32.mrf.mxu2 }
  0xfb   : > { %944 = vst [vmem:[%s1863_s6 + $0x30] sm:$0xff] %v912_v22  ;;  %v796_v24 = vadd.f32 %v795_v23, %v1922_v4  ;;  %v824_v25 = vpop.f32.mrf.mxu3  ;;  %v740_v26 = vpop.f32.mrf.mxu0 }
  0xfc   : > { %v825_v27 = vadd.f32 %v824_v25, %v1925_v13  ;;  %v741_v28 = vadd.f32 %v740_v26, %v1910_v55  ;;  %v769_v29 = vpop.f32.mrf.mxu1 }
  0xfd   : > { %v856_v30 = vmax.f32 %v796_v24, 0.0  ;;  %v770_v31 = vadd.f32 %v769_v29, %v1913_v57 }
  0xfe   : > { %v857_v32 = vmax.f32 %v825_v27, 0.0  ;;  %v862_v33 = vmax.f32 %v741_v28, 0.0 }
  0xff   : > { %v863_v34 = vmax.f32 %v770_v31, 0.0 }
 0x100   : > { %v913_v35 = vpack.c.bf16 %v857_v32, %v856_v30 }
 0x101   : > { %v916_v36 = vpack.c.bf16 %v863_v34, %v862_v33 }
 0x102   : > { %945 = vst [vmem:[%s1863_s6 + $0x38] sm:$0xff] %v913_v35  ;;  %v798_v37 = vpop.f32.mrf.mxu2 }
 0x103   : > { %948 = vst [vmem:[%s1863_s6 + $0x50] sm:$0xff] %v916_v36  ;;  %v799_v38 = vadd.f32 %v798_v37, %v1922_v4  ;;  %v827_v39 = vpop.f32.mrf.mxu3  ;;  %v742_v40 = vpop.f32.mrf.mxu0 }
 0x104   : > { %v828_v42 = vadd.f32 %v827_v39, %v1925_v13  ;;  %v743_v43 = vadd.f32 %v742_v40, %v1910_v55  ;;  %v771_v44 = vpop.f32.mrf.mxu1 }
 0x105   : > { %v864_v45 = vmax.f32 %v799_v38, 0.0  ;;  %v772_v46 = vadd.f32 %v771_v44, %v1913_v57 }
 0x106   : > { %v865_v47 = vmax.f32 %v828_v42, 0.0  ;;  %v870_v48 = vmax.f32 %v743_v43, 0.0 }
 0x107   : > { %v871_v49 = vmax.f32 %v772_v46, 0.0 }
 0x108   : > { %v917_v50 = vpack.c.bf16 %v865_v47, %v864_v45 }
 0x109   : > { %v920_v51 = vpack.c.bf16 %v871_v49, %v870_v48 }
 0x10a   : > { %949 = vst [vmem:[%s1863_s6 + $0x58] sm:$0xff] %v917_v50  ;;  %v800_v52 = vpop.f32.mrf.mxu2 }
 0x10b   : > { %952 = vst [vmem:[%s1863_s6 + $0x70] sm:$0xff] %v920_v51  ;;  %v801_v53 = vadd.f32 %v800_v52, %v1922_v4  ;;  %v829_v54 = vpop.f32.mrf.mxu3  ;;  %v745_v56 = vpop.f32.mrf.mxu0 }
 0x10c   : > { %v830_v58 = vadd.f32 %v829_v54, %v1925_v13  ;;  %v746_v5 = vadd.f32 %v745_v56, %v1910_v55  ;;  %v774_v59 = vpop.f32.mrf.mxu1 }
 0x10d   : > { %v872_v6 = vmax.f32 %v801_v53, 0.0  ;;  %v775_v60 = vadd.f32 %v774_v59, %v1913_v57 }
 0x10e   : > { %v873_v61 = vmax.f32 %v830_v58, 0.0  ;;  %v878_v62 = vmax.f32 %v746_v5, 0.0 }
 0x10f   : > { %v879_v63 = vmax.f32 %v775_v60, 0.0 }
 0x110   : > { %v921_v0 = vpack.c.bf16 %v873_v61, %v872_v6 }
 0x111   : > { %v924_v1 = vpack.c.bf16 %v879_v63, %v878_v62 }
 0x112   : > { %953 = vst [vmem:[%s1863_s6 + $0x78] sm:$0xff] %v921_v0  ;;  %v803_v2 = vpop.f32.mrf.mxu2 }
 0x113   : > { %956 = vst [vmem:[%s1863_s6 + $0x90] sm:$0xff] %v924_v1  ;;  %v804_v3 = vadd.f32 %v803_v2, %v1922_v4  ;;  %v832_v7 = vpop.f32.mrf.mxu3  ;;  %v747_v8 = vpop.f32.mrf.mxu0 }
 0x114   : > { %v833_v14 = vadd.f32 %v832_v7, %v1925_v13  ;;  %v748_v9 = vadd.f32 %v747_v8, %v1910_v55  ;;  %v776_v10 = vpop.f32.mrf.mxu1 }
 0x115   : > { %v880_v11 = vmax.f32 %v804_v3, 0.0  ;;  %v777_v12 = vadd.f32 %v776_v10, %v1913_v57 }
 0x116   : > { %v881_v15 = vmax.f32 %v833_v14, 0.0  ;;  %v886_v16 = vmax.f32 %v748_v9, 0.0 }
 0x117   : > { %v887_v17 = vmax.f32 %v777_v12, 0.0 }
 0x118   : > { %v925_v18 = vpack.c.bf16 %v881_v15, %v880_v11 }
 0x119   : > { %v928_v41 = vpack.c.bf16 %v887_v17, %v886_v16 }
 0x11a   : > { %957 = vst [vmem:[%s1863_s6 + $0x98] sm:$0xff] %v925_v18  ;;  %v805_v19 = vpop.f32.mrf.mxu2 }
 0x11b   : > { %960 = vst [vmem:[%s1863_s6 + $0xb0] sm:$0xff] %v928_v41  ;;  %v806_v20 = vadd.f32 %v805_v19, %v1922_v4  ;;  %v834_v21 = vpop.f32.mrf.mxu3  ;;  %v750_v22 = vpop.f32.mrf.mxu0 }
 0x11c   : > { %v835_v23 = vadd.f32 %v834_v21, %v1925_v13  ;;  %v751_v24 = vadd.f32 %v750_v22, %v1910_v55  ;;  %v779_v25 = vpop.f32.mrf.mxu1 }
 0x11d   : > { %v888_v26 = vmax.f32 %v806_v20, 0.0  ;;  %v780_v27 = vadd.f32 %v779_v25, %v1913_v57 }
 0x11e   : > { %v889_v28 = vmax.f32 %v835_v23, 0.0  ;;  %v894_v29 = vmax.f32 %v751_v24, 0.0 }
 0x11f   : > { %v895_v30 = vmax.f32 %v780_v27, 0.0 }
 0x120   : > { %v929_v31 = vpack.c.bf16 %v889_v28, %v888_v26 }
 0x121   : > { %v932_v32 = vpack.c.bf16 %v895_v30, %v894_v29 }
 0x122   : > { %961 = vst [vmem:[%s1863_s6 + $0xb8] sm:$0xff] %v929_v31  ;;  %v808_v33 = vpop.f32.mrf.mxu2 }
 0x123   : > { %964 = vst [vmem:[%s1863_s6 + $0xd0] sm:$0xff] %v932_v32  ;;  %v809_v34 = vadd.f32 %v808_v33, %v1922_v4  ;;  %v837_v35 = vpop.f32.mrf.mxu3  ;;  %v752_v36 = vpop.f32.mrf.mxu0 }
 0x124   : > { %v838_v37 = vadd.f32 %v837_v35, %v1925_v13  ;;  %v753_v38 = vadd.f32 %v752_v36, %v1910_v55  ;;  %v781_v39 = vpop.f32.mrf.mxu1 }
 0x125   : > { %v896_v40 = vmax.f32 %v809_v34, 0.0  ;;  %v782_v42 = vadd.f32 %v781_v39, %v1913_v57 }
 0x126   : > { %v897_v43 = vmax.f32 %v838_v37, 0.0  ;;  %v902_v44 = vmax.f32 %v753_v38, 0.0 }
 0x127   : > { %v903_v45 = vmax.f32 %v782_v42, 0.0 }
 0x128   : > { %v933_v46 = vpack.c.bf16 %v897_v43, %v896_v40 }
 0x129   : > { %v936_v47 = vpack.c.bf16 %v903_v45, %v902_v44 }
 0x12a   : > { %965 = vst [vmem:[%s1863_s6 + $0xd8] sm:$0xff] %v933_v46  ;;  %v810_v48 = vpop.f32.mrf.mxu2 }
 0x12b   : > { %968 = vst [vmem:[%s1863_s6 + $0xf0] sm:$0xff] %v936_v47  ;;  %v811_v49 = vadd.f32 %v810_v48, %v1922_v4  ;;  %v839_v50 = vpop.f32.mrf.mxu3 }
 0x12c   : > { %v840_v51 = vadd.f32 %v839_v50, %v1925_v13 }
 0x12d   : > { %v904_v52 = vmax.f32 %v811_v49, 0.0 }
 0x12e   : > { %v905_v55 = vmax.f32 %v840_v51, 0.0 }
 0x130   : > { %v937_v53 = vpack.c.bf16 %v905_v55, %v904_v52 }
 0x132   : > { %969 = vst [vmem:[%s1863_s6 + $0xf8] sm:$0xff] %v937_v53 }
 0x133 PF: > { %s13_s12 = sadd.s32 1, %s1395_s12  }
 0x134   : > { %p10_p4 = scmp.ge.s32.totalorder %s13_s12, 6  }
 0x136   :  { %12 = sbr.rel (!%p10_p4) target bundleno = 1 (0x1), region = 62 }

// kernel: _lambda_.4
= control target key start
LH: loop header
LB: loop body
LE: loop exit
PB: predicated region body
PF: predicated region fallthrough
CT: control target
= control target key end

     0   :  { %s900_s9 = smov 0   ;;  %s902_s10 = smov 0   ;;  %s1034_s0 = inlined_call_operand.vmem [shape: bf16[2,1,64,1024], index: 0, kind: input, shape index: {}]   ;;  %s1035_s1 = inlined_call_operand.vmem [shape: f32[2,1,2,64], index: 1, kind: input, shape index: {}]   ;;  %s1036_s2 = inlined_call_operand.vmem [shape: f32[2,2,1024], index: 2, kind: output, shape index: {}]  }
   0x1   :  { %s904_s11 = smov 0  }
   0x2 LB: > { %s24_s12 = sadd.s32 1, %s879_s10  ;;  %p656_p0 = scmp.ge.s32.totalorder %s883_s11, 1  ;;  %s883_s11 = sphi %s904_s11, %s12_s11   ;;  %s879_s10 = sphi %s902_s10, %s1038_s10   ;;  %s875_s9 = sphi %s900_s9, %s1037_s9  }
   0x3   : > { %p26_p1 = scmp.ge.s32.totalorder %s24_s12, 2  ;;  %p144_p2 = scmp.lt.s32.totalorder %s883_s11, 3 }
   0x5   : > { %s1040_s12 = smov (%p26_p1, %s24_s12), 0  ;;  %p145_p3 = pnand %p656_p0, %p144_p2 }
   0x6   : > { %p177_p4 = scmp.lt.s32.totalorder (!%p145_p3), %s875_s9, 1 }
   0x7   : > { %148 = sbr.rel (%p145_p3) target bundleno = 192 (0xc0), region = 28 }
   0xc   : > { %s1042_s9 = smov (!%p177_p4, %s875_s9), 1  ;;  %vm507_vm0 = vcmask 517120   ;;  %vm399_vm1 = vcmask 523264   ;;  %vm550_vm6 = vcmask 1041408   ;;  %vm552_vm7 = vcmask 1045508  }
   0xd   : > { %s800_s13 = sshll.u32 %s1042_s9, 8  ;;  %s659_s17 = sshll.u32 %s1042_s9, 1  ;;  %vm554_vm8 = vcmask 1043456  }
   0xe   : > { %s924_s16 = scalar_lea.vmem %s1034_s0, %s800_s13  ;;  %s192_s20 = scalar_lea.vmem %s1035_s1, %s659_s17 }
   0xf   : > { %v760_v0 = vld [vmem:[%s924_s16 + $0xc0] sm:$0xf]  ;;  %v826_v2 = vld [vmem:[%s924_s16 + $0xc4] sm:$0xf]  ;;  %v768_v5 = vld [vmem:[%s924_s16 + $0xc8] sm:$0xf] }
  0x10   : > { %v830_v1 = vld [vmem:[%s924_s16 + $0xdc] sm:$0xf0]  ;;  %v762_v4 = vld [vmem:[%s924_s16 + $0xe0] sm:$0xf0]  ;;  %v831_v6 = vld [vmem:[%s924_s16 + $0xe4] sm:$0xf0] }
  0x11   : > { %v761_v3 = vor.u32 %v830_v1, %v760_v0  ;;  %v765_v7 = vor.u32 %v826_v2, %v762_v4  ;;  %v769_v8 = vor.u32 %v831_v6, %v768_v5  ;;  %v827_v9 = vld [vmem:[%s924_s16 + $0xcc] sm:$0xf]  ;;  %v728_v11 = vld [vmem:[%s924_s16 + $0x80] sm:$0xf]  ;;  %v818_v14 = vld [vmem:[%s924_s16 + $0x84] sm:$0xf] }
  0x12   : > { %v770_v10 = vld [vmem:[%s924_s16 + $0xe8] sm:$0xf0]  ;;  %v822_v13 = vld [vmem:[%s924_s16 + $0x9c] sm:$0xf0]  ;;  %v730_v15 = vld [vmem:[%s924_s16 + $0xa0] sm:$0xf0] }
  0x13   : > { %407 = vmatpush.bf16.msra.mxu0 %v761_v3  ;;  %v773_v12 = vor.u32 %v827_v9, %v770_v10  ;;  %420 = vmatpush.bf16.msra.mxu1 %v765_v7  ;;  %v729_v16 = vor.u32 %v822_v13, %v728_v11  ;;  %v733_v17 = vor.u32 %v818_v14, %v730_v15  ;;  %v736_v18 = vld [vmem:[%s924_s16 + $0x88] sm:$0xf]  ;;  %v819_v20 = vld [vmem:[%s924_s16 + $0x8c] sm:$0xf]  ;;  %v696_v23 = vld [vmem:[%s924_s16 + $0x40] sm:$0xf] }
  0x14   : > { %433 = vmatpush.bf16.msra.mxu2 %v769_v8  ;;  %v823_v19 = vld [vmem:[%s924_s16 + $0xa4] sm:$0xf0]  ;;  %v738_v22 = vld [vmem:[%s924_s16 + $0xa8] sm:$0xf0]  ;;  %v814_v24 = vld [vmem:[%s924_s16 + $0x5c] sm:$0xf0] }
  0x15   : > { %446 = vmatpush.bf16.msra.mxu3 %v773_v12  ;;  %v737_v21 = vor.u32 %v823_v19, %v736_v18  ;;  %v741_v25 = vor.u32 %v819_v20, %v738_v22  ;;  %v810_v26 = vld [vmem:[%s924_s16 + $0x44] sm:$0xf]  ;;  %v704_v28 = vld [vmem:[%s924_s16 + $0x48] sm:$0xf]  ;;  %v697_v29 = vor.u32 %v814_v24, %v696_v23  ;;  %v811_v31 = vld [vmem:[%s924_s16 + $0x4c] sm:$0xf] }
  0x16   : > { %v698_v27 = vld [vmem:[%s924_s16 + $0x60] sm:$0xf0]  ;;  %v815_v30 = vld [vmem:[%s924_s16 + $0x64] sm:$0xf0]  ;;  %v706_v32 = vld [vmem:[%s924_s16 + $0x68] sm:$0xf0] }
  0x17   : > { %408 = vmatpush.bf16.msra.mxu0 %v729_v16  ;;  %421 = vmatpush.bf16.msra.mxu1 %v733_v17  ;;  %v701_v33 = vor.u32 %v810_v26, %v698_v27  ;;  %v705_v34 = vor.u32 %v815_v30, %v704_v28  ;;  %v237_v35 = vld [vmem:[%s192_s20] sm:$0x3]  ;;  %v709_v38 = vor.u32 %v811_v31, %v706_v32  ;;  %v802_v40 = vld [vmem:[%s924_s16 + $0x4] sm:$0xf]  ;;  %v672_v42 = vld [vmem:[%s924_s16 + $0x8] sm:$0xf] }
  0x18   : > { %434 = vmatpush.bf16.msra.mxu2 %v737_v21  ;;  %v664_v36 = vld [vmem:[%s924_s16] sm:$0xf]  ;;  %v508_v39 = vsel %vm507_vm0, %v237_v35, 0.0  ;;  %v666_v41 = vld [vmem:[%s924_s16 + $0x20] sm:$0xf0]  ;;  %v972_v58 = vpack.c.bf16 %v237_v35, %v237_v35  ;;  %s801_s21 = sshll.u32 %s1042_s9, 4 }
  0x19   : > { %v806_v37 = vld [vmem:[%s924_s16 + $0x1c] sm:$0xf0]  ;;  %447 = vmatpush.bf16.msra.mxu3 %v741_v25  ;;  %509 = vadd.xlane.f32.xlu0 %v508_v39  ;;  %v807_v43 = vld [vmem:[%s924_s16 + $0x24] sm:$0xf0]  ;;  %v803_v44 = vld [vmem:[%s924_s16 + $0xc] sm:$0xf]  ;;  %v669_v49 = vor.u32 %v802_v40, %v666_v41  ;;  %s197_s24 = scalar_lea.vmem %s1036_s2, %s801_s21 }
  0x1a   : > { %v665_v45 = vor.u32 %v806_v37, %v664_v36  ;;  %v674_v46 = vld [vmem:[%s924_s16 + $0x28] sm:$0xf0]  ;;  %v784_v47 = vld [vmem:[%s924_s16 + $0xd8] sm:$0xf]  ;;  %v673_v50 = vor.u32 %v807_v43, %v672_v42  ;;  %v829_v51 = vld [vmem:[%s924_s16 + $0xdc] sm:$0xf] }
  0x1b   : > { %409 = vmatpush.bf16.msra.mxu0 %v697_v29  ;;  %v833_v48 = vld [vmem:[%s924_s16 + $0xf4] sm:$0xf0]  ;;  %422 = vmatpush.bf16.msra.mxu1 %v701_v33  ;;  %v786_v52 = vld [vmem:[%s924_s16 + $0xf8] sm:$0xf0]  ;;  %v677_v53 = vor.u32 %v803_v44, %v674_v46  ;;  %v776_v55 = vld [vmem:[%s924_s16 + $0xd0] sm:$0xf] }
  0x1c   : > { %435 = vmatpush.bf16.msra.mxu2 %v705_v34  ;;  %v785_v54 = vor.u32 %v833_v48, %v784_v47  ;;  %v832_v56 = vld [vmem:[%s924_s16 + $0xec] sm:$0xf0]  ;;  %v828_v57 = vld [vmem:[%s924_s16 + $0xd4] sm:$0xf]  ;;  %v789_v59 = vor.u32 %v829_v51, %v786_v52  ;;  %v752_v61 = vld [vmem:[%s924_s16 + $0x98] sm:$0xf] }
  0x1d   : > { %448 = vmatpush.bf16.msra.mxu3 %v709_v38  ;;  %v778_v60 = vld [vmem:[%s924_s16 + $0xf0] sm:$0xf0]  ;;  %v825_v62 = vld [vmem:[%s924_s16 + $0xb4] sm:$0xf0]  ;;  %v821_v63 = vld [vmem:[%s924_s16 + $0x9c] sm:$0xf]  ;;  %v777_v1 = vor.u32 %v832_v56, %v776_v55 }
  0x1e   : > { %v754_v0 = vld [vmem:[%s924_s16 + $0xb8] sm:$0xf0]  ;;  %v781_v2 = vor.u32 %v828_v57, %v778_v60  ;;  %v753_v3 = vor.u32 %v825_v62, %v752_v61  ;;  %v744_v4 = vld [vmem:[%s924_s16 + $0x90] sm:$0xf]  ;;  %v820_v6 = vld [vmem:[%s924_s16 + $0x94] sm:$0xf] }
  0x1f   : > { %410 = vmatpush.bf16.msra.mxu0 %v665_v45  ;;  %423 = vmatpush.bf16.msra.mxu1 %v669_v49  ;;  %v824_v5 = vld [vmem:[%s924_s16 + $0xac] sm:$0xf0]  ;;  %v757_v7 = vor.u32 %v821_v63, %v754_v0  ;;  %v746_v8 = vld [vmem:[%s924_s16 + $0xb0] sm:$0xf0]  ;;  %v720_v9 = vld [vmem:[%s924_s16 + $0x58] sm:$0xf] }
  0x20   : > { %436 = vmatpush.bf16.msra.mxu2 %v673_v50  ;;  %v817_v10 = vld [vmem:[%s924_s16 + $0x74] sm:$0xf0]  ;;  %v813_v11 = vld [vmem:[%s924_s16 + $0x5c] sm:$0xf]  ;;  %v745_v13 = vor.u32 %v824_v5, %v744_v4  ;;  %v749_v14 = vor.u32 %v820_v6, %v746_v8  ;;  %v712_v16 = vld [vmem:[%s924_s16 + $0x50] sm:$0xf] }
  0x21   : > { %449 = vmatpush.bf16.msra.mxu3 %v677_v53  ;;  %v722_v12 = vld [vmem:[%s924_s16 + $0x78] sm:$0xf0]  ;;  %v721_v15 = vor.u32 %v817_v10, %v720_v9  ;;  %v816_v17 = vld [vmem:[%s924_s16 + $0x6c] sm:$0xf0]  ;;  %v812_v18 = vld [vmem:[%s924_s16 + $0x54] sm:$0xf] }
  0x22   : > { %790 = vmatmul.msk.bf16.vlgmr.msra.gmra.mxu0 %vm399_vm1, %v972_v58  ;;  %791 = vmatmul.msk.bf16.vlgmr.msra.gmra.mxu1 %vm399_vm1, %v972_v58  ;;  %v725_v19 = vor.u32 %v813_v11, %v722_v12  ;;  %v714_v20 = vld [vmem:[%s924_s16 + $0x70] sm:$0xf0]  ;;  %v688_v21 = vld [vmem:[%s924_s16 + $0x18] sm:$0xf]  ;;  %v805_v23 = vld [vmem:[%s924_s16 + $0x1c] sm:$0xf]  ;;  %v713_v25 = vor.u32 %v816_v17, %v712_v16 }
  0x23   : > { %792 = vmatmul.msk.bf16.vlgmr.msra.gmra.mxu2 %vm399_vm1, %v972_v58  ;;  %459 = vmatpush.bf16.msrb.mxu0 %v777_v1  ;;  %v809_v22 = vld [vmem:[%s924_s16 + $0x34] sm:$0xf0]  ;;  %v690_v24 = vld [vmem:[%s924_s16 + $0x38] sm:$0xf0]  ;;  %v717_v26 = vor.u32 %v812_v18, %v714_v20  ;;  %v680_v28 = vld [vmem:[%s924_s16 + $0x10] sm:$0xf] }
  0x24   : > { %485 = vmatpush.bf16.msrb.mxu2 %v785_v54  ;;  %793 = vmatmul.msk.bf16.vlgmr.msra.gmra.mxu3 %vm399_vm1, %v972_v58  ;;  %v689_v27 = vor.u32 %v809_v22, %v688_v21  ;;  %v808_v29 = vld [vmem:[%s924_s16 + $0x2c] sm:$0xf0]  ;;  %v693_v30 = vor.u32 %v805_v23, %v690_v24  ;;  %v804_v31 = vld [vmem:[%s924_s16 + $0x14] sm:$0xf] }
  0x25   : > { %498 = vmatpush.bf16.msrb.mxu3 %v789_v59  ;;  %472 = vmatpush.bf16.msrb.mxu1 %v781_v2  ;;  %v682_v32 = vld [vmem:[%s924_s16 + $0x30] sm:$0xf0]  ;;  %v681_v33 = vor.u32 %v808_v29, %v680_v28 }
  0x26   : > { %v685_v34 = vor.u32 %v804_v31, %v682_v32 }
  0x27   : > { %460 = vmatpush.bf16.msrb.mxu0 %v745_v13 }
  0x28   : > { %486 = vmatpush.bf16.msrb.mxu2 %v753_v3 }
  0x29   : > { %499 = vmatpush.bf16.msrb.mxu3 %v757_v7  ;;  %473 = vmatpush.bf16.msrb.mxu1 %v749_v14 }
  0x2b   : > { %461 = vmatpush.bf16.msrb.mxu0 %v713_v25 }
  0x2c   : > { %487 = vmatpush.bf16.msrb.mxu2 %v721_v15 }
  0x2d   : > { %500 = vmatpush.bf16.msrb.mxu3 %v725_v19  ;;  %474 = vmatpush.bf16.msrb.mxu1 %v717_v26 }
  0x2f   : > { %462 = vmatpush.bf16.msrb.mxu0 %v681_v33 }
  0x30   : > { %488 = vmatpush.bf16.msrb.mxu2 %v689_v27 }
  0x31   : > { %501 = vmatpush.bf16.msrb.mxu3 %v693_v30  ;;  %475 = vmatpush.bf16.msrb.mxu1 %v685_v34 }
  0x32   : > { %794 = vmatmul.msk.bf16.vlgmr.msrb.gmra.mxu0 %vm399_vm1, %v972_v58 }
  0x33   : > { %796 = vmatmul.msk.bf16.vlgmr.msrb.gmra.mxu2 %vm399_vm1, %v972_v58 }
  0x34   : > { %795 = vmatmul.msk.bf16.vlgmr.msrb.gmra.mxu1 %vm399_vm1, %v972_v58  ;;  %797 = vmatmul.msk.bf16.vlgmr.msrb.gmra.mxu3 %vm399_vm1, %v972_v58 }
  0x8c   : > { %v510_v35 = vpop.xlane.xlu0 %509 }
  0x8d   : > { %v511_v36 = vadd.f32 1e-05, %v510_v35 }
  0x8f   : > { %859 = vrcp.f32 %v511_v36  ;;  %v525_v39 = vand.u32 2147483648, %v511_v36  ;;  %vm519_vm2 = vweird.f32 %v511_v36  ;;  %v523_v41 = vand.u32 2147483647, %v511_v36 }
  0x91   : > { %v526_v43 = vor.u32 1.1754944e-38, %v525_v39  ;;  %vm524_vm5 = vcmp.eq.f32.partialorder %v523_v41, 8.507059e+37 }
  0x95   : > { %v860_v37 = vpop.eup %859 }
  0x96   : > { %v515_v38 = vmul.f32 %v860_v37, %v511_v36  ;;  %vm520_vm3 = vweird.f32 %v860_v37 }
  0x97   : > { %vm521_vm4 = vmor %vm519_vm2, %vm520_vm3 }
  0x98   : > { %v516_v40 = vsub.f32 1.0, %v515_v38 }
  0x9a   : > { %v517_v42 = vmul.f32 %v860_v37, %v516_v40 }
  0x9c   : > { %v518_v44 = vadd.f32 %v860_v37, %v517_v42 }
  0x9e   : > { %v522_v45 = vsel %vm521_vm4, %v860_v37, %v518_v44 }
  0x9f   : > { %v412_v46 = vpop.f32.mrf.mxu0  ;;  %v527_v47 = vsel %vm524_vm5, %v526_v43, %v522_v45  ;;  %v425_v48 = vpop.f32.mrf.mxu1 }
  0xa0   : > { %v529_v49 = vmul.f32 %v527_v47, %v425_v48  ;;  %v528_v50 = vmul.f32 %v527_v47, %v412_v46 }
  0xa2   : > { %v544_v51 = vrot.slane %v529_v49, 6 }
  0xa4   : > { %v551_v59 = vsel %vm550_vm6, %v528_v50, %v544_v51 }
  0xa6   : > { %v438_v52 = vpop.f32.mrf.mxu2 }
  0xa7   : > { %v530_v53 = vmul.f32 %v527_v47, %v438_v52  ;;  %v451_v54 = vpop.f32.mrf.mxu3  ;;  %v414_v55 = vpop.f32.mrf.mxu0 }
  0xa8   : > { %v531_v56 = vmul.f32 %v527_v47, %v451_v54  ;;  %v427_v57 = vpop.f32.mrf.mxu1 }
  0xa9   : > { %v545_v58 = vrot.slane %v530_v53, 4 }
  0xaa   : > { %v546_v60 = vrot.slane %v531_v56, 2 }
  0xac   : > { %v553_v61 = vsel %vm552_vm7, %v545_v58, %v546_v60 }
  0xad   : > { %v555_v62 = vsel %vm554_vm8, %v551_v59, %v553_v61 }
  0xae   : > { %v440_v63 = vpop.f32.mrf.mxu2  ;;  %563 = vst [vmem:[%s197_s24] sm:$0xff] %v555_v62 }
  0xaf   : > { %v453_v0 = vpop.f32.mrf.mxu3  ;;  %v464_v1 = vpop.f32.mrf.mxu0 }
  0xb0   : > { %v532_v12 = vmul.f32 %v527_v47, %v464_v1 }
  0xb1   : > { %v477_v2 = vpop.f32.mrf.mxu1 }
  0xb2   : > { %v533_v3 = vmul.f32 %v527_v47, %v477_v2 }
  0xb4   : > { %v547_v7 = vrot.slane %v533_v3, 6 }
  0xb6   : > { %v490_v4 = vpop.f32.mrf.mxu2  ;;  %v556_v14 = vsel %vm550_vm6, %v532_v12, %v547_v7 }
  0xb7   : > { %v534_v5 = vmul.f32 %v527_v47, %v490_v4  ;;  %v503_v6 = vpop.f32.mrf.mxu3  ;;  %v466_v9 = vpop.f32.mrf.mxu0 }
  0xb8   : > { %v535_v8 = vmul.f32 %v527_v47, %v503_v6 }
  0xb9   : > { %v548_v10 = vrot.slane %v534_v5, 4  ;;  %v479_v11 = vpop.f32.mrf.mxu1 }
  0xba   : > { %v549_v13 = vrot.slane %v535_v8, 2 }
  0xbc   : > { %v557_v15 = vsel %vm552_vm7, %v548_v10, %v549_v13 }
  0xbd   : > { %v558_v16 = vsel %vm554_vm8, %v556_v14, %v557_v15 }
  0xbe   : > { %v492_v17 = vpop.f32.mrf.mxu2  ;;  %564 = vst [vmem:[%s197_s24 + $0x8] sm:$0xff] %v558_v16 }
  0xbf   : > { %v505_v18 = vpop.f32.mrf.mxu3 }
  0xc0 PF: > { %s12_s11 = sadd.s32 1, %s883_s11   ;;  %s1037_s9 = smov %s879_s10 }
  0xc1   : > { %p9_p5 = scmp.ge.s32.totalorder %s12_s11, 4   ;;  %s1038_s10 = smov %s1040_s12 }
  0xc3   :  { %11 = sbr.rel (!%p9_p5) target bundleno = 2 (0x2), region = 65 }

// kernel: _lambda_.5
= control target key start
LH: loop header
LB: loop body
LE: loop exit
PB: predicated region body
PF: predicated region fallthrough
CT: control target
= control target key end

     0   :  { %s2986_s9 = smov 0   ;;  %s4338_s0 = inlined_call_operand.vmem [shape: bf16[2,64,1024], index: 0, kind: input, shape index: {}]   ;;  %s4339_s1 = inlined_call_operand.vmem [shape: f32[2,2,1024], index: 1, kind: input, shape index: {}]   ;;  %s4340_s2 = inlined_call_operand.vmem [shape: f32[2,2,64], index: 2, kind: output, shape index: {}]  }
   0x1 LB: > { %s2659_s10 = sadd.s32 4294967295, %s2966_s9   ;;  %p2663_p0 = scmp.ge.s32.totalorder %s2966_s9, 1  ;;  %s2966_s9 = sphi %s2986_s9, %s12_s9  }
   0x2   : > { %p122_p1 = scmp.lt.s32.totalorder %s2966_s9, 3 }
   0x4   : > { %p123_p2 = pnand %p2663_p0, %p122_p1 }
   0x6   : > { %126 = sbr.rel (%p123_p2) target bundleno = 5452 (0x154c), region = 28 }
   0xb   : > { %p148_p3 = scmp.lt.s32.totalorder %s2659_s10, 1  ;;  %vm810_vm0 = vcmask 1041408   ;;  %vm616_vm4 = vcmask 523264  }
   0xd   : > { %s4517_s10 = smov (!%p148_p3, %s2659_s10), 1 }
   0xe   : > { %s2839_s11 = sshll.u32 %s4517_s10, 8  ;;  %s2840_s15 = sshll.u32 %s4517_s10, 4 }
   0xf   : > { %s3000_s14 = scalar_lea.vmem %s4338_s0, %s2839_s11  ;;  %s157_s18 = scalar_lea.vmem %s4339_s1, %s2840_s15 }
  0x10   : > { %v2767_v0 = vld [vmem:[%s3000_s14 + $0xc0] sm:$0xf]  ;;  %v2865_v2 = vld [vmem:[%s3000_s14 + $0xc4] sm:$0xf]  ;;  %v2775_v5 = vld [vmem:[%s3000_s14 + $0xc8] sm:$0xf] }
  0x11   : > { %v2869_v1 = vld [vmem:[%s3000_s14 + $0xdc] sm:$0xf0]  ;;  %v2769_v4 = vld [vmem:[%s3000_s14 + $0xe0] sm:$0xf0]  ;;  %v2870_v6 = vld [vmem:[%s3000_s14 + $0xe4] sm:$0xf0] }
  0x12   : > { %v3005_v3 = vor.u32 %v2869_v1, %v2767_v0  ;;  %v3010_v7 = vor.u32 %v2865_v2, %v2769_v4  ;;  %v3012_v8 = vor.u32 %v2870_v6, %v2775_v5  ;;  %v2866_v9 = vld [vmem:[%s3000_s14 + $0xcc] sm:$0xf]  ;;  %v2735_v12 = vld [vmem:[%s3000_s14 + $0x80] sm:$0xf]  ;;  %v2857_v14 = vld [vmem:[%s3000_s14 + $0x84] sm:$0xf] }
  0x13   : > { %v2777_v10 = vld [vmem:[%s3000_s14 + $0xe8] sm:$0xf0]  ;;  %v2861_v13 = vld [vmem:[%s3000_s14 + $0x9c] sm:$0xf0]  ;;  %v2737_v15 = vld [vmem:[%s3000_s14 + $0xa0] sm:$0xf0] }
  0x14   : > { %361 = vmatpush.bf16.xpose.msra.mxu0 %v3005_v3  ;;  %v3017_v11 = vor.u32 %v2866_v9, %v2777_v10  ;;  %390 = vmatpush.bf16.xpose.msra.mxu1 %v3010_v7  ;;  %v2743_v16 = vld [vmem:[%s3000_s14 + $0x88] sm:$0xf]  ;;  %v2858_v18 = vld [vmem:[%s3000_s14 + $0x8c] sm:$0xf]  ;;  %v3030_v20 = vor.u32 %v2861_v13, %v2735_v12  ;;  %v3032_v21 = vor.u32 %v2857_v14, %v2737_v15  ;;  %v2703_v24 = vld [vmem:[%s3000_s14 + $0x40] sm:$0xf] }
  0x15   : > { %419 = vmatpush.bf16.xpose.msra.mxu2 %v3012_v8  ;;  %v2862_v17 = vld [vmem:[%s3000_s14 + $0xa4] sm:$0xf0]  ;;  %v2745_v19 = vld [vmem:[%s3000_s14 + $0xa8] sm:$0xf0]  ;;  %v2853_v25 = vld [vmem:[%s3000_s14 + $0x5c] sm:$0xf0] }
  0x16   : > { %448 = vmatpush.bf16.xpose.msra.mxu3 %v3017_v11  ;;  %v3034_v22 = vor.u32 %v2862_v17, %v2743_v16  ;;  %v3036_v23 = vor.u32 %v2858_v18, %v2745_v19  ;;  %v2849_v26 = vld [vmem:[%s3000_s14 + $0x44] sm:$0xf]  ;;  %v2711_v28 = vld [vmem:[%s3000_s14 + $0x48] sm:$0xf]  ;;  %v2850_v30 = vld [vmem:[%s3000_s14 + $0x4c] sm:$0xf]  ;;  %v3050_v32 = vor.u32 %v2853_v25, %v2703_v24 }
  0x17   : > { %v2705_v27 = vld [vmem:[%s3000_s14 + $0x60] sm:$0xf0]  ;;  %v2854_v29 = vld [vmem:[%s3000_s14 + $0x64] sm:$0xf0]  ;;  %v2713_v31 = vld [vmem:[%s3000_s14 + $0x68] sm:$0xf0] }
  0x18   : > { %4413 = vst [vmem:[#allocation2_spill] sm:$0xff] %v3050_v32  ;;  %v3052_v33 = vor.u32 %v2849_v26, %v2705_v27  ;;  %v3054_v34 = vor.u32 %v2854_v29, %v2711_v28  ;;  %v3056_v35 = vor.u32 %v2850_v30, %v2713_v31  ;;  %v2671_v36 = vld [vmem:[%s3000_s14] sm:$0xf]  ;;  %v2841_v38 = vld [vmem:[%s3000_s14 + $0x4] sm:$0xf]  ;;  %s2668_s19 = sshll.u32 %s4517_s10, 1 }
  0x19   : > { %v2845_v37 = vld [vmem:[%s3000_s14 + $0x1c] sm:$0xf0]  ;;  %v2673_v39 = vld [vmem:[%s3000_s14 + $0x20] sm:$0xf0]  ;;  %v2679_v40 = vld [vmem:[%s3000_s14 + $0x8] sm:$0xf]  ;;  %s161_s22 = scalar_lea.vmem %s4340_s2, %s2668_s19 }
  0x1a   : > { %4414 = vst [vmem:[#allocation3_spill] sm:$0xff] %v3052_v33  ;;  %v2846_v41 = vld [vmem:[%s3000_s14 + $0x24] sm:$0xf0]  ;;  %v2842_v42 = vld [vmem:[%s3000_s14 + $0xc] sm:$0xf]  ;;  %v3073_v47 = vor.u32 %v2845_v37, %v2671_v36  ;;  %v3078_v51 = vor.u32 %v2841_v38, %v2673_v39 }
  0x1b   : > { %4415 = vst [vmem:[#allocation4_spill] sm:$0xff] %v3056_v35  ;;  %v2681_v43 = vld [vmem:[%s3000_s14 + $0x28] sm:$0xf0]  ;;  %v2791_v44 = vld [vmem:[%s3000_s14 + $0xd8] sm:$0xf]  ;;  %v3080_v52 = vor.u32 %v2846_v41, %v2679_v40 }
  0x1c   : > { %362 = vmatpush.bf16.xpose.msra.mxu0 %v3030_v20  ;;  %391 = vmatpush.bf16.xpose.msra.mxu1 %v3032_v21  ;;  %v2872_v45 = vld [vmem:[%s3000_s14 + $0xf4] sm:$0xf0]  ;;  %v2783_v46 = vld [vmem:[%s3000_s14 + $0xd0] sm:$0xf]  ;;  %4416 = vst [vmem:[#allocation5_spill] sm:$0xff] %v3073_v47  ;;  %v3084_v55 = vor.u32 %v2842_v42, %v2681_v43 }
  0x1d   : > { %420 = vmatpush.bf16.xpose.msra.mxu2 %v3034_v22  ;;  %v2871_v48 = vld [vmem:[%s3000_s14 + $0xec] sm:$0xf0]  ;;  %v2868_v49 = vld [vmem:[%s3000_s14 + $0xdc] sm:$0xf]  ;;  %4417 = vst [vmem:[#allocation6_spill] sm:$0xff] %v3078_v51  ;;  %v3086_v56 = vor.u32 %v2872_v45, %v2791_v44  ;;  %v3219_v44 = vld [vmem:[%s157_s18] sm:$0xff] }
  0x1e   : > { %449 = vmatpush.bf16.xpose.msra.mxu3 %v3036_v23  ;;  %v2793_v50 = vld [vmem:[%s3000_s14 + $0xf8] sm:$0xf0]  ;;  %4418 = vst [vmem:[#allocation7_spill] sm:$0xff] %v3080_v52  ;;  %v2867_v53 = vld [vmem:[%s3000_s14 + $0xd4] sm:$0xf]  ;;  %v3088_v57 = vor.u32 %v2871_v48, %v2783_v46  ;;  %v3229_v46 = vld [vmem:[%s157_s18 + $0x8] sm:$0xff] }
  0x1f   : > { %v2785_v54 = vld [vmem:[%s3000_s14 + $0xf0] sm:$0xf0]  ;;  %4419 = vst [vmem:[#allocation8_spill] sm:$0xff] %v3084_v55  ;;  %v3090_v58 = vor.u32 %v2868_v49, %v2793_v50  ;;  %v2759_v60 = vld [vmem:[%s3000_s14 + $0x98] sm:$0xf]  ;;  %v787_v50 = vmul.f32 %v3219_v44, %v3219_v44 }
  0x20   : > { %4420 = vst [vmem:[#allocation9_spill] sm:$0xff] %v3086_v56  ;;  %v3093_v59 = vor.u32 %v2867_v53, %v2785_v54  ;;  %v2864_v61 = vld [vmem:[%s3000_s14 + $0xb4] sm:$0xf0]  ;;  %v2751_v62 = vld [vmem:[%s3000_s14 + $0x90] sm:$0xf]  ;;  %v788_v54 = vmul.f32 %v3229_v46, %v3229_v46 }
  0x21   : > { %4421 = vst [vmem:[#allocation10_spill] sm:$0xff] %v3088_v57  ;;  %v2863_v63 = vld [vmem:[%s3000_s14 + $0xac] sm:$0xf0]  ;;  %v2860_v0 = vld [vmem:[%s3000_s14 + $0x9c] sm:$0xf]  ;;  %v3110_v5 = vor.u32 %v2864_v61, %v2759_v60 }
  0x22   : > { %4422 = vst [vmem:[#allocation11_spill] sm:$0xff] %v3090_v58  ;;  %v2761_v1 = vld [vmem:[%s3000_s14 + $0xb8] sm:$0xf0]  ;;  %v2859_v2 = vld [vmem:[%s3000_s14 + $0x94] sm:$0xf]  ;;  %v3113_v6 = vor.u32 %v2863_v63, %v2751_v62 }
  0x23   : > { %4423 = vst [vmem:[#allocation12_spill] sm:$0xff] %v3093_v59  ;;  %v2753_v4 = vld [vmem:[%s3000_s14 + $0xb0] sm:$0xf0]  ;;  %v3115_v9 = vor.u32 %v2860_v0, %v2761_v1  ;;  %v2727_v12 = vld [vmem:[%s3000_s14 + $0x58] sm:$0xf] }
  0x24   : > { %363 = vmatpush.bf16.xpose.msra.mxu0 %v3050_v32  ;;  %392 = vmatpush.bf16.xpose.msra.mxu1 %v3052_v33  ;;  %4424 = vst [vmem:[#allocation13_spill] sm:$0xff] %v3110_v5  ;;  %v3119_v10 = vor.u32 %v2859_v2, %v2753_v4  ;;  %v2856_v13 = vld [vmem:[%s3000_s14 + $0x74] sm:$0xf0]  ;;  %v2719_v14 = vld [vmem:[%s3000_s14 + $0x50] sm:$0xf] }
  0x25   : > { %421 = vmatpush.bf16.xpose.msra.mxu2 %v3054_v34  ;;  %4425 = vst [vmem:[#allocation14_spill] sm:$0xff] %v3113_v6  ;;  %v2855_v15 = vld [vmem:[%s3000_s14 + $0x6c] sm:$0xf0]  ;;  %v2852_v16 = vld [vmem:[%s3000_s14 + $0x5c] sm:$0xf]  ;;  %v3134_v24 = vor.u32 %v2856_v13, %v2727_v12 }
  0x26   : > { %450 = vmatpush.bf16.xpose.msra.mxu3 %v3056_v35  ;;  %4426 = vst [vmem:[#allocation15_spill] sm:$0xff] %v3115_v9  ;;  %v2729_v17 = vld [vmem:[%s3000_s14 + $0x78] sm:$0xf0]  ;;  %v2851_v18 = vld [vmem:[%s3000_s14 + $0x54] sm:$0xf]  ;;  %v3136_v25 = vor.u32 %v2855_v15, %v2719_v14 }
  0x27   : > { %4427 = vst [vmem:[#allocation16_spill] sm:$0xff] %v3119_v10  ;;  %v2721_v19 = vld [vmem:[%s3000_s14 + $0x70] sm:$0xf0]  ;;  %v3138_v26 = vor.u32 %v2852_v16, %v2729_v17  ;;  %v2695_v28 = vld [vmem:[%s3000_s14 + $0x18] sm:$0xf] }
  0x28   : > { %4428 = vst [vmem:[#allocation17_spill] sm:$0xff] %v3134_v24  ;;  %v3140_v27 = vor.u32 %v2851_v18, %v2721_v19  ;;  %v2848_v29 = vld [vmem:[%s3000_s14 + $0x34] sm:$0xf0]  ;;  %v2687_v30 = vld [vmem:[%s3000_s14 + $0x10] sm:$0xf] }
  0x29   : > { %4429 = vst [vmem:[#allocation18_spill] sm:$0xff] %v3136_v25  ;;  %v3153_v31 = vor.u32 %v2848_v29, %v2695_v28  ;;  %v2847_v36 = vld [vmem:[%s3000_s14 + $0x2c] sm:$0xf0]  ;;  %v2844_v37 = vld [vmem:[%s3000_s14 + $0x1c] sm:$0xf] }
  0x2a   : > { %4430 = vst [vmem:[#allocation19_spill] sm:$0xff] %v3138_v26  ;;  %v2697_v38 = vld [vmem:[%s3000_s14 + $0x38] sm:$0xf0]  ;;  %v3158_v39 = vor.u32 %v2847_v36, %v2687_v30  ;;  %v2843_v41 = vld [vmem:[%s3000_s14 + $0x14] sm:$0xf] }
  0x2b   : > { %4431 = vst [vmem:[#allocation20_spill] sm:$0xff] %v3140_v27  ;;  %v3160_v40 = vor.u32 %v2844_v37, %v2697_v38  ;;  %v2689_v42 = vld [vmem:[%s3000_s14 + $0x30] sm:$0xf0] }
  0x2c   : > { %364 = vmatpush.bf16.xpose.msra.mxu0 %v3073_v47  ;;  %393 = vmatpush.bf16.xpose.msra.mxu1 %v3078_v51  ;;  %4432 = vst [vmem:[#allocation21_spill] sm:$0xff] %v3153_v31  ;;  %v3165_v43 = vor.u32 %v2843_v41, %v2689_v42 }
  0x2d   : > { %422 = vmatpush.bf16.xpose.msra.mxu2 %v3080_v52  ;;  %4433 = vst [vmem:[#allocation22_spill] sm:$0xff] %v3158_v39 }
  0x2e   : > { %451 = vmatpush.bf16.xpose.msra.mxu3 %v3084_v55  ;;  %4434 = vst [vmem:[#allocation23_spill] sm:$0xff] %v3160_v40 }
  0x2f   : > { %4435 = vst [vmem:[#allocation24_spill] sm:$0xff] %v3165_v43 }
  0x30   : > { %4436 = vst [vmem:[#allocation25_spill] sm:$0xff] %v3219_v44 }
  0x31   : > { %656 = vst [vmem:[#allocation1] ss:$4 sm:$0xff] %v3219_v44 }
  0x32   : > { %4437 = vst [vmem:[#allocation26_spill] sm:$0xff] %v3229_v46 }
  0x33   : > { %365 = vmatmul.bf16.vlgmr.msra.gmra.mxu0 %v3073_v47  ;;  %394 = vmatmul.bf16.vlgmr.msra.gmra.mxu1 %v3078_v51  ;;  %658 = vst [vmem:[#allocation1 + $0x20] ss:$4 sm:$0xff] %v3229_v46 }
  0x34   : > { %477 = vmatpush.bf16.xpose.msrb.mxu0 %v3088_v57  ;;  %506 = vmatpush.bf16.xpose.msrb.mxu1 %v3093_v59 }
  0x35   : > { %535 = vmatpush.bf16.xpose.msrb.mxu2 %v3086_v56  ;;  %452 = vmatmul.bf16.vlgmr.msra.gmra.mxu3 %v3084_v55 }
  0x36   : > { %564 = vmatpush.bf16.xpose.msrb.mxu3 %v3090_v58  ;;  %423 = vmatmul.bf16.vlgmr.msra.gmra.mxu2 %v3080_v52 }
  0x38   : > { %v661_v45 = vld.sshfl [vmem:[#allocation1 + $0x10] sm:$0xff pattern:$0x73625140]  ;;  %v659_v48 = vld.sshfl [vmem:[#allocation1] sm:$0xff pattern:$0x73625140] }
  0x39   : > { %v662_v49 = vld.sshfl [vmem:[#allocation1 + $0x18] sm:$0xff pattern:$0x73625140]  ;;  %v660_v53 = vld.sshfl [vmem:[#allocation1 + $0x8] sm:$0xff pattern:$0x73625140] }
  0x3a   : > { %791 = vst [vmem:[#allocation1] ss:$4 sm:$0xff] %v787_v50  ;;  %v3236_v60 = vld.sshfl [vmem:[#allocation1 + $0x30] sm:$0xff pattern:$0x73625140] }
  0x3b   : > { %v3238_v61 = vld.sshfl [vmem:[#allocation1 + $0x20] sm:$0xff pattern:$0x73625140]  ;;  %v3240_v62 = vld.sshfl [vmem:[#allocation1 + $0x38] sm:$0xff pattern:$0x73625140] }
  0x3c   : > { %478 = vmatpush.bf16.xpose.msrb.mxu0 %v3113_v6  ;;  %507 = vmatpush.bf16.xpose.msrb.mxu1 %v3119_v10  ;;  %v3242_v63 = vld.sshfl [vmem:[#allocation1 + $0x28] sm:$0xff pattern:$0x73625140] }
  0x3d   : > { %536 = vmatpush.bf16.xpose.msrb.mxu2 %v3110_v5  ;;  %793 = vst [vmem:[#allocation1 + $0x20] ss:$4 sm:$0xff] %v788_v54  ;;  %v675_v54 = vpack.c.bf16 %v659_v48, %v659_v48 }
  0x3e   : > { %565 = vmatpush.bf16.xpose.msrb.mxu3 %v3115_v9 }
  0x41   : > { %v794_v0 = vld.sshfl [vmem:[#allocation1] sm:$0xff pattern:$0x73625140]  ;;  %v795_v1 = vld.sshfl [vmem:[#allocation1 + $0x8] sm:$0xff pattern:$0x73625140] }
  0x42   : > { %v796_v2 = vld.sshfl [vmem:[#allocation1 + $0x10] sm:$0xff pattern:$0x73625140]  ;;  %v811_v4 = vsel %vm810_vm0, %v794_v0, 0.0  ;;  %v812_v12 = vsel %vm810_vm0, %v795_v1, 0.0 }
  0x43   : > { %370 = vmatmul.bf16.gmra.mxu0 %v3050_v32  ;;  %399 = vmatmul.bf16.gmra.mxu1 %v3052_v33  ;;  %v814_v13 = vsel %vm810_vm0, %v796_v2, 0.0  ;;  %v797_v14 = vld.sshfl [vmem:[#allocation1 + $0x18] sm:$0xff pattern:$0x73625140]  ;;  %v813_v15 = vadd.f32 %v812_v12, %v811_v4  ;;  %v677_v2 = vpack.c.bf16 %v661_v45, %v661_v45  ;;  %v676_v4 = vpack.c.bf16 %v660_v53, %v660_v53 }
  0x44   : > { %479 = vmatpush.bf16.xpose.msrb.mxu0 %v3136_v25  ;;  %508 = vmatpush.bf16.xpose.msrb.mxu1 %v3140_v27  ;;  %v816_v16 = vsel %vm810_vm0, %v797_v14, 0.0  ;;  %v798_v18 = vld.sshfl [vmem:[#allocation1 + $0x20] sm:$0xff pattern:$0x73625140] }
  0x45   : > { %537 = vmatpush.bf16.xpose.msrb.mxu2 %v3134_v24  ;;  %457 = vmatmul.bf16.gmra.mxu3 %v3056_v35  ;;  %v815_v17 = vadd.f32 %v814_v13, %v813_v15  ;;  %v799_v19 = vld.sshfl [vmem:[#allocation1 + $0x28] sm:$0xff pattern:$0x73625140]  ;;  %v818_v29 = vsel %vm810_vm0, %v798_v18, 0.0  ;;  %v678_v13 = vpack.c.bf16 %v662_v49, %v662_v49 }
  0x46   : > { %566 = vmatpush.bf16.xpose.msrb.mxu3 %v3138_v26  ;;  %428 = vmatmul.bf16.gmra.mxu2 %v3054_v34  ;;  %v820_v30 = vsel %vm810_vm0, %v799_v19, 0.0  ;;  %v800_v36 = vld.sshfl [vmem:[#allocation1 + $0x30] sm:$0xff pattern:$0x73625140]  ;;  %v679_v19 = vpack.c.bf16 %v3238_v61, %v3238_v61 }
  0x47   : > { %v817_v28 = vadd.f32 %v816_v16, %v815_v17  ;;  %v822_v38 = vsel %vm810_vm0, %v800_v36, 0.0  ;;  %v801_v41 = vld.sshfl [vmem:[#allocation1 + $0x38] sm:$0xff pattern:$0x73625140]  ;;  %v680_v36 = vpack.c.bf16 %v3242_v63, %v3242_v63 }
  0x48   : > { %v824_v50 = vsel %vm810_vm0, %v801_v41, 0.0 }
  0x49   : > { %v819_v37 = vadd.f32 %v818_v29, %v817_v28 }
  0x4b   : > { %v821_v42 = vadd.f32 %v820_v30, %v819_v37  ;;  %v681_v30 = vpack.c.bf16 %v3236_v60, %v3236_v60 }
  0x4c   : > { %480 = vmatpush.bf16.xpose.msrb.mxu0 %v3158_v39  ;;  %509 = vmatpush.bf16.xpose.msrb.mxu1 %v3165_v43 }
  0x4d   : > { %538 = vmatpush.bf16.xpose.msrb.mxu2 %v3153_v31  ;;  %v823_v0 = vadd.f32 %v822_v38, %v821_v42  ;;  %v682_v38 = vpack.c.bf16 %v3240_v62, %v3240_v62 }
  0x4e   : > { %567 = vmatpush.bf16.xpose.msrb.mxu3 %v3160_v40 }
  0x4f   : > { %v825_v14 = vadd.f32 %v824_v50, %v823_v0 }
  0x51   : > { %826 = vadd.xlane.f32.xlu0 %v825_v14 }
  0x53   : > { %375 = vmatmul.bf16.gmra.mxu0 %v3030_v20  ;;  %404 = vmatmul.bf16.gmra.mxu1 %v3032_v21 }
  0x54   : > { %687 = vmatpush.bf16.xpose.msra.mxu0 %v3005_v3  ;;  %700 = vmatpush.bf16.xpose.msra.mxu1 %v3010_v7 }
  0x55   : > { %713 = vmatpush.bf16.xpose.msra.mxu2 %v3012_v8  ;;  %462 = vmatmul.bf16.gmra.mxu3 %v3036_v23 }
  0x56   : > { %726 = vmatpush.bf16.xpose.msra.mxu3 %v3017_v11  ;;  %433 = vmatmul.bf16.gmra.mxu2 %v3034_v22 }
  0x5c   : > { %688 = vmatpush.bf16.xpose.msra.mxu0 %v3030_v20  ;;  %701 = vmatpush.bf16.xpose.msra.mxu1 %v3032_v21 }
  0x5d   : > { %714 = vmatpush.bf16.xpose.msra.mxu2 %v3034_v22 }
  0x5e   : > { %727 = vmatpush.bf16.xpose.msra.mxu3 %v3036_v23 }
  0x63   : > { %380 = vmatmul.bf16.gmra.mxu0 %v3005_v3  ;;  %409 = vmatmul.bf16.gmra.mxu1 %v3010_v7 }
  0x64   : > { %689 = vmatpush.bf16.xpose.msra.mxu0 %v3050_v32  ;;  %702 = vmatpush.bf16.xpose.msra.mxu1 %v3052_v33 }
  0x65   : > { %715 = vmatpush.bf16.xpose.msra.mxu2 %v3054_v34  ;;  %467 = vmatmul.bf16.gmra.mxu3 %v3017_v11 }
  0x66   : > { %728 = vmatpush.bf16.xpose.msra.mxu3 %v3056_v35  ;;  %438 = vmatmul.bf16.gmra.mxu2 %v3012_v8 }
  0x6c   : > { %690 = vmatpush.bf16.xpose.msra.mxu0 %v3073_v47  ;;  %703 = vmatpush.bf16.xpose.msra.mxu1 %v3078_v51 }
  0x6d   : > { %716 = vmatpush.bf16.xpose.msra.mxu2 %v3080_v52 }
  0x6e   : > { %729 = vmatpush.bf16.xpose.msra.mxu3 %v3084_v55 }
  0x73   : > { %481 = vmatmul.bf16.vlgmr.msrb.gmra.mxu0 %v3158_v39  ;;  %510 = vmatmul.bf16.vlgmr.msrb.gmra.mxu1 %v3165_v43 }
  0x74   : > { %739 = vmatpush.bf16.xpose.msrb.mxu0 %v3088_v57  ;;  %752 = vmatpush.bf16.xpose.msrb.mxu1 %v3093_v59 }
  0x75   : > { %568 = vmatmul.bf16.vlgmr.msrb.gmra.mxu3 %v3160_v40 }
  0x76   : > { %539 = vmatmul.bf16.vlgmr.msrb.gmra.mxu2 %v3153_v31  ;;  %778 = vmatpush.bf16.xpose.msrb.mxu3 %v3090_v58 }
  0x77   : > { %765 = vmatpush.bf16.xpose.msrb.mxu2 %v3086_v56 }
  0x7c   : > { %740 = vmatpush.bf16.xpose.msrb.mxu0 %v3113_v6  ;;  %753 = vmatpush.bf16.xpose.msrb.mxu1 %v3119_v10 }
  0x7e   : > { %779 = vmatpush.bf16.xpose.msrb.mxu3 %v3115_v9 }
  0x7f   : > { %766 = vmatpush.bf16.xpose.msrb.mxu2 %v3110_v5 }
  0x83   : > { %486 = vmatmul.bf16.gmra.mxu0 %v3136_v25  ;;  %515 = vmatmul.bf16.gmra.mxu1 %v3140_v27 }
  0x84   : > { %741 = vmatpush.bf16.xpose.msrb.mxu0 %v3136_v25  ;;  %754 = vmatpush.bf16.xpose.msrb.mxu1 %v3140_v27 }
  0x85   : > { %573 = vmatmul.bf16.gmra.mxu3 %v3138_v26 }
  0x86   : > { %544 = vmatmul.bf16.gmra.mxu2 %v3134_v24  ;;  %780 = vmatpush.bf16.xpose.msrb.mxu3 %v3138_v26 }
  0x87   : > { %767 = vmatpush.bf16.xpose.msrb.mxu2 %v3134_v24 }
  0x8c   : > { %742 = vmatpush.bf16.xpose.msrb.mxu0 %v3158_v39  ;;  %755 = vmatpush.bf16.xpose.msrb.mxu1 %v3165_v43 }
  0x8e   : > { %781 = vmatpush.bf16.xpose.msrb.mxu3 %v3160_v40 }
  0x8f   : > { %768 = vmatpush.bf16.xpose.msrb.mxu2 %v3153_v31 }
  0x93   : > { %491 = vmatmul.bf16.gmra.mxu0 %v3113_v6  ;;  %520 = vmatmul.bf16.gmra.mxu1 %v3119_v10 }
  0x95   : > { %578 = vmatmul.bf16.gmra.mxu3 %v3115_v9 }
  0x96   : > { %549 = vmatmul.bf16.gmra.mxu2 %v3110_v5 }
  0xa3   : > { %496 = vmatmul.bf16.gmra.mxu0 %v3088_v57  ;;  %525 = vmatmul.bf16.gmra.mxu1 %v3093_v59 }
  0xa5   : > { %583 = vmatmul.bf16.gmra.mxu3 %v3090_v58 }
  0xa6   : > { %554 = vmatmul.bf16.gmra.mxu2 %v3086_v56 }
  0xb0   : > { %v366_v1 = vpop.f32.mrf.mxu0  ;;  %v395_v12 = vpop.f32.mrf.mxu1 }
  0xb1   : > { %v396_v15 = vadd.f32 %v395_v12, %v366_v1 }
  0xb3   : > { %691 = vmatmul.bf16.vlgmr.msra.gmra.mxu0 %v675_v54  ;;  %704 = vmatmul.bf16.vlgmr.msra.gmra.mxu1 %v676_v4 }
  0xb4   : > { %1167 = vmatpush.bf16.msra.mxu0 %v3005_v3  ;;  %1180 = vmatpush.bf16.msra.mxu1 %v3010_v7 }
  0xb5   : > { %730 = vmatmul.bf16.vlgmr.msra.gmra.mxu3 %v678_v13 }
  0xb6   : > { %717 = vmatmul.bf16.vlgmr.msra.gmra.mxu2 %v677_v2  ;;  %1206 = vmatpush.bf16.msra.mxu3 %v3017_v11 }
  0xb7   : > { %1193 = vmatpush.bf16.msra.mxu2 %v3012_v8 }
  0xb8   : > { %v453_v53 = vpop.f32.mrf.mxu3  ;;  %v3260_v16 = vpop.f32.mrf.mxu0  ;;  %1168 = vmatpush.bf16.msra.mxu0 %v3030_v20  ;;  %1181 = vmatpush.bf16.msra.mxu1 %v3032_v21 }
  0xb9   : > { %v424_v48 = vpop.f32.mrf.mxu2  ;;  %v3262_v49 = vpop.f32.mrf.mxu1 }
  0xba   : > { %v425_v45 = vadd.f32 %v424_v48, %v396_v15  ;;  %1207 = vmatpush.bf16.msra.mxu3 %v3036_v23 }
  0xbb   : > { %1194 = vmatpush.bf16.msra.mxu2 %v3034_v22 }
  0xbc   : > { %v3265_v17 = vadd.f32 %v453_v53, %v425_v45  ;;  %1169 = vmatpush.bf16.msra.mxu0 %v3050_v32  ;;  %1182 = vmatpush.bf16.msra.mxu1 %v3052_v33 }
  0xbe   : > { %1208 = vmatpush.bf16.msra.mxu3 %v3056_v35 }
  0xbf   : > { %1195 = vmatpush.bf16.msra.mxu2 %v3054_v34 }
  0xc0   : > { %v3278_v28 = vpop.f32.mrf.mxu3  ;;  %v371_v29 = vpop.f32.mrf.mxu0  ;;  %1170 = vmatpush.bf16.msra.mxu0 %v3073_v47  ;;  %1183 = vmatpush.bf16.msra.mxu1 %v3078_v51  ;;  %v589_v51 = vlaneseq }
  0xc1   : > { %v3273_v18 = vpop.f32.mrf.mxu2  ;;  %v400_v37 = vpop.f32.mrf.mxu1 }
  0xc2   : > { %v401_v41 = vadd.f32 %v400_v37, %v371_v29  ;;  %1209 = vmatpush.bf16.msra.mxu3 %v3084_v55 }
  0xc3   : > { %1196 = vmatpush.bf16.msra.mxu2 %v3080_v52  ;;  %743 = vmatmul.bf16.vlgmr.msrb.gmra.mxu0 %v679_v19 }
  0xc4   : > { %756 = vmatmul.bf16.vlgmr.msrb.gmra.mxu1 %v680_v36  ;;  %1219 = vmatpush.bf16.msrb.mxu0 %v3088_v57 }
  0xc5   : > { %782 = vmatmul.bf16.vlgmr.msrb.gmra.mxu3 %v682_v38  ;;  %1232 = vmatpush.bf16.msrb.mxu1 %v3093_v59 }
  0xc6   : > { %769 = vmatmul.bf16.vlgmr.msrb.gmra.mxu2 %v681_v30  ;;  %1258 = vmatpush.bf16.msrb.mxu3 %v3090_v58 }
  0xc7   : > { %1245 = vmatpush.bf16.msrb.mxu2 %v3086_v56 }
  0xc8   : > { %v458_v62 = vpop.f32.mrf.mxu3  ;;  %v373_v63 = vpop.f32.mrf.mxu0  ;;  %1220 = vmatpush.bf16.msrb.mxu0 %v3113_v6 }
  0xc9   : > { %v429_v60 = vpop.f32.mrf.mxu2  ;;  %v402_v42 = vpop.f32.mrf.mxu1  ;;  %1233 = vmatpush.bf16.msrb.mxu1 %v3119_v10 }
  0xca   : > { %v430_v61 = vadd.f32 %v429_v60, %v401_v41  ;;  %1259 = vmatpush.bf16.msrb.mxu3 %v3115_v9  ;;  %v403_v6 = vadd.f32 %v402_v42, %v373_v63  ;;  %v3318_v42 = vshrl.u32 %v589_v51, 7 }
  0xcb   : > { %1246 = vmatpush.bf16.msrb.mxu2 %v3110_v5 }
  0xcc   : > { %v3295_v50 = vadd.f32 %v458_v62, %v430_v61  ;;  %1221 = vmatpush.bf16.msrb.mxu0 %v3136_v25  ;;  %4438 = vst [vmem:[#allocation27_spill] sm:$0xff] %v3318_v42 }
  0xcd   : > { %1234 = vmatpush.bf16.msrb.mxu1 %v3140_v27  ;;  %v398_v27 = vadd.f32 %v3262_v49, %v3260_v16 }
  0xce   : > { %1260 = vmatpush.bf16.msrb.mxu3 %v3138_v26 }
  0xcf   : > { %1247 = vmatpush.bf16.msrb.mxu2 %v3134_v24  ;;  %v427_v25 = vadd.f32 %v3273_v18, %v398_v27 }
  0xd0   : > { %v460_v0 = vpop.f32.mrf.mxu3  ;;  %v376_v1 = vpop.f32.mrf.mxu0  ;;  %1222 = vmatpush.bf16.msrb.mxu0 %v3158_v39 }
  0xd1   : > { %v431_v54 = vpop.f32.mrf.mxu2  ;;  %v405_v2 = vpop.f32.mrf.mxu1  ;;  %1235 = vmatpush.bf16.msrb.mxu1 %v3165_v43  ;;  %v456_v5 = vadd.f32 %v3278_v28, %v427_v25 }
  0xd2   : > { %v406_v4 = vadd.f32 %v405_v2, %v376_v1  ;;  %1261 = vmatpush.bf16.msrb.mxu3 %v3160_v40  ;;  %v432_v59 = vadd.f32 %v431_v54, %v403_v6 }
  0xd3   : > { %1248 = vmatpush.bf16.msrb.mxu2 %v3153_v31 }
  0xd4   : > { %v461_v52 = vadd.f32 %v460_v0, %v432_v59 }
  0xd8   : > { %v463_v14 = vpop.f32.mrf.mxu3  ;;  %v378_v15 = vpop.f32.mrf.mxu0 }
  0xd9   : > { %v434_v12 = vpop.f32.mrf.mxu2  ;;  %v407_v48 = vpop.f32.mrf.mxu1 }
  0xda   : > { %v435_v13 = vadd.f32 %v434_v12, %v406_v4  ;;  %v408_v58 = vadd.f32 %v407_v48, %v378_v15 }
  0xdc   : > { %v464_v45 = vadd.f32 %v463_v14, %v435_v13 }
  0xe0   : > { %v465_v19 = vpop.f32.mrf.mxu3  ;;  %v381_v29 = vpop.f32.mrf.mxu0 }
  0xe1   : > { %v436_v53 = vpop.f32.mrf.mxu2  ;;  %v410_v30 = vpop.f32.mrf.mxu1 }
  0xe2   : > { %v411_v36 = vadd.f32 %v410_v30, %v381_v29  ;;  %v437_v56 = vadd.f32 %v436_v53, %v408_v58  ;;  %v3356_v53 = vadd.s32 40, %v3318_v42 }
  0xe4   : > { %v466_v32 = vadd.f32 %v465_v19, %v437_v56  ;;  %4444 = vst [vmem:[#allocation33_spill] sm:$0xff] %v3356_v53 }
  0xe8   : > { %v468_v38 = vpop.f32.mrf.mxu3  ;;  %v383_v41 = vpop.f32.mrf.mxu0 }
  0xe9   : > { %v439_v37 = vpop.f32.mrf.mxu2  ;;  %v412_v60 = vpop.f32.mrf.mxu1 }
  0xea   : > { %v440_v6 = vadd.f32 %v439_v37, %v411_v36  ;;  %v413_v0 = vadd.f32 %v412_v60, %v383_v41  ;;  %v3374_v60 = vadd.s32 48, %v3318_v42 }
  0xec   : > { %4445 = vst [vmem:[#allocation34_spill] sm:$0xff] %v3374_v60 }
  0xf0   : > { %v3310_v62 = vpop.f32.mrf.mxu3  ;;  %v482_v1 = vpop.f32.mrf.mxu0 }
  0xf1   : > { %v3308_v61 = vpop.f32.mrf.mxu2  ;;  %v511_v2 = vpop.f32.mrf.mxu1  ;;  %v483_v55 = vadd.f32 %v482_v1, %v3265_v17  ;;  %v3321_v17 = vadd.s32 8, %v3318_v42 }
  0xf3   : > { %v512_v63 = vadd.f32 %v511_v2, %v483_v55  ;;  %4439 = vst [vmem:[#allocation28_spill] sm:$0xff] %v3321_v17  ;;  %v469_v55 = vadd.f32 %v468_v38, %v440_v6 }
  0xf8   : > { %v569_v12 = vpop.f32.mrf.mxu3  ;;  %v484_v46 = vpop.f32.mrf.mxu0 }
  0xf9   : > { %v540_v4 = vpop.f32.mrf.mxu2  ;;  %v513_v44 = vpop.f32.mrf.mxu1  ;;  %v485_v57 = vadd.f32 %v484_v46, %v456_v5 }
  0xfa   : > { %v541_v46 = vadd.f32 %v540_v4, %v512_v63 }
  0xfb   : > { %v514_v18 = vadd.f32 %v513_v44, %v485_v57  ;;  %v3326_v57 = vadd.s32 16, %v3318_v42 }
  0xfc   : > { %v3330_v15 = vadd.f32 %v569_v12, %v541_v46 }
  0xfd   : > { %4441 = vst [vmem:[#allocation30_spill] sm:$0xff] %v3326_v57 }
 0x100   : > { %v571_v14 = vpop.f32.mrf.mxu3  ;;  %v487_v43 = vpop.f32.mrf.mxu0 }
 0x101   : > { %v542_v13 = vpop.f32.mrf.mxu2  ;;  %v516_v40 = vpop.f32.mrf.mxu1  ;;  %v488_v16 = vadd.f32 %v487_v43, %v3295_v50  ;;  %v3323_v50 = vand.u32 127, %v589_v51 }
 0x102   : > { %v543_v25 = vadd.f32 %v542_v13, %v514_v18 }
 0x103   : > { %v517_v5 = vadd.f32 %v516_v40, %v488_v16  ;;  %4440 = vst [vmem:[#allocation29_spill] sm:$0xff] %v3323_v50  ;;  %vm601_vm1 = vcmp.eq.s32.totalorder %v3321_v17, %v3323_v50  ;;  %vm600_vm2 = vcmp.eq.s32.totalorder %v3318_v42, %v3323_v50  ;;  %vm4401_vm3 = vcmp.eq.s32.totalorder %v3326_v57, %v3323_v50 }
 0x104   : > { %v3328_v56 = vadd.f32 %v571_v14, %v543_v25  ;;  %v608_v19 = vsel %vm600_vm2, %v3330_v15, 0.0  ;;  %vm4399_vm7 = vcmp.eq.s32.totalorder %v3356_v53, %v3323_v50  ;;  %vm4397_vm8 = vcmp.eq.s32.totalorder %v3374_v60, %v3323_v50 }
 0x105   : > { %v3384_v14 = vsel %vm616_vm4, %v608_v19, 0.0 }
 0x106   : > { %v609_v48 = vsel %vm601_vm1, %v3328_v56, 0.0 }
 0x107   : > { %v3369_v38 = vsel %vm616_vm4, %v609_v48, 0.0 }
 0x108   : > { %v574_v29 = vpop.f32.mrf.mxu3  ;;  %v489_v30 = vpop.f32.mrf.mxu0 }
 0x109   : > { %v545_v39 = vpop.f32.mrf.mxu2  ;;  %v518_v31 = vpop.f32.mrf.mxu1  ;;  %v490_v33 = vadd.f32 %v489_v30, %v461_v52  ;;  %v619_v30 = vadd.f32 %v3369_v38, %v3384_v14 }
 0x10a   : > { %v546_v59 = vadd.f32 %v545_v39, %v517_v5  ;;  %v3413_v5 = vadd.s32 56, %v3318_v42 }
 0x10b   : > { %v519_v28 = vadd.f32 %v518_v31, %v490_v33 }
 0x10c   : > { %4446 = vst [vmem:[#allocation35_spill] sm:$0xff] %v3413_v5  ;;  %vm4396_vm9 = vcmp.eq.s32.totalorder %v3413_v5, %v3323_v50 }
 0x110   : > { %v576_v24 = vpop.f32.mrf.mxu3  ;;  %v492_v10 = vpop.f32.mrf.mxu0 }
 0x111   : > { %v547_v26 = vpop.f32.mrf.mxu2  ;;  %v521_v9 = vpop.f32.mrf.mxu1  ;;  %v493_v58 = vadd.f32 %v492_v10, %v464_v45 }
 0x112   : > { %v548_v44 = vadd.f32 %v547_v26, %v519_v28  ;;  %v442_v26 = vadd.f32 %v3308_v61, %v413_v0 }
 0x113   : > { %v522_v54 = vadd.f32 %v521_v9, %v493_v58  ;;  %v3344_v9 = vadd.s32 32, %v3318_v42 }
 0x114   : > { %v3351_v45 = vadd.f32 %v576_v24, %v548_v44  ;;  %v471_v61 = vadd.f32 %v3310_v62, %v442_v26 }
 0x115   : > { %4443 = vst [vmem:[#allocation32_spill] sm:$0xff] %v3344_v9  ;;  %vm4398_vm6 = vcmp.eq.s32.totalorder %v3344_v9, %v3323_v50 }
 0x118   : > { %v579_v49 = vpop.f32.mrf.mxu3  ;;  %v494_v35 = vpop.f32.mrf.mxu0 }
 0x119   : > { %v550_v47 = vpop.f32.mrf.mxu2  ;;  %v523_v27 = vpop.f32.mrf.mxu1  ;;  %v495_v43 = vadd.f32 %v494_v35, %v466_v32  ;;  %v3335_v32 = vadd.s32 24, %v3318_v42  ;;  %v3337_v35 = vadd.f32 %v574_v29, %v546_v59 }
 0x11a   : > { %v551_v51 = vadd.f32 %v550_v47, %v522_v54 }
 0x11b   : > { %4442 = vst [vmem:[#allocation31_spill] sm:$0xff] %v3335_v32  ;;  %v524_v31 = vadd.f32 %v523_v27, %v495_v43  ;;  %vm4400_vm5 = vcmp.eq.s32.totalorder %v3335_v32, %v3323_v50  ;;  %v610_v36 = vsel %vm4401_vm3, %v3337_v35, 0.0 }
 0x11c   : > { %v3366_v24 = vadd.f32 %v579_v49, %v551_v51  ;;  %v611_v1 = vsel %vm4400_vm5, %v3351_v45, 0.0  ;;  %v3387_v29 = vsel %vm616_vm4, %v610_v36, 0.0 }
 0x11d   : > { %v3400_v18 = vsel %vm616_vm4, %v611_v1, 0.0  ;;  %v621_v63 = vadd.f32 %v3387_v29, %v619_v30 }
 0x11e   : > { %v612_v16 = vsel %vm4398_vm6, %v3366_v24, 0.0 }
 0x11f   : > { %v3410_v25 = vsel %vm616_vm4, %v612_v16, 0.0  ;;  %v623_v58 = vadd.f32 %v3400_v18, %v621_v63  ;;  %v827_v16 = vpop.xlane.xlu0 %826 }
 0x120   : > { %v581_v40 = vpop.f32.mrf.mxu3  ;;  %v497_v10 = vpop.f32.mrf.mxu0 }
 0x121   : > { %v552_v52 = vpop.f32.mrf.mxu2  ;;  %v526_v33 = vpop.f32.mrf.mxu1  ;;  %v498_v39 = vadd.f32 %v497_v10, %v469_v55 }
 0x122   : > { %v553_v47 = vadd.f32 %v552_v52, %v524_v31  ;;  %v625_v52 = vadd.f32 %v3410_v25, %v623_v58 }
 0x123   : > { %v527_v37 = vadd.f32 %v526_v33, %v498_v39 }
 0x124   : > { %v3381_v2 = vadd.f32 %v581_v40, %v553_v47 }
 0x126   : > { %v613_v6 = vsel %vm4399_vm7, %v3381_v2, 0.0 }
 0x127   : > { %v3421_v28 = vsel %vm616_vm4, %v613_v6, 0.0 }
 0x128   : > { %v584_v12 = vpop.f32.mrf.mxu3  ;;  %v499_v13 = vpop.f32.mrf.mxu0  ;;  %v627_v0 = vadd.f32 %v3421_v28, %v625_v52 }
 0x129   : > { %v555_v41 = vpop.f32.mrf.mxu2  ;;  %v528_v62 = vpop.f32.mrf.mxu1  ;;  %v500_v27 = vadd.f32 %v499_v13, %v471_v61 }
 0x12a   : > { %v556_v4 = vadd.f32 %v555_v41, %v527_v37 }
 0x12b   : > { %v529_v59 = vadd.f32 %v528_v62, %v500_v27 }
 0x12c   : > { %v3397_v49 = vadd.f32 %v584_v12, %v556_v4 }
 0x12e   : > { %v614_v46 = vsel %vm4397_vm8, %v3397_v49, 0.0 }
 0x12f   : > { %v3425_v40 = vsel %vm616_vm4, %v614_v46, 0.0 }
 0x130   : > { %v586_v44 = vpop.f32.mrf.mxu3  ;;  %v692_v54 = vpop.f32.mrf.mxu0  ;;  %v629_v51 = vadd.f32 %v3425_v40, %v627_v0 }
 0x131   : > { %v557_v43 = vpop.f32.mrf.mxu2  ;;  %v705_v10 = vpop.f32.mrf.mxu1 }
 0x132   : > { %v558_v55 = vadd.f32 %v557_v43, %v529_v59  ;;  %v706_v12 = vadd.f32 %v705_v10, %v692_v54 }
 0x134   : > { %v3430_v33 = vadd.f32 %v586_v44, %v558_v55 }
 0x136   : > { %v615_v31 = vsel %vm4396_vm9, %v3430_v33, 0.0 }
 0x137   : > { %v3438_v39 = vsel %vm616_vm4, %v615_v31, 0.0 }
 0x138   : > { %v631_v26 = vadd.f32 %v3438_v39, %v629_v51  ;;  %v731_v19 = vpop.f32.mrf.mxu3  ;;  %v694_v36 = vpop.f32.mrf.mxu0 }
 0x139   : > { %v718_v48 = vpop.f32.mrf.mxu2  ;;  %v707_v37 = vpop.f32.mrf.mxu1 }
 0x13a   : > { %v632_v47 = vrot.slane %v631_v26, 4  ;;  %v719_v6 = vadd.f32 %v718_v48, %v706_v12 }
 0x13c   : > { %v633_v41 = vadd.f32 %v632_v47, %v631_v26  ;;  %v732_v43 = vadd.f32 %v731_v19, %v719_v6 }
 0x13e   : > { %v634_v61 = vrot.slane %v633_v41, 2 }
 0x140   : > { %v635_v1 = vadd.f32 %v634_v61, %v633_v41  ;;  %v733_v62 = vpop.f32.mrf.mxu3  ;;  %v744_v30 = vpop.f32.mrf.mxu0 }
 0x141   : > { %v720_v4 = vpop.f32.mrf.mxu2  ;;  %v757_v27 = vpop.f32.mrf.mxu1  ;;  %v745_v0 = vadd.f32 %v744_v30, %v732_v43 }
 0x142   : > { %v636_v13 = vrot.slane %v635_v1, 1 }
 0x143   : > { %v758_v31 = vadd.f32 %v757_v27, %v745_v0 }
 0x144   : > { %v3441_v63 = vadd.f32 %v636_v13, %v635_v1 }
 0x146   : > { %4447 = vst [vmem:[#allocation36_spill] sm:$0xff] %v3441_v63  ;;  %v828_v58 = vmul.f32 %v827_v16, %v3441_v63 }
 0x148   : > { %v829_v46 = vmax.f32 %v828_v58, 1e-16  ;;  %v783_v52 = vpop.f32.mrf.mxu3  ;;  %v746_v55 = vpop.f32.mrf.mxu0 }
 0x149   : > { %v770_v59 = vpop.f32.mrf.mxu2  ;;  %v759_v44 = vpop.f32.mrf.mxu1 }
 0x14a   : > { %2884 = vrsqrt.f32 %v829_v46  ;;  %v771_v37 = vadd.f32 %v770_v59, %v758_v31  ;;  %vm836_vm11 = vweird.f32 %v829_v46 }
 0x14c   : > { %v784_v61 = vadd.f32 %v783_v52, %v771_v37 }
 0x150   : > { %v2885_v51 = vpop.eup %2884  ;;  %v785_v26 = vpop.f32.mrf.mxu3 }
 0x151   : > { %v831_v54 = vmul.f32 %v2885_v51, %v829_v46  ;;  %v772_v10 = vpop.f32.mrf.mxu2  ;;  %vm837_vm10 = vweird.f32 %v2885_v51 }
 0x152   : > { %vm838_vm12 = vmor %vm836_vm11, %vm837_vm10  ;;  %vm4395_vm11 = vcmp.eq.s32.totalorder %v3318_v42, 0 }
 0x153   : > { %v832_v47 = vmul.f32 %v2885_v51, %v831_v54 }
 0x155   : > { %v833_v36 = vmul.f32 0.5, %v832_v47 }
 0x157   : > { %v834_v41 = vsub.f32 1.5, %v833_v36 }
 0x159   : > { %v835_v48 = vmul.f32 %v2885_v51, %v834_v41 }
 0x15b   : > { %v839_v19 = vsel %vm838_vm12, %v2885_v51, %v835_v48  ;;  %vm873_vm12 = vcmask 517120  }
 0x15c   : > { %v840_v1 = vmul.f32 %v839_v19, %v784_v61 }
 0x15e   : > { %v842_v4 = vrot.slane %v840_v1, 1 }
 0x160   : > { %v844_v12 = vsub.f32 %v840_v1, %v842_v4 }
 0x162   : > { %v845_v13 = vmul.f32 10.0, %v844_v12 }
 0x164   : > { %v846_v62 = vsub.f32 0.0, %v845_v13 }
 0x166   : > { %v847_v30 = vmul.f32 1.442695, %v846_v62 }
 0x168   : > { %2886 = vpow2.f32 %v847_v30 }
 0x16e   : > { %v2887_v16 = vpop.eup %2886 }
 0x16f   : > { %v849_v27 = vadd.f32 1.0, %v2887_v16 }
 0x171   : > { %2888 = vrcp.f32 %v849_v27  ;;  %v861_v43 = vand.u32 2147483648, %v849_v27  ;;  %v859_v46 = vand.u32 2147483647, %v849_v27  ;;  %vm855_vm14 = vweird.f32 %v849_v27 }
 0x173   : > { %v862_v44 = vor.u32 1.1754944e-38, %v861_v43  ;;  %vm860_vm10 = vcmp.eq.f32.partialorder %v859_v46, 8.507059e+37 }
 0x177   : > { %v2889_v6 = vpop.eup %2888 }
 0x178   : > { %v851_v58 = vmul.f32 %v2889_v6, %v849_v27  ;;  %vm856_vm13 = vweird.f32 %v2889_v6 }
 0x179   : > { %vm857_vm15 = vmor %vm855_vm14, %vm856_vm13 }
 0x17a   : > { %v852_v59 = vsub.f32 1.0, %v851_v58 }
 0x17c   : > { %v853_v55 = vmul.f32 %v2889_v6, %v852_v59 }
 0x17e   : > { %v854_v52 = vadd.f32 %v2889_v6, %v853_v55 }
 0x180   : > { %v858_v0 = vsel %vm857_vm15, %v2889_v6, %v854_v52 }
 0x181   : > { %v863_v51 = vsel %vm860_vm10, %v862_v44, %v858_v0 }
 0x182   : > { %v866_v54 = vsub.f32 1.0, %v863_v51  ;;  %v867_v10 = vperm.slane %v863_v51, 0 }
 0x184   : > { %v868_v31 = vperm.slane %v866_v54, 0 }
 0x186   : > { %v3447_v26 = vsel %vm4395_vm11, %v867_v10, %v868_v31 }
 0x187   : > { %v878_v47 = vsel %vm873_vm12, %v3447_v26, -inf }
 0x188   : > { %879 = vmax.xlane.f32.xlu0 %v878_v47 }
 0x1fb   : > { %v880_v36 = vpop.xlane.xlu0 %879 }
 0x1fc   : > { %vm881_vm13 = vcmp.eq.f32.partialorder %v3447_v26, %v880_v36 }
 0x1fd   : > { %v882_v37 = vsel %vm881_vm13, %v3323_v50, 64 }
 0x1fe   : > { %v883_v41 = vsel %vm873_vm12, %v882_v37, 2147483647 }
 0x1ff   : > { %v885_v48 = vshra.s32 %v883_v41, 16  ;;  %v884_v19 = vand.u32 65535, %v883_v41  ;;  %v2968_v41 = vmov 0.0  }
 0x201   : > { %v887_v61 = vcvt.s32.f32 %v885_v48  ;;  %v886_v4 = vcvt.s32.f32 %v884_v19 }
 0x203   : > { %888 = vmin.xlane.f32.xlu1 %v887_v61 }
 0x276   : > { %v889_v1 = vpop.xlane.xlu1 %888 }
 0x277   : > { %vm890_vm14 = vcmp.eq.f32.partialorder %v887_v61, %v889_v1  ;;  %v895_v13 = vcvt.f32.s32 %v889_v1 }
 0x278   : > { %v891_v12 = vsel %vm890_vm14, %v886_v4, inf }
 0x279   : > { %892 = vmin.xlane.f32.xlu1 %v891_v12  ;;  %v896_v30 = vshll.u32 %v895_v13, 16 }
 0x2ec   : > { %v893_v62 = vpop.xlane.xlu1 %892 }
 0x2ed   : > { %v894_v16 = vcvt.f32.s32 %v893_v62 }
 0x2ef   : > { %v897_v27 = vadd.s32 %v896_v30, %v894_v16 }
 0x2f1   : > { %vm898_vm15 = vcmp.eq.s32.totalorder %v3323_v50, %v897_v27 }
 0x2f2   : > { %v900_v6 = vsel %vm898_vm15, -inf, %v3447_v26  ;;  %v899_v48 = vsel %vm898_vm15, 1.0, %v2968_v41 }
 0x2f3   : > { %v901_v58 = vsel %vm873_vm12, %v900_v6, -inf }
 0x2f4   : > { %902 = vmax.xlane.f32.xlu2 %v901_v58 }
 0x367   : > { %v903_v59 = vpop.xlane.xlu2 %902 }
 0x368   : > { %vm904_vm10 = vcmp.eq.f32.partialorder %v900_v6, %v903_v59 }
 0x369   : > { %v905_v43 = vsel %vm904_vm10, %v3323_v50, 64 }
 0x36a   : > { %v906_v55 = vsel %vm873_vm12, %v905_v43, 2147483647 }
 0x36b   : > { %v908_v46 = vshra.s32 %v906_v55, 16  ;;  %v907_v44 = vand.u32 65535, %v906_v55 }
 0x36d   : > { %v910_v52 = vcvt.s32.f32 %v908_v46  ;;  %v909_v51 = vcvt.s32.f32 %v907_v44 }
 0x36f   : > { %911 = vmin.xlane.f32.xlu2 %v910_v52 }
 0x3e2   : > { %v912_v0 = vpop.xlane.xlu2 %911 }
 0x3e3   : > { %vm913_vm13 = vcmp.eq.f32.partialorder %v910_v52, %v912_v0  ;;  %v918_v10 = vcvt.f32.s32 %v912_v0 }
 0x3e4   : > { %v914_v54 = vsel %vm913_vm13, %v909_v51, inf }
 0x3e5   : > { %915 = vmin.xlane.f32.xlu0 %v914_v54  ;;  %v919_v47 = vshll.u32 %v918_v10, 16 }
 0x458   : > { %v916_v31 = vpop.xlane.xlu0 %915 }
 0x459   : > { %v917_v36 = vcvt.f32.s32 %v916_v31 }
 0x45b   : > { %v920_v37 = vadd.s32 %v919_v47, %v917_v36 }
 0x45d   : > { %vm921_vm14 = vcmp.eq.s32.totalorder %v3323_v50, %v920_v37 }
 0x45e   : > { %v923_v61 = vsel %vm921_vm14, -inf, %v900_v6  ;;  %v922_v19 = vsel %vm921_vm14, 1.0, %v899_v48 }
 0x45f   : > { %v924_v1 = vsel %vm873_vm12, %v923_v61, -inf }
 0x460   : > { %925 = vmax.xlane.f32.xlu1 %v924_v1 }
 0x4d3   : > { %v926_v4 = vpop.xlane.xlu1 %925 }
 0x4d4   : > { %vm927_vm10 = vcmp.eq.f32.partialorder %v923_v61, %v926_v4 }
 0x4d5   : > { %v928_v12 = vsel %vm927_vm10, %v3323_v50, 64 }
 0x4d6   : > { %v929_v13 = vsel %vm873_vm12, %v928_v12, 2147483647 }
 0x4d7   : > { %v931_v62 = vshra.s32 %v929_v13, 16  ;;  %v930_v16 = vand.u32 65535, %v929_v13 }
 0x4d9   : > { %v933_v30 = vcvt.s32.f32 %v931_v62  ;;  %v932_v59 = vcvt.s32.f32 %v930_v16 }
 0x4db   : > { %934 = vmin.xlane.f32.xlu2 %v933_v30 }
 0x54e   : > { %v935_v58 = vpop.xlane.xlu2 %934 }
 0x54f   : > { %vm936_vm13 = vcmp.eq.f32.partialorder %v933_v30, %v935_v58  ;;  %v941_v6 = vcvt.f32.s32 %v935_v58 }
 0x550   : > { %v937_v27 = vsel %vm936_vm13, %v932_v59, inf }
 0x551   : > { %938 = vmin.xlane.f32.xlu0 %v937_v27  ;;  %v942_v55 = vshll.u32 %v941_v6, 16 }
 0x5c4   : > { %v939_v43 = vpop.xlane.xlu0 %938 }
 0x5c5   : > { %v940_v46 = vcvt.f32.s32 %v939_v43 }
 0x5c7   : > { %v943_v52 = vadd.s32 %v942_v55, %v940_v46 }
 0x5c9   : > { %vm944_vm15 = vcmp.eq.s32.totalorder %v3323_v50, %v943_v52 }
 0x5ca   : > { %v946_v44 = vsel %vm944_vm15, -inf, %v923_v61  ;;  %v945_v0 = vsel %vm944_vm15, 1.0, %v922_v19 }
 0x5cb   : > { %v947_v51 = vsel %vm873_vm12, %v946_v44, -inf }
 0x5cc   : > { %948 = vmax.xlane.f32.xlu1 %v947_v51 }
 0x63f   : > { %v949_v54 = vpop.xlane.xlu1 %948 }
 0x640   : > { %vm950_vm14 = vcmp.eq.f32.partialorder %v946_v44, %v949_v54 }
 0x641   : > { %v951_v10 = vsel %vm950_vm14, %v3323_v50, 64 }
 0x642   : > { %v952_v31 = vsel %vm873_vm12, %v951_v10, 2147483647 }
 0x643   : > { %v954_v47 = vshra.s32 %v952_v31, 16  ;;  %v953_v37 = vand.u32 65535, %v952_v31 }
 0x645   : > { %v956_v36 = vcvt.s32.f32 %v954_v47  ;;  %v955_v1 = vcvt.s32.f32 %v953_v37 }
 0x647   : > { %957 = vmin.xlane.f32.xlu2 %v956_v36 }
 0x6ba   : > { %v958_v48 = vpop.xlane.xlu2 %957 }
 0x6bb   : > { %vm959_vm10 = vcmp.eq.f32.partialorder %v956_v36, %v958_v48  ;;  %v964_v61 = vcvt.f32.s32 %v958_v48 }
 0x6bc   : > { %v960_v4 = vsel %vm959_vm10, %v955_v1, inf }
 0x6bd   : > { %961 = vmin.xlane.f32.xlu0 %v960_v4  ;;  %v965_v12 = vshll.u32 %v964_v61, 16 }
 0x730   : > { %v962_v19 = vpop.xlane.xlu0 %961 }
 0x731   : > { %v963_v13 = vcvt.f32.s32 %v962_v19 }
 0x733   : > { %v966_v62 = vadd.s32 %v965_v12, %v963_v13 }
 0x735   : > { %vm967_vm13 = vcmp.eq.s32.totalorder %v3323_v50, %v966_v62 }
 0x736   : > { %v969_v30 = vsel %vm967_vm13, -inf, %v946_v44  ;;  %v968_v16 = vsel %vm967_vm13, 1.0, %v945_v0 }
 0x737   : > { %v970_v58 = vsel %vm873_vm12, %v969_v30, -inf }
 0x738   : > { %971 = vmax.xlane.f32.xlu1 %v970_v58 }
 0x7ab   : > { %v972_v59 = vpop.xlane.xlu1 %971 }
 0x7ac   : > { %vm973_vm15 = vcmp.eq.f32.partialorder %v969_v30, %v972_v59 }
 0x7ad   : > { %v974_v27 = vsel %vm973_vm15, %v3323_v50, 64 }
 0x7ae   : > { %v975_v6 = vsel %vm873_vm12, %v974_v27, 2147483647 }
 0x7af   : > { %v977_v43 = vshra.s32 %v975_v6, 16  ;;  %v976_v46 = vand.u32 65535, %v975_v6 }
 0x7b1   : > { %v979_v55 = vcvt.s32.f32 %v977_v43  ;;  %v978_v51 = vcvt.s32.f32 %v976_v46 }
 0x7b3   : > { %980 = vmin.xlane.f32.xlu2 %v979_v55 }
 0x826   : > { %v981_v52 = vpop.xlane.xlu2 %980 }
 0x827   : > { %vm982_vm14 = vcmp.eq.f32.partialorder %v979_v55, %v981_v52  ;;  %v987_v44 = vcvt.f32.s32 %v981_v52 }
 0x828   : > { %v983_v54 = vsel %vm982_vm14, %v978_v51, inf }
 0x829   : > { %984 = vmin.xlane.f32.xlu0 %v983_v54  ;;  %v988_v10 = vshll.u32 %v987_v44, 16 }
 0x89c   : > { %v985_v0 = vpop.xlane.xlu0 %984 }
 0x89d   : > { %v986_v31 = vcvt.f32.s32 %v985_v0 }
 0x89f   : > { %v989_v47 = vadd.s32 %v988_v10, %v986_v31 }
 0x8a1   : > { %vm990_vm10 = vcmp.eq.s32.totalorder %v3323_v50, %v989_v47 }
 0x8a2   : > { %v992_v36 = vsel %vm990_vm10, -inf, %v969_v30  ;;  %v991_v37 = vsel %vm990_vm10, 1.0, %v968_v16 }
 0x8a3   : > { %v993_v48 = vsel %vm873_vm12, %v992_v36, -inf }
 0x8a4   : > { %994 = vmax.xlane.f32.xlu1 %v993_v48 }
 0x917   : > { %v995_v1 = vpop.xlane.xlu1 %994 }
 0x918   : > { %vm996_vm13 = vcmp.eq.f32.partialorder %v992_v36, %v995_v1 }
 0x919   : > { %v997_v4 = vsel %vm996_vm13, %v3323_v50, 64 }
 0x91a   : > { %v998_v61 = vsel %vm873_vm12, %v997_v4, 2147483647 }
 0x91b   : > { %v1000_v19 = vshra.s32 %v998_v61, 16  ;;  %v999_v13 = vand.u32 65535, %v998_v61 }
 0x91d   : > { %v1002_v12 = vcvt.s32.f32 %v1000_v19  ;;  %v1001_v58 = vcvt.s32.f32 %v999_v13 }
 0x91f   : > { %1003 = vmin.xlane.f32.xlu2 %v1002_v12 }
 0x992   : > { %v1004_v62 = vpop.xlane.xlu2 %1003 }
 0x993   : > { %vm1005_vm15 = vcmp.eq.f32.partialorder %v1002_v12, %v1004_v62  ;;  %v1010_v30 = vcvt.f32.s32 %v1004_v62 }
 0x994   : > { %v1006_v59 = vsel %vm1005_vm15, %v1001_v58, inf }
 0x995   : > { %1007 = vmin.xlane.f32.xlu0 %v1006_v59  ;;  %v1011_v27 = vshll.u32 %v1010_v30, 16 }
 0xa08   : > { %v1008_v16 = vpop.xlane.xlu0 %1007 }
 0xa09   : > { %v1009_v6 = vcvt.f32.s32 %v1008_v16 }
 0xa0b   : > { %v1012_v43 = vadd.s32 %v1011_v27, %v1009_v6 }
 0xa0d   : > { %vm1013_vm14 = vcmp.eq.s32.totalorder %v3323_v50, %v1012_v43 }
 0xa0e   : > { %v1015_v55 = vsel %vm1013_vm14, -inf, %v992_v36  ;;  %v1014_v46 = vsel %vm1013_vm14, 1.0, %v991_v37 }
 0xa0f   : > { %v1016_v52 = vsel %vm873_vm12, %v1015_v55, -inf }
 0xa10   : > { %1017 = vmax.xlane.f32.xlu1 %v1016_v52 }
 0xa83   : > { %v1018_v51 = vpop.xlane.xlu1 %1017 }
 0xa84   : > { %vm1019_vm10 = vcmp.eq.f32.partialorder %v1015_v55, %v1018_v51 }
 0xa85   : > { %v1020_v54 = vsel %vm1019_vm10, %v3323_v50, 64 }
 0xa86   : > { %v1021_v44 = vsel %vm873_vm12, %v1020_v54, 2147483647 }
 0xa87   : > { %v1023_v0 = vshra.s32 %v1021_v44, 16  ;;  %v1022_v31 = vand.u32 65535, %v1021_v44 }
 0xa89   : > { %v1025_v10 = vcvt.s32.f32 %v1023_v0  ;;  %v1024_v48 = vcvt.s32.f32 %v1022_v31 }
 0xa8b   : > { %1026 = vmin.xlane.f32.xlu2 %v1025_v10 }
 0xafe   : > { %v1027_v47 = vpop.xlane.xlu2 %1026 }
 0xaff   : > { %vm1028_vm13 = vcmp.eq.f32.partialorder %v1025_v10, %v1027_v47  ;;  %v1033_v36 = vcvt.f32.s32 %v1027_v47 }
 0xb00   : > { %v1029_v1 = vsel %vm1028_vm13, %v1024_v48, inf }
 0xb01   : > { %1030 = vmin.xlane.f32.xlu0 %v1029_v1  ;;  %v1034_v4 = vshll.u32 %v1033_v36, 16 }
 0xb74   : > { %v1031_v37 = vpop.xlane.xlu0 %1030 }
 0xb75   : > { %v1032_v61 = vcvt.f32.s32 %v1031_v37 }
 0xb77   : > { %v1035_v19 = vadd.s32 %v1034_v4, %v1032_v61 }
 0xb79   : > { %vm1036_vm15 = vcmp.eq.s32.totalorder %v3323_v50, %v1035_v19 }
 0xb7a   : > { %v1038_v12 = vsel %vm1036_vm15, -inf, %v1015_v55  ;;  %v1037_v13 = vsel %vm1036_vm15, 1.0, %v1014_v46 }
 0xb7b   : > { %v1039_v62 = vsel %vm873_vm12, %v1038_v12, -inf }
 0xb7c   : > { %1040 = vmax.xlane.f32.xlu1 %v1039_v62 }
 0xbef   : > { %v1041_v58 = vpop.xlane.xlu1 %1040 }
 0xbf0   : > { %vm1042_vm14 = vcmp.eq.f32.partialorder %v1038_v12, %v1041_v58 }
 0xbf1   : > { %v1043_v59 = vsel %vm1042_vm14, %v3323_v50, 64 }
 0xbf2   : > { %v1044_v30 = vsel %vm873_vm12, %v1043_v59, 2147483647 }
 0xbf3   : > { %v1046_v16 = vshra.s32 %v1044_v30, 16  ;;  %v1045_v6 = vand.u32 65535, %v1044_v30 }
 0xbf5   : > { %v1048_v27 = vcvt.s32.f32 %v1046_v16  ;;  %v1047_v52 = vcvt.s32.f32 %v1045_v6 }
 0xbf7   : > { %1049 = vmin.xlane.f32.xlu2 %v1048_v27 }
 0xc6a   : > { %v1050_v43 = vpop.xlane.xlu2 %1049 }
 0xc6b   : > { %vm1051_vm10 = vcmp.eq.f32.partialorder %v1048_v27, %v1050_v43  ;;  %v1056_v55 = vcvt.f32.s32 %v1050_v43 }
 0xc6c   : > { %v1052_v51 = vsel %vm1051_vm10, %v1047_v52, inf }
 0xc6d   : > { %1053 = vmin.xlane.f32.xlu0 %v1052_v51  ;;  %v1057_v54 = vshll.u32 %v1056_v55, 16 }
 0xce0   : > { %v1054_v46 = vpop.xlane.xlu0 %1053 }
 0xce1   : > { %v1055_v44 = vcvt.f32.s32 %v1054_v46 }
 0xce3   : > { %v1058_v0 = vadd.s32 %v1057_v54, %v1055_v44 }
 0xce5   : > { %vm1059_vm13 = vcmp.eq.s32.totalorder %v3323_v50, %v1058_v0 }
 0xce6   : > { %v1061_v10 = vsel %vm1059_vm13, -inf, %v1038_v12  ;;  %v1060_v31 = vsel %vm1059_vm13, 1.0, %v1037_v13 }
 0xce7   : > { %v1062_v47 = vsel %vm873_vm12, %v1061_v10, -inf }
 0xce8   : > { %1063 = vmax.xlane.f32.xlu1 %v1062_v47 }
 0xd5b   : > { %v1064_v48 = vpop.xlane.xlu1 %1063 }
 0xd5c   : > { %vm1065_vm15 = vcmp.eq.f32.partialorder %v1061_v10, %v1064_v48 }
 0xd5d   : > { %v1066_v1 = vsel %vm1065_vm15, %v3323_v50, 64 }
 0xd5e   : > { %v1067_v36 = vsel %vm873_vm12, %v1066_v1, 2147483647 }
 0xd5f   : > { %v1069_v37 = vshra.s32 %v1067_v36, 16  ;;  %v1068_v61 = vand.u32 65535, %v1067_v36 }
 0xd61   : > { %v1071_v4 = vcvt.s32.f32 %v1069_v37  ;;  %v1070_v62 = vcvt.s32.f32 %v1068_v61 }
 0xd63   : > { %1072 = vmin.xlane.f32.xlu2 %v1071_v4 }
 0xdd6   : > { %v1073_v19 = vpop.xlane.xlu2 %1072 }
 0xdd7   : > { %vm1074_vm14 = vcmp.eq.f32.partialorder %v1071_v4, %v1073_v19  ;;  %v1079_v12 = vcvt.f32.s32 %v1073_v19 }
 0xdd8   : > { %v1075_v58 = vsel %vm1074_vm14, %v1070_v62, inf }
 0xdd9   : > { %1076 = vmin.xlane.f32.xlu0 %v1075_v58  ;;  %v1080_v59 = vshll.u32 %v1079_v12, 16 }
 0xe4c   : > { %v1077_v13 = vpop.xlane.xlu0 %1076 }
 0xe4d   : > { %v1078_v30 = vcvt.f32.s32 %v1077_v13 }
 0xe4f   : > { %v1081_v16 = vadd.s32 %v1080_v59, %v1078_v30 }
 0xe51   : > { %vm1082_vm10 = vcmp.eq.s32.totalorder %v3323_v50, %v1081_v16 }
 0xe52   : > { %v1084_v27 = vsel %vm1082_vm10, -inf, %v1061_v10  ;;  %v1083_v6 = vsel %vm1082_vm10, 1.0, %v1060_v31 }
 0xe53   : > { %v1085_v43 = vsel %vm873_vm12, %v1084_v27, -inf }
 0xe54   : > { %1086 = vmax.xlane.f32.xlu1 %v1085_v43 }
 0xec7   : > { %v1087_v52 = vpop.xlane.xlu1 %1086 }
 0xec8   : > { %vm1088_vm13 = vcmp.eq.f32.partialorder %v1084_v27, %v1087_v52 }
 0xec9   : > { %v1089_v51 = vsel %vm1088_vm13, %v3323_v50, 64 }
 0xeca   : > { %v1090_v55 = vsel %vm873_vm12, %v1089_v51, 2147483647 }
 0xecb   : > { %v1092_v46 = vshra.s32 %v1090_v55, 16  ;;  %v1091_v44 = vand.u32 65535, %v1090_v55 }
 0xecd   : > { %v1094_v54 = vcvt.s32.f32 %v1092_v46  ;;  %v1093_v47 = vcvt.s32.f32 %v1091_v44 }
 0xecf   : > { %1095 = vmin.xlane.f32.xlu2 %v1094_v54 }
 0xf42   : > { %v1096_v0 = vpop.xlane.xlu2 %1095 }
 0xf43   : > { %vm1097_vm15 = vcmp.eq.f32.partialorder %v1094_v54, %v1096_v0  ;;  %v1102_v10 = vcvt.f32.s32 %v1096_v0 }
 0xf44   : > { %v1098_v48 = vsel %vm1097_vm15, %v1093_v47, inf }
 0xf45   : > { %1099 = vmin.xlane.f32.xlu0 %v1098_v48  ;;  %v1103_v1 = vshll.u32 %v1102_v10, 16 }
 0xfb8   : > { %v1100_v31 = vpop.xlane.xlu0 %1099 }
 0xfb9   : > { %v1101_v36 = vcvt.f32.s32 %v1100_v31 }
 0xfbb   : > { %v1104_v37 = vadd.s32 %v1103_v1, %v1101_v36 }
 0xfbd   : > { %vm1105_vm14 = vcmp.eq.s32.totalorder %v3323_v50, %v1104_v37 }
 0xfbe   : > { %v1107_v4 = vsel %vm1105_vm14, -inf, %v1084_v27  ;;  %v1106_v61 = vsel %vm1105_vm14, 1.0, %v1083_v6 }
 0xfbf   : > { %v1108_v19 = vsel %vm873_vm12, %v1107_v4, -inf }
 0xfc0   : > { %1109 = vmax.xlane.f32.xlu1 %v1108_v19 }
0x1033   : > { %v1110_v62 = vpop.xlane.xlu1 %1109 }
0x1034   : > { %vm1111_vm10 = vcmp.eq.f32.partialorder %v1107_v4, %v1110_v62 }
0x1035   : > { %v1112_v58 = vsel %vm1111_vm10, %v3323_v50, 64 }
0x1036   : > { %v1113_v12 = vsel %vm873_vm12, %v1112_v58, 2147483647 }
0x1037   : > { %v1115_v13 = vshra.s32 %v1113_v12, 16  ;;  %v1114_v30 = vand.u32 65535, %v1113_v12 }
0x1039   : > { %v1117_v59 = vcvt.s32.f32 %v1115_v13  ;;  %v1116_v43 = vcvt.s32.f32 %v1114_v30 }
0x103b   : > { %1118 = vmin.xlane.f32.xlu2 %v1117_v59 }
0x10ae   : > { %v1119_v16 = vpop.xlane.xlu2 %1118 }
0x10af   : > { %vm1120_vm13 = vcmp.eq.f32.partialorder %v1117_v59, %v1119_v16  ;;  %v1125_v27 = vcvt.f32.s32 %v1119_v16 }
0x10b0   : > { %v1121_v52 = vsel %vm1120_vm13, %v1116_v43, inf  ;;  %v3557_v43 = vmax.f32 %v3441_v63, 1e-12 }
0x10b1   : > { %1122 = vmin.xlane.f32.xlu0 %v1121_v52  ;;  %v1126_v51 = vshll.u32 %v1125_v27, 16 }
0x10b9   : > { %638 = vadd.xlane.f32.xlu0 %v3384_v14 }
0x10c1   : > { %642 = vadd.xlane.f32.xlu0 %v3387_v29 }
0x10c9   : > { %646 = vadd.xlane.f32.xlu0 %v3410_v25 }
0x10d1   : > { %652 = vadd.xlane.f32.xlu0 %v3438_v39 }
0x1124   : > { %v1123_v6 = vpop.xlane.xlu0 %1122 }
0x1125   : > { %v1124_v55 = vcvt.f32.s32 %v1123_v6 }
0x1127   : > { %v1127_v46 = vadd.s32 %v1126_v51, %v1124_v55 }
0x1129   : > { %vm1128_vm15 = vcmp.eq.s32.totalorder %v3323_v50, %v1127_v46 }
0x112a   : > { %v1130_v54 = vsel %vm1128_vm15, -inf, %v1107_v4  ;;  %v3505_v44 = vsel %vm1128_vm15, 1.0, %v1106_v61 }
0x112b   : > { %v1131_v0 = vsel %vm873_vm12, %v1130_v54, -inf }
0x112c   : > { %1132 = vmax.xlane.f32.xlu1 %v1131_v0  ;;  %v3525_v37 = vpop.xlane.xlu0 %638 }
0x112d   : > { %v1289_v62 = vmax.f32 %v3525_v37, 1e-12 }
0x112f   : > { %2890 = vrsqrt.f32 %v1289_v62 }
0x1134   : > { %640 = vadd.xlane.f32.xlu1 %v3369_v38  ;;  %v2969_v38 = vmov 0.6   ;;  %v3529_v61 = vpop.xlane.xlu0 %642 }
0x1135   : > { %v3549_v59 = vpop.eup %2890 }
0x1136   : > { %v1298_v6 = vmul.f32 %v3549_v59, %v1289_v62  ;;  %vm1304_vm15 = vweird.f32 %v3549_v59 }
0x1138   : > { %v1299_v0 = vmul.f32 %v3549_v59, %v1298_v6 }
0x113c   : > { %644 = vadd.xlane.f32.xlu1 %v3400_v18  ;;  %v870_v18 = vsel %vm4395_vm11, 0.7, %v2969_v38 }
0x113d   : > { %vm871_vm13 = vcmp.gt.f32.partialorder %v3447_v26, %v870_v18  ;;  %v1291_v26 = vmax.f32 %v3529_v61, 1e-12 }
0x113e   : > { %v3520_v1 = vsel %vm871_vm13, 1.0, %v2968_v41  ;;  %v3535_v41 = vpop.xlane.xlu0 %646 }
0x113f   : > { %v874_v36 = vsel %vm873_vm12, %v3520_v1, 0.0  ;;  %4449 = vst [vmem:[#allocation38_spill] sm:$0xff] %v3535_v41  ;;  %2892 = vrsqrt.f32 %v1291_v26  ;;  %v3543_v12 = vmax.f32 %v3535_v41, 1e-12  ;;  %vm1323_vm11 = vweird.f32 %v1291_v26 }
0x1144   : > { %648 = vadd.xlane.f32.xlu1 %v3421_v28 }
0x1145   : > { %v3554_v16 = vpop.eup %2892 }
0x1146   : > { %v3560_v52 = vpop.xlane.xlu0 %652  ;;  %v1318_v51 = vmul.f32 %v3554_v16, %v1291_v26 }
0x1147   : > { %4451 = vst [vmem:[#allocation40_spill] sm:$0xff] %v3560_v52  ;;  %v3570_v55 = vmax.f32 %v3560_v52, 1e-12 }
0x119f   : > { %v1133_v14 = vpop.xlane.xlu1 %1132 }
0x11a0   : > { %vm1134_vm14 = vcmp.eq.f32.partialorder %v1130_v54, %v1133_v14  ;;  %v1319_v14 = vmul.f32 %v3554_v16, %v1318_v51 }
0x11a1   : > { %v1135_v29 = vsel %vm1134_vm14, %v3323_v50, 64  ;;  %vm1324_vm14 = vweird.f32 %v3554_v16 }
0x11a2   : > { %v1136_v25 = vsel %vm873_vm12, %v1135_v29, 2147483647  ;;  %v1320_v38 = vmul.f32 0.5, %v1319_v14  ;;  %vm3611_vm9 = vmor %vm1323_vm11, %vm1324_vm14 }
0x11a3   : > { %v1138_v39 = vshra.s32 %v1136_v25, 16  ;;  %v1137_v48 = vand.u32 65535, %v1136_v25 }
0x11a4   : > { %v1321_v9 = vsub.f32 1.5, %v1320_v38 }
0x11a5   : > { %v1140_v47 = vcvt.s32.f32 %v1138_v39  ;;  %v1139_v31 = vcvt.s32.f32 %v1137_v48 }
0x11a7   : > { %1141 = vmin.xlane.f32.xlu2 %v1140_v47  ;;  %v3527_v4 = vpop.xlane.xlu1 %640 }
0x11a8   : > { %v3538_v58 = vmax.f32 %v3527_v4, 1e-12 }
0x11aa   : > { %2894 = vrsqrt.f32 %v3538_v58  ;;  %vm1313_vm11 = vweird.f32 %v3538_v58 }
0x11ab   : > { %2896 = vrsqrt.f32 %v3543_v12 }
0x11af   : > { %v3531_v19 = vpop.xlane.xlu1 %644 }
0x11b0   : > { %4448 = vst [vmem:[#allocation37_spill] sm:$0xff] %v3531_v19  ;;  %v3547_v13 = vmax.f32 %v3531_v19, 1e-12  ;;  %v3563_v27 = vpop.eup %2894 }
0x11b1   : > { %v1308_v46 = vmul.f32 %v3563_v27, %v3538_v58  ;;  %v3574_v54 = vpop.eup %2896  ;;  %vm1314_vm8 = vweird.f32 %v3563_v27 }
0x11b2   : > { %2898 = vrsqrt.f32 %v3547_v13  ;;  %vm3626_vm14 = vmor %vm1313_vm11, %vm1314_vm8 }
0x11b3   : > { %v1309_v48 = vmul.f32 %v3563_v27, %v1308_v46 }
0x11b5   : > { %v1310_v51 = vmul.f32 0.5, %v1309_v48  ;;  %v1322_v48 = vmul.f32 %v3554_v16, %v1321_v9 }
0x11b7   : > { %v1311_v57 = vsub.f32 1.5, %v1310_v51 }
0x11b8   : > { %v3578_v29 = vpop.eup %2898 }
0x11b9   : > { %v1328_v18 = vmul.f32 %v3578_v29, %v3547_v13  ;;  %v1312_v51 = vmul.f32 %v3563_v27, %v1311_v57 }
0x11bb   : > { %v1329_v46 = vmul.f32 %v3578_v29, %v1328_v18 }
0x121a   : > { %v3513_v10 = vpop.xlane.xlu2 %1141 }
0x121b   : > { %vm1143_vm10 = vcmp.eq.f32.partialorder %v1140_v47, %v3513_v10  ;;  %v1338_v47 = vmul.f32 %v3574_v54, %v3543_v12  ;;  %v1148_v18 = vcvt.f32.s32 %v3513_v10  ;;  %v1326_v10 = vsel %vm3611_vm9, %v3554_v16, %v1322_v48 }
0x121c   : > { %v1144_v28 = vsel %vm1143_vm10, %v1139_v31, inf  ;;  %v1300_v31 = vmul.f32 0.5, %v1299_v0  ;;  %vm1303_vm10 = vweird.f32 %v1289_v62  ;;  %vm1334_vm9 = vweird.f32 %v3578_v29 }
0x121d   : > { %1145 = vmin.xlane.f32.xlu2 %v1144_v28  ;;  %v1339_v6 = vmul.f32 %v3574_v54, %v1338_v47  ;;  %vm3607_vm13 = vmor %vm1303_vm10, %vm1304_vm15  ;;  %vm1344_vm15 = vweird.f32 %v3574_v54  ;;  %vm1343_vm10 = vweird.f32 %v3543_v12 }
0x121e   : > { %v1301_v60 = vsub.f32 1.5, %v1300_v31  ;;  %v1330_v31 = vmul.f32 0.5, %v1329_v46  ;;  %vm3640_vm11 = vmor %vm1343_vm10, %vm1344_vm15  ;;  %vm1373_vm10 = vweird.f32 %v3570_v55 }
0x121f   : > { %v1340_v53 = vmul.f32 0.5, %v1339_v6 }
0x1220   : > { %v1302_v47 = vmul.f32 %v3549_v59, %v1301_v60  ;;  %v1331_v62 = vsub.f32 1.5, %v1330_v31 }
0x1221   : > { %v1341_v60 = vsub.f32 1.5, %v1340_v53  ;;  %v1149_v53 = vshll.u32 %v1148_v18, 16 }
0x1222   : > { %v1306_v26 = vsel %vm3607_vm13, %v3549_v59, %v1302_v47  ;;  %v1316_v59 = vsel %vm3626_vm14, %v3563_v27, %v1312_v51  ;;  %v1332_v58 = vmul.f32 %v3578_v29, %v1331_v62  ;;  %v1390_v47 = vmul.f32 2.0, %v1326_v10 }
0x1223   : > { %v1342_v31 = vmul.f32 %v3574_v54, %v1341_v60  ;;  %v1388_v48 = vmul.f32 2.0, %v1306_v26  ;;  %vm1384_vm13 = vweird.f32 %v3557_v43  ;;  %vm1333_vm14 = vweird.f32 %v3547_v13 }
0x1224   : > { %v1389_v27 = vmul.f32 2.0, %v1316_v59  ;;  %vm3647_vm5 = vmor %vm1333_vm14, %vm1334_vm9  ;;  %v1398_v51 = vmul.f32 %v1390_v47, %v3337_v35 }
0x1225   : > { %875 = vadd.xlane.f32.xlu2 %v874_v36  ;;  %v1396_v62 = vmul.f32 %v1388_v48, %v3330_v15 }
0x1226   : > { %v1397_v35 = vmul.f32 %v1389_v27, %v3328_v56 }
0x122d   : > { %650 = vadd.xlane.f32.xlu2 %v3425_v40  ;;  %v3540_v40 = vpop.xlane.xlu1 %648 }
0x122e   : > { %4450 = vst [vmem:[#allocation39_spill] sm:$0xff] %v3540_v40  ;;  %v3552_v30 = vmax.f32 %v3540_v40, 1e-12 }
0x1230   : > { %2900 = vrsqrt.f32 %v3552_v30  ;;  %vm1353_vm3 = vweird.f32 %v3552_v30 }
0x1231   : > { %2902 = vrsqrt.f32 %v3557_v43 }
0x1232   : > { %2904 = vrsqrt.f32 %v3570_v55 }
0x1236   : > { %v3580_v25 = vpop.eup %2900 }
0x1237   : > { %v3583_v39 = vpop.eup %2902  ;;  %v1348_v28 = vmul.f32 %v3580_v25, %v3552_v30  ;;  %vm1354_vm8 = vweird.f32 %v3580_v25 }
0x1238   : > { %v1379_v36 = vmul.f32 %v3583_v39, %v3557_v43  ;;  %v3595_v5 = vpop.eup %2904  ;;  %vm1385_vm7 = vweird.f32 %v3583_v39  ;;  %vm3656_vm15 = vmor %vm1353_vm3, %vm1354_vm8  ;;  %v4475_v43 = vld [vmem:[#allocation8_spill] sm:$0xff] }
0x1239   : > { %v1349_v0 = vmul.f32 %v3580_v25, %v1348_v28  ;;  %v1368_v32 = vmul.f32 %v3595_v5, %v3570_v55  ;;  %vm1374_vm3 = vweird.f32 %v3595_v5 }
0x123a   : > { %v1380_v14 = vmul.f32 %v3583_v39, %v1379_v36  ;;  %v1346_v36 = vsel %vm3640_vm11, %v3574_v54, %v1342_v31  ;;  %vm3694_vm8 = vmor %vm1373_vm10, %vm1374_vm3  ;;  %vm1787_vm10 = vcmask 1043456  }
0x123b   : > { %v1350_v38 = vmul.f32 0.5, %v1349_v0  ;;  %v1369_v9 = vmul.f32 %v3595_v5, %v1368_v32  ;;  %v1392_v26 = vmul.f32 2.0, %v1346_v36 }
0x123c   : > { %v1381_v28 = vmul.f32 0.5, %v1380_v14 }
0x123d   : > { %v1351_v0 = vsub.f32 1.5, %v1350_v38  ;;  %v1370_v6 = vmul.f32 0.5, %v1369_v9  ;;  %v1400_v57 = vmul.f32 %v1392_v26, %v3366_v24 }
0x123e   : > { %v1382_v32 = vsub.f32 1.5, %v1381_v28 }
0x123f   : > { %v1352_v38 = vmul.f32 %v3580_v25, %v1351_v0  ;;  %v1371_v28 = vsub.f32 1.5, %v1370_v6 }
0x1240   : > { %v1383_v60 = vmul.f32 %v3583_v39, %v1382_v32 }
0x1241   : > { %v1356_v54 = vsel %vm3656_vm15, %v3580_v25, %v1352_v38  ;;  %v1372_v15 = vmul.f32 %v3595_v5, %v1371_v28  ;;  %v2970_v25 = vmov 0  }
0x1242   : > { %v1393_v0 = vmul.f32 2.0, %v1356_v54  ;;  %v4471_v54 = vld [vmem:[#allocation4_spill] sm:$0xff] }
0x1243   : > { %v1376_v6 = vsel %vm3694_vm8, %v3595_v5, %v1372_v15 }
0x1244   : > { %v1401_v24 = vmul.f32 %v1393_v0, %v3381_v2  ;;  %v1395_v27 = vmul.f32 2.0, %v1376_v6  ;;  %v4479_v6 = vld [vmem:[#allocation12_spill] sm:$0xff] }
0x1246   : > { %v1403_v13 = vmul.f32 %v1395_v27, %v3430_v33  ;;  %v4472_v33 = vld [vmem:[#allocation7_spill] sm:$0xff] }
0x1290   : > { %v1146_v46 = vpop.xlane.xlu2 %1145 }
0x1291   : > { %v1147_v14 = vcvt.f32.s32 %v1146_v46  ;;  %v1336_v46 = vsel %vm3647_vm5, %v3578_v29, %v1332_v58 }
0x1293   : > { %v1150_v16 = vadd.s32 %v1149_v53, %v1147_v14 }
0x1295   : > { %vm1151_vm6 = vcmp.eq.s32.totalorder %v3323_v50, %v1150_v16 }
0x1296   : > { %v1152_v30 = vsel %vm1151_vm6, 1.0, %v3505_v44  ;;  %v1391_v44 = vmul.f32 2.0, %v1336_v46  ;;  %vm1386_vm6 = vmor %vm1384_vm13, %vm1385_vm7 }
0x1297   : > { %v3685_v56 = vsel %vm1386_vm6, %v3583_v39, %v1383_v60  ;;  %vm1785_vm6 = vcmask 1045508  }
0x1298   : > { %v876_v9 = vpop.xlane.xlu2 %875  ;;  %v1406_v55 = vmul.f32 %v1398_v51, %v3685_v56  ;;  %v1405_v39 = vmul.f32 %v1397_v35, %v3685_v56  ;;  %v1404_v14 = vmul.f32 %v1396_v62, %v3685_v56  ;;  %v1399_v31 = vmul.f32 %v1391_v44, %v3351_v45  ;;  %v4470_v51 = vld [vmem:[#allocation3_spill] sm:$0xff] }
0x1299   : > { %vm877_vm9 = vcmp.gt.f32.partialorder %v876_v9, 0.0  ;;  %v1409_v2 = vmul.f32 %v1401_v24, %v3685_v56  ;;  %v1408_v18 = vmul.f32 %v1400_v57, %v3685_v56  ;;  %v4469_v9 = vld [vmem:[#allocation2_spill] sm:$0xff]  ;;  %v1411_v44 = vmul.f32 %v1403_v13, %v3685_v56  ;;  %v4478_v57 = vld [vmem:[#allocation11_spill] sm:$0xff]  ;;  %v4480_v24 = vld [vmem:[#allocation13_spill] sm:$0xff] }
0x129a   : > { %v3671_v10 = vsel %vm877_vm9, %v3520_v1, %v1152_v30  ;;  %v1407_v28 = vmul.f32 %v1399_v31, %v3685_v56  ;;  %v4485_v13 = vld [vmem:[#allocation18_spill] sm:$0xff] }
0x129b   : > { %v3677_v29 = vpack.c.bf16 %v3671_v10, %v3671_v10  ;;  %vm1412_vm5 = vcmp.gt.f32.partialorder %v3671_v10, 0.0 }
0x129c   : > { %v1413_v1 = vsel %vm1412_vm5, 1, %v2970_v25  ;;  %v4473_v25 = vld [vmem:[#allocation5_spill] sm:$0xff] }
0x129d   : > { %v1414_v53 = vperm.slane %v1413_v1, 1  ;;  %2797 = vmatmul.msk.bf16.vlgmr.msra.gmra.mxu0 %vm616_vm4, %v3677_v29  ;;  %2798 = vmatmul.msk.bf16.vlgmr.msra.gmra.mxu1 %vm616_vm4, %v3677_v29  ;;  %v4474_v1 = vld [vmem:[#allocation6_spill] sm:$0xff] }
0x129e   : > { %2799 = vmatmul.msk.bf16.vlgmr.msra.gmra.mxu2 %vm616_vm4, %v3677_v29  ;;  %2800 = vmatmul.msk.bf16.vlgmr.msra.gmra.mxu3 %vm616_vm4, %v3677_v29 }
0x129f   : > { %vm3705_vm7 = vcmp.eq.s32.totalorder %v1414_v53, 1  ;;  %1590 = vmatpush.bf16.msra.mxu2 %v3012_v8  ;;  %1532 = vmatpush.bf16.msra.mxu0 %v3005_v3 }
0x12a0   : > { %v3716_v16 = vpop.xlane.xlu2 %650  ;;  %v3720_v59 = vsel %vm3705_vm7, %v1406_v55, -1e+30  ;;  %v3724_v58 = vsel %vm3705_vm7, %v1405_v39, -1e+30  ;;  %v3728_v45 = vsel %vm3705_vm7, %v1404_v14, -1e+30  ;;  %1561 = vmatpush.bf16.msra.mxu1 %v3010_v7  ;;  %1619 = vmatpush.bf16.msra.mxu3 %v3017_v11 }
0x12a1   : > { %4468 = vst [vmem:[#allocation41_spill] sm:$0xff] %v3716_v16  ;;  %v1295_v5 = vmax.f32 %v3716_v16, 1e-12  ;;  %v1430_v47 = vsel %vm616_vm4, %v3720_v59, -inf  ;;  %v1427_v48 = vsel %vm616_vm4, %v3724_v58, -inf  ;;  %v1424_v38 = vsel %vm616_vm4, %v3728_v45, -inf }
0x12a2   : > { %1431 = vmax.xlane.f32.xlu0 %v1430_v47  ;;  %1428 = vmax.xlane.f32.xlu2 %v1427_v48  ;;  %v3749_v12 = vsel %vm3705_vm7, %v1409_v2, -1e+30  ;;  %v3753_v36 = vsel %vm3705_vm7, %v1408_v18, -1e+30  ;;  %v3757_v60 = vsel %vm3705_vm7, %v1407_v28, -1e+30 }
0x12a3   : > { %2906 = vrsqrt.f32 %v1295_v5  ;;  %1425 = vmax.xlane.f32.xlu1 %v1424_v38  ;;  %1591 = vmatpush.bf16.msra.mxu2 %v3034_v22  ;;  %v1439_v46 = vsel %vm616_vm4, %v3749_v12, -inf  ;;  %v1436_v30 = vsel %vm616_vm4, %v3753_v36, -inf  ;;  %v1433_v26 = vsel %vm616_vm4, %v3757_v60, -inf  ;;  %v4476_v55 = vld [vmem:[#allocation9_spill] sm:$0xff]  ;;  %v4477_v14 = vld [vmem:[#allocation10_spill] sm:$0xff]  ;;  %v4482_v38 = vld [vmem:[#allocation15_spill] sm:$0xff] }
0x12a4   : > { %1533 = vmatpush.bf16.msra.mxu0 %v3030_v20  ;;  %1562 = vmatpush.bf16.msra.mxu1 %v3032_v21  ;;  %v3784_v53 = vsel %vm3705_vm7, %v1411_v44, -1e+30  ;;  %vm1363_vm11 = vweird.f32 %v1295_v5  ;;  %v4481_v48 = vld [vmem:[#allocation14_spill] sm:$0xff]  ;;  %v4483_v18 = vld [vmem:[#allocation16_spill] sm:$0xff]  ;;  %v4484_v28 = vld [vmem:[#allocation17_spill] sm:$0xff] }
0x12a5   : > { %1620 = vmatpush.bf16.msra.mxu3 %v3036_v23  ;;  %v1445_v31 = vsel %vm616_vm4, %v3784_v53, -inf  ;;  %v4491_v44 = vld [vmem:[#allocation24_spill] sm:$0xff] }
0x12a7   : > { %1592 = vmatpush.bf16.msra.mxu2 %v3054_v34 }
0x12a8   : > { %1534 = vmatpush.bf16.msra.mxu0 %v4469_v9  ;;  %1563 = vmatpush.bf16.msra.mxu1 %v4470_v51 }
0x12a9   : > { %v2907_v62 = vpop.eup %2906  ;;  %1621 = vmatpush.bf16.msra.mxu3 %v4471_v54 }
0x12aa   : > { %v1358_v35 = vmul.f32 %v2907_v62, %v1295_v5  ;;  %1440 = vmax.xlane.f32.xlu0 %v1439_v46  ;;  %1437 = vmax.xlane.f32.xlu2 %v1436_v30  ;;  %vm1364_vm13 = vweird.f32 %v2907_v62  ;;  %v4486_v46 = vld [vmem:[#allocation19_spill] sm:$0xff]  ;;  %v4487_v30 = vld [vmem:[#allocation20_spill] sm:$0xff] }
0x12ab   : > { %1434 = vmax.xlane.f32.xlu1 %v1433_v26  ;;  %1593 = vmatpush.bf16.msra.mxu2 %v4472_v33  ;;  %vm1365_vm14 = vmor %vm1363_vm11, %vm1364_vm13 }
0x12ac   : > { %v1359_v15 = vmul.f32 %v2907_v62, %v1358_v35  ;;  %1535 = vmatpush.bf16.msra.mxu0 %v4473_v25  ;;  %1564 = vmatpush.bf16.msra.mxu1 %v4474_v1  ;;  %v4488_v35 = vld [vmem:[#allocation21_spill] sm:$0xff] }
0x12ad   : > { %2801 = vmatmul.msk.bf16.vlgmr.msrb.gmra.mxu0 %vm616_vm4, %v3677_v29  ;;  %2802 = vmatmul.msk.bf16.vlgmr.msrb.gmra.mxu1 %vm616_vm4, %v3677_v29 }
0x12ae   : > { %v1360_v0 = vmul.f32 0.5, %v1359_v15  ;;  %2803 = vmatmul.msk.bf16.vlgmr.msrb.gmra.mxu2 %vm616_vm4, %v3677_v29  ;;  %2804 = vmatmul.msk.bf16.vlgmr.msrb.gmra.mxu3 %vm616_vm4, %v3677_v29  ;;  %v4490_v15 = vld [vmem:[#allocation23_spill] sm:$0xff] }
0x12af   : > { %1622 = vmatpush.bf16.msra.mxu3 %v4475_v43  ;;  %1706 = vmatpush.bf16.msrb.mxu2 %v4476_v55 }
0x12b0   : > { %v1361_v39 = vsub.f32 1.5, %v1360_v0  ;;  %1648 = vmatpush.bf16.msrb.mxu0 %v4477_v14  ;;  %1677 = vmatpush.bf16.msrb.mxu1 %v4479_v6 }
0x12b2   : > { %v1362_v29 = vmul.f32 %v2907_v62, %v1361_v39  ;;  %1446 = vmax.xlane.f32.xlu2 %v1445_v31 }
0x12b3   : > { %1735 = vmatpush.bf16.msrb.mxu3 %v4478_v57  ;;  %1707 = vmatpush.bf16.msrb.mxu2 %v4480_v24 }
0x12b4   : > { %v1366_v47 = vsel %vm1365_vm14, %v2907_v62, %v1362_v29  ;;  %1649 = vmatpush.bf16.msrb.mxu0 %v4481_v48  ;;  %1678 = vmatpush.bf16.msrb.mxu1 %v4483_v18 }
0x12b5   : > { %v1394_v2 = vmul.f32 2.0, %v1366_v47 }
0x12b7   : > { %1736 = vmatpush.bf16.msrb.mxu3 %v4482_v38  ;;  %v1402_v27 = vmul.f32 %v1394_v2, %v3397_v49  ;;  %1708 = vmatpush.bf16.msrb.mxu2 %v4484_v28  ;;  %v4489_v49 = vld [vmem:[#allocation22_spill] sm:$0xff] }
0x12b8   : > { %1650 = vmatpush.bf16.msrb.mxu0 %v4485_v13  ;;  %1679 = vmatpush.bf16.msrb.mxu1 %v4487_v30 }
0x12b9   : > { %v1410_v5 = vmul.f32 %v1402_v27, %v3685_v56 }
0x12bb   : > { %1737 = vmatpush.bf16.msrb.mxu3 %v4486_v46  ;;  %v3805_v62 = vsel %vm3705_vm7, %v1410_v5, -1e+30  ;;  %1709 = vmatpush.bf16.msrb.mxu2 %v4488_v35 }
0x12bc   : > { %v1442_v26 = vsel %vm616_vm4, %v3805_v62, -inf  ;;  %1651 = vmatpush.bf16.msrb.mxu0 %v4489_v49  ;;  %1680 = vmatpush.bf16.msrb.mxu1 %v4491_v44 }
0x12bd   : > { %1443 = vmax.xlane.f32.xlu1 %v1442_v26 }
0x12bf   : > { %1738 = vmatpush.bf16.msrb.mxu3 %v4490_v15 }
0x1315   : > { %v1432_v0 = vpop.xlane.xlu0 %1431  ;;  %v1429_v56 = vpop.xlane.xlu2 %1428 }
0x1316   : > { %v1450_v39 = vsub.f32 %v3720_v59, %v1432_v0  ;;  %v1426_v31 = vpop.xlane.xlu1 %1425  ;;  %v1449_v32 = vsub.f32 %v3724_v58, %v1429_v56 }
0x1317   : > { %v1448_v29 = vsub.f32 %v3728_v45, %v1426_v31 }
0x1318   : > { %v1460_v47 = vmul.f32 1.442695, %v1450_v39  ;;  %v1458_v2 = vmul.f32 1.442695, %v1449_v32 }
0x1319   : > { %v1456_v27 = vmul.f32 1.442695, %v1448_v29 }
0x131a   : > { %2908 = vpow2.f32 %v1460_v47  ;;  %v3816_v5 = vpop.f32.mrf.mxu0  ;;  %v3818_v42 = vpop.f32.mrf.mxu1 }
0x131b   : > { %2910 = vpow2.f32 %v1456_v27 }
0x131c   : > { %2912 = vpow2.f32 %v1458_v2 }
0x131d   : > { %v1441_v26 = vpop.xlane.xlu0 %1440  ;;  %v1438_v50 = vpop.xlane.xlu2 %1437 }
0x131e   : > { %v1453_v17 = vsub.f32 %v3749_v12, %v1441_v26  ;;  %v1435_v59 = vpop.xlane.xlu1 %1434  ;;  %v1452_v0 = vsub.f32 %v3753_v36, %v1438_v50 }
0x131f   : > { %v1451_v58 = vsub.f32 %v3757_v60, %v1435_v59 }
0x1320   : > { %v3823_v45 = vpop.eup %2908  ;;  %v1466_v56 = vmul.f32 1.442695, %v1453_v17  ;;  %v1464_v39 = vmul.f32 1.442695, %v1452_v0 }
0x1321   : > { %v2911_v31 = vpop.eup %2910  ;;  %v1462_v32 = vmul.f32 1.442695, %v1451_v58  ;;  %v3825_v29 = vpop.f32.mrf.mxu2  ;;  %v1478_v2 = vsel %vm616_vm4, %v3823_v45, 0.0 }
0x1322   : > { %v3827_v47 = vpop.f32.mrf.mxu3  ;;  %v2913_v27 = vpop.eup %2912  ;;  %2914 = vpow2.f32 %v1466_v56  ;;  %1479 = vadd.xlane.f32.xlu2 %v1478_v2  ;;  %v1472_v50 = vsel %vm616_vm4, %v2911_v31, 0.0 }
0x1323   : > { %v1174_v12 = vpop.f32.mrf.mxu0  ;;  %v1187_v36 = vpop.f32.mrf.mxu1  ;;  %2916 = vpow2.f32 %v1462_v32  ;;  %1473 = vadd.xlane.f32.xlu0 %v1472_v50  ;;  %v1475_v17 = vsel %vm616_vm4, %v2913_v27, 0.0 }
0x1324   : > { %2918 = vpow2.f32 %v1464_v39  ;;  %1476 = vadd.xlane.f32.xlu1 %v1475_v17 }
0x1325   : > { %v1447_v60 = vpop.xlane.xlu2 %1446 }
0x1326   : > { %v1455_v26 = vsub.f32 %v3784_v53, %v1447_v60 }
0x1328   : > { %v3834_v59 = vpop.eup %2914  ;;  %v1470_v0 = vmul.f32 1.442695, %v1455_v26 }
0x1329   : > { %v2917_v58 = vpop.eup %2916  ;;  %v1200_v63 = vpop.f32.mrf.mxu2  ;;  %v1487_v2 = vsel %vm616_vm4, %v3834_v59, 0.0 }
0x132a   : > { %v1213_v56 = vpop.f32.mrf.mxu3  ;;  %v3838_v12 = vpop.eup %2918  ;;  %2920 = vpow2.f32 %v1470_v0  ;;  %1488 = vadd.xlane.f32.xlu2 %v1487_v2  ;;  %v1481_v32 = vsel %vm616_vm4, %v2917_v58, 0.0  ;;  %v1156_v0 = vsel %vm873_vm12, %v3671_v10, 0.0 }
0x132b   : > { %v3841_v39 = vpop.f32.mrf.mxu0  ;;  %v3843_v50 = vpop.f32.mrf.mxu1  ;;  %1482 = vadd.xlane.f32.xlu0 %v1481_v32  ;;  %v1484_v53 = vsel %vm616_vm4, %v3838_v12, 0.0 }
0x132c   : > { %1485 = vadd.xlane.f32.xlu1 %v1484_v53 }
0x1330   : > { %v3847_v63 = vpop.eup %2920  ;;  %v1444_v36 = vpop.xlane.xlu1 %1443 }
0x1331   : > { %v3849_v17 = vpop.f32.mrf.mxu2  ;;  %v1454_v26 = vsub.f32 %v3805_v62, %v1444_v36  ;;  %v1493_v56 = vsel %vm616_vm4, %v3847_v63, 0.0 }
0x1332   : > { %v3851_v60 = vpop.f32.mrf.mxu3  ;;  %1157 = vadd.xlane.f32.xlu2 %v1156_v0 }
0x1333   : > { %v1226_v2 = vpop.f32.mrf.mxu0  ;;  %v1239_v32 = vpop.f32.mrf.mxu1  ;;  %v1468_v52 = vmul.f32 1.442695, %v1454_v26 }
0x1334   : > { %1494 = vadd.xlane.f32.xlu1 %v1493_v56 }
0x1335   : > { %2922 = vpow2.f32 %v1468_v52 }
0x1339   : > { %v1252_v53 = vpop.f32.mrf.mxu2 }
0x133a   : > { %v1265_v16 = vpop.f32.mrf.mxu3 }
0x133b   : > { %v3858_v40 = vpop.eup %2922 }
0x133c   : > { %v1490_v41 = vsel %vm616_vm4, %v3858_v40, 0.0 }
0x133d   : > { %1491 = vadd.xlane.f32.xlu0 %v1490_v41 }
0x1395   : > { %v1480_v62 = vpop.xlane.xlu2 %1479 }
0x1396   : > { %v1474_v36 = vpop.xlane.xlu0 %1473 }
0x1397   : > { %2924 = vrcp.f32 %v1474_v36  ;;  %v1477_v10 = vpop.xlane.xlu1 %1476 }
0x1398   : > { %2926 = vrcp.f32 %v1477_v10 }
0x139d   : > { %v2925_v19 = vpop.eup %2924  ;;  %v1489_v2 = vpop.xlane.xlu2 %1488 }
0x139e   : > { %v2927_v32 = vpop.eup %2926  ;;  %v1504_v0 = vmul.f32 %v2925_v19, %v2911_v31  ;;  %v1483_v52 = vpop.xlane.xlu0 %1482 }
0x139f   : > { %v1505_v26 = vmul.f32 %v2927_v32, %v2913_v27  ;;  %2928 = vrcp.f32 %v1483_v52 }
0x13a0   : > { %2930 = vrcp.f32 %v1480_v62  ;;  %v1486_v62 = vpop.xlane.xlu1 %1485 }
0x13a1   : > { %v3862_v56 = vpack.c.bf16 %v1505_v26, %v1504_v0 }
0x13a3   : > { %2805 = vmatmul.msk.bf16.vlgmr.msra.gmra.mxu0 %vm616_vm4, %v3862_v56  ;;  %2809 = vmatmul.msk.bf16.vlgmr.msra.gmra.mxu1 %vm616_vm4, %v3862_v56 }
0x13a4   : > { %2813 = vmatmul.msk.bf16.vlgmr.msra.gmra.mxu2 %vm616_vm4, %v3862_v56  ;;  %2817 = vmatmul.msk.bf16.vlgmr.msra.gmra.mxu3 %vm616_vm4, %v3862_v56 }
0x13a5   : > { %v1158_v41 = vpop.xlane.xlu2 %1157  ;;  %1970 = vmatpush.bf16.xpose.msra.mxu0 %v3005_v3  ;;  %1983 = vmatpush.bf16.xpose.msra.mxu1 %v3010_v7  ;;  %v2929_v19 = vpop.eup %2928 }
0x13a6   : > { %2932 = vrcp.f32 %v1158_v41  ;;  %1996 = vmatpush.bf16.xpose.msra.mxu2 %v3012_v8  ;;  %2009 = vmatpush.bf16.xpose.msra.mxu3 %v3017_v11  ;;  %v2931_v16 = vpop.eup %2930  ;;  %v1507_v27 = vmul.f32 %v2929_v19, %v2917_v58  ;;  %v1278_v8 = vand.u32 2147483648, %v1158_v41  ;;  %v1276_v10 = vand.u32 2147483647, %v1158_v41 }
0x13a7   : > { %v1506_v3 = vmul.f32 %v2931_v16, %v3823_v45  ;;  %2934 = vrcp.f32 %v1489_v2  ;;  %vm1272_vm9 = vweird.f32 %v1158_v41 }
0x13a8   : > { %2936 = vrcp.f32 %v1486_v62  ;;  %vm1277_vm5 = vcmp.eq.f32.partialorder %v1276_v10, 8.507059e+37 }
0x13a9   : > { %v3881_v36 = vpack.c.bf16 %v1507_v27, %v1506_v3 }
0x13ac   : > { %v2933_v31 = vpop.eup %2932 }
0x13ad   : > { %v1268_v53 = vmul.f32 %v2933_v31, %v1158_v41  ;;  %1971 = vmatpush.bf16.xpose.msra.mxu0 %v3030_v20  ;;  %1984 = vmatpush.bf16.xpose.msra.mxu1 %v3032_v21  ;;  %vm1273_vm15 = vweird.f32 %v2933_v31  ;;  %v1279_v20 = vor.u32 1.1754944e-38, %v1278_v8  ;;  %v2935_v32 = vpop.eup %2934 }
0x13ae   : > { %1997 = vmatpush.bf16.xpose.msra.mxu2 %v3034_v22  ;;  %2010 = vmatpush.bf16.xpose.msra.mxu3 %v3036_v23  ;;  %vm1274_vm3 = vmor %vm1272_vm9, %vm1273_vm15  ;;  %v1509_v41 = vmul.f32 %v2935_v32, %v3834_v59 }
0x13af   : > { %v1269_v7 = vsub.f32 1.0, %v1268_v53 }
0x13b0   : > { %v1492_v8 = vpop.xlane.xlu0 %1491 }
0x13b1   : > { %v1270_v11 = vmul.f32 %v2933_v31, %v1269_v7  ;;  %2938 = vrcp.f32 %v1492_v8 }
0x13b3   : > { %v1271_v58 = vadd.f32 %v2933_v31, %v1270_v11  ;;  %2806 = vmatmul.msk.bf16.gmra.mxu0 %vm616_vm4, %v3881_v36  ;;  %2810 = vmatmul.msk.bf16.gmra.mxu1 %vm616_vm4, %v3881_v36 }
0x13b4   : > { %2814 = vmatmul.msk.bf16.gmra.mxu2 %vm616_vm4, %v3881_v36  ;;  %2818 = vmatmul.msk.bf16.gmra.mxu3 %vm616_vm4, %v3881_v36 }
0x13b5   : > { %v1275_v21 = vsel %vm1274_vm3, %v2933_v31, %v1271_v58  ;;  %1972 = vmatpush.bf16.xpose.msra.mxu0 %v4469_v9  ;;  %1985 = vmatpush.bf16.xpose.msra.mxu1 %v4470_v51  ;;  %v1495_v58 = vpop.xlane.xlu1 %1494 }
0x13b6   : > { %v1280_v22 = vsel %vm1277_vm5, %v1279_v20, %v1275_v21  ;;  %1998 = vmatpush.bf16.xpose.msra.mxu2 %v3054_v34  ;;  %2011 = vmatpush.bf16.xpose.msra.mxu3 %v4471_v54  ;;  %2940 = vrcp.f32 %v1495_v58 }
0x13b7   : > { %v3896_v23 = vmul.f32 %v1280_v22, %v3818_v42  ;;  %v3899_v45 = vmul.f32 %v1280_v22, %v3825_v29  ;;  %v3902_v2 = vmul.f32 %v1280_v22, %v3827_v47  ;;  %v3905_v0 = vmul.f32 %v1280_v22, %v3816_v5  ;;  %v2937_v42 = vpop.eup %2936 }
0x13b8   : > { %v3908_v9 = vmul.f32 %v1280_v22, %v3843_v50  ;;  %v3911_v34 = vmul.f32 %v1280_v22, %v3849_v17  ;;  %v3914_v51 = vmul.f32 %v1280_v22, %v3851_v60  ;;  %v3923_v52 = vmul.f32 %v1280_v22, %v3841_v39  ;;  %v4492_v39 = vld [vmem:[#allocation25_spill] sm:$0xff] }
0x13b9   : > { %v1763_v54 = vmul.f32 0.5, %v3896_v23  ;;  %v1764_v29 = vmul.f32 0.5, %v3899_v45  ;;  %v1765_v47 = vmul.f32 0.5, %v3902_v2  ;;  %v1508_v60 = vmul.f32 %v2937_v42, %v3838_v12  ;;  %v2939_v42 = vpop.eup %2938 }
0x13ba   : > { %v1767_v26 = vmul.f32 0.5, %v3908_v9  ;;  %v1768_v5 = vmul.f32 0.5, %v3911_v34  ;;  %v1769_v50 = vmul.f32 0.5, %v3914_v51  ;;  %v1762_v19 = vmul.f32 0.5, %v3905_v0 }
0x13bb   : > { %v1778_v17 = vrot.slane %v1763_v54, 6  ;;  %v1779_v16 = vrot.slane %v1764_v29, 4  ;;  %v1780_v31 = vrot.slane %v1765_v47, 2  ;;  %v1766_v12 = vmul.f32 0.5, %v3923_v52 }
0x13bc   : > { %v1781_v27 = vrot.slane %v1767_v26, 6  ;;  %v1782_v53 = vrot.slane %v1768_v5, 4  ;;  %v1783_v3 = vrot.slane %v1769_v50, 2  ;;  %v1760_v7 = vmul.f32 0.5, %v4492_v39  ;;  %v2941_v5 = vpop.eup %2940 }
0x13bd   : > { %1973 = vmatpush.bf16.xpose.msra.mxu0 %v4473_v25  ;;  %1986 = vmatpush.bf16.xpose.msra.mxu1 %v4474_v1  ;;  %v1784_v59 = vsel %vm810_vm0, %v1762_v19, %v1778_v17  ;;  %v3935_v62 = vpack.c.bf16 %v1509_v41, %v1508_v60  ;;  %v1786_v11 = vsel %vm1785_vm6, %v1779_v16, %v1780_v31 }
0x13be   : > { %1999 = vmatpush.bf16.xpose.msra.mxu2 %v4472_v33  ;;  %2012 = vmatpush.bf16.xpose.msra.mxu3 %v4475_v43  ;;  %v1789_v25 = vsel %vm810_vm0, %v1766_v12, %v1781_v27  ;;  %v1790_v10 = vsel %vm1785_vm6, %v1782_v53, %v1783_v3  ;;  %v1788_v1 = vsel %vm1787_vm10, %v1784_v59, %v1786_v11  ;;  %v4493_v33 = vld [vmem:[#allocation26_spill] sm:$0xff]  ;;  %vm2090_vm0 = vcmask 1040384  }
0x13bf   : > { %v1761_v43 = vmul.f32 0.5, %v4493_v33  ;;  %v1791_v20 = vsel %vm1787_vm10, %v1789_v25, %v1790_v10  ;;  %v3947_v21 = vadd.f32 %v1788_v1, %v1760_v7  ;;  %v1510_v50 = vmul.f32 %v2939_v42, %v3858_v40 }
0x13c0   : > { %v1511_v16 = vmul.f32 %v2941_v5, %v3847_v63 }
0x13c1   : > { %v3949_v22 = vadd.f32 %v1791_v20, %v1761_v43  ;;  %v2070_v32 = vmul.f32 %v3947_v21, %v3947_v21 }
0x13c2   : > { %v1515_v3 = vpack.c.bf16 %v1511_v16, %v1510_v50 }
0x13c3   : > { %2807 = vmatmul.msk.bf16.gmra.mxu0 %vm616_vm4, %v3935_v62  ;;  %2811 = vmatmul.msk.bf16.gmra.mxu1 %vm616_vm4, %v3935_v62  ;;  %v2071_v54 = vmul.f32 %v3949_v22, %v3949_v22  ;;  %v2074_v29 = vperm.slane %v2070_v32, 0  ;;  %v2075_v47 = vperm.slane %v2070_v32, 2  ;;  %v2076_v26 = vperm.slane %v2070_v32, 4 }
0x13c4   : > { %2815 = vmatmul.msk.bf16.gmra.mxu2 %vm616_vm4, %v3935_v62  ;;  %2819 = vmatmul.msk.bf16.gmra.mxu3 %vm616_vm4, %v3935_v62  ;;  %v2077_v17 = vperm.slane %v2070_v32, 6 }
0x13c5   : > { %v2091_v60 = vsel %vm2090_vm0, %v2074_v29, 0.0  ;;  %v2092_v41 = vsel %vm2090_vm0, %v2075_v47, 0.0  ;;  %v2078_v31 = vperm.slane %v2071_v54, 0  ;;  %v2094_v27 = vsel %vm2090_vm0, %v2076_v26, 0.0  ;;  %v164_v29 = vld [vmem:[%s3000_s14 + $0x8] sm:$0xff]  ;;  %v167_v47 = vld [vmem:[%s3000_s14 + $0x20] sm:$0xff] }
0x13c6   : > { %v2093_v19 = vadd.f32 %v2092_v41, %v2091_v60  ;;  %v2079_v12 = vperm.slane %v2071_v54, 2  ;;  %v2096_v59 = vsel %vm2090_vm0, %v2077_v17, 0.0  ;;  %v2080_v40 = vperm.slane %v2071_v54, 4 }
0x13c7   : > { %v2098_v7 = vsel %vm2090_vm0, %v2078_v31, 0.0  ;;  %v2081_v8 = vperm.slane %v2071_v54, 6  ;;  %v2123_v41 = vunpack.c.l.bf16 %v164_v29 }
0x13c8   : > { %v2095_v53 = vadd.f32 %v2094_v27, %v2093_v19  ;;  %v2100_v11 = vsel %vm2090_vm0, %v2079_v12, 0.0  ;;  %v2102_v10 = vsel %vm2090_vm0, %v2080_v40, 0.0  ;;  %v1946_v27 = vperm.slane %v3949_v22, 0 }
0x13c9   : > { %v2104_v58 = vsel %vm2090_vm0, %v2081_v8, 0.0 }
0x13ca   : > { %v2097_v39 = vadd.f32 %v2096_v59, %v2095_v53  ;;  %v2130_v59 = vunpack.c.h.bf16 %v167_v47 }
0x13cc   : > { %v2099_v63 = vadd.f32 %v2098_v7, %v2097_v39  ;;  %v2124_v7 = vunpack.c.h.bf16 %v164_v29 }
0x13ce   : > { %v2101_v25 = vadd.f32 %v2100_v11, %v2099_v63  ;;  %v1947_v11 = vperm.slane %v3949_v22, 2 }
0x13d0   : > { %v2103_v1 = vadd.f32 %v2102_v10, %v2101_v25  ;;  %v1948_v25 = vperm.slane %v3949_v22, 4 }
0x13d2   : > { %v3969_v33 = vadd.f32 %v2104_v58, %v2103_v1  ;;  %v168_v58 = vld [vmem:[%s3000_s14 + $0x28] sm:$0xff] }
0x13d3   : > { %2808 = vmatmul.msk.bf16.gmra.mxu0 %vm616_vm4, %v1515_v3  ;;  %2812 = vmatmul.msk.bf16.gmra.mxu1 %vm616_vm4, %v1515_v3 }
0x13d4   : > { %2816 = vmatmul.msk.bf16.gmra.mxu2 %vm616_vm4, %v1515_v3  ;;  %2820 = vmatmul.msk.bf16.gmra.mxu3 %vm616_vm4, %v1515_v3 }
0x13e3   : > { %2821 = vmatmul.msk.bf16.vlgmr.msrb.gmra.mxu0 %vm616_vm4, %v3862_v56  ;;  %2825 = vmatmul.msk.bf16.vlgmr.msrb.gmra.mxu1 %vm616_vm4, %v3862_v56 }
0x13e4   : > { %2829 = vmatmul.msk.bf16.vlgmr.msrb.gmra.mxu2 %vm616_vm4, %v3862_v56  ;;  %2833 = vmatmul.msk.bf16.vlgmr.msrb.gmra.mxu3 %vm616_vm4, %v3862_v56 }
0x13e5   : > { %2022 = vmatpush.bf16.xpose.msrb.mxu0 %v4477_v14  ;;  %2035 = vmatpush.bf16.xpose.msrb.mxu1 %v4479_v6  ;;  %v1797_v14 = vmul.f32 0.3, %v3896_v23  ;;  %v1943_v6 = vperm.slane %v3947_v21, 2 }
0x13e6   : > { %2048 = vmatpush.bf16.xpose.msrb.mxu2 %v4476_v55  ;;  %2061 = vmatpush.bf16.xpose.msrb.mxu3 %v4478_v57  ;;  %v1796_v55 = vmul.f32 0.3, %v3905_v0  ;;  %v1942_v57 = vperm.slane %v3947_v21, 0  ;;  %v1798_v0 = vmul.f32 0.3, %v3899_v45 }
0x13e8   : > { %v4032_v26 = vperm.slane %v1798_v0, 1 }
0x13ed   : > { %2023 = vmatpush.bf16.xpose.msrb.mxu0 %v4481_v48  ;;  %2036 = vmatpush.bf16.xpose.msrb.mxu1 %v4483_v18  ;;  %v1944_v48 = vperm.slane %v3947_v21, 4  ;;  %v4022_v18 = vperm.slane %v1796_v55, 1  ;;  %v1962_v55 = vpack.c.bf16 %v1946_v27, %v1946_v27 }
0x13ee   : > { %2049 = vmatpush.bf16.xpose.msrb.mxu2 %v4480_v24  ;;  %2062 = vmatpush.bf16.xpose.msrb.mxu3 %v4482_v38  ;;  %v163_v24 = vld [vmem:[%s3000_s14] sm:$0xff]  ;;  %v1945_v38 = vperm.slane %v3947_v21, 6 }
0x13ef   : > { %v2122_v56 = vunpack.c.h.bf16 %v163_v24 }
0x13f0   : > { %v1961_v23 = vpack.c.bf16 %v1945_v38, %v1945_v38 }
0x13f3   : > { %2822 = vmatmul.msk.bf16.gmra.mxu0 %vm616_vm4, %v3881_v36  ;;  %2826 = vmatmul.msk.bf16.gmra.mxu1 %vm616_vm4, %v3881_v36 }
0x13f4   : > { %2830 = vmatmul.msk.bf16.gmra.mxu2 %vm616_vm4, %v3881_v36  ;;  %2834 = vmatmul.msk.bf16.gmra.mxu3 %vm616_vm4, %v3881_v36  ;;  %v1960_v36 = vpack.c.bf16 %v1944_v48, %v1944_v48 }
0x13f5   : > { %2024 = vmatpush.bf16.xpose.msrb.mxu0 %v4485_v13  ;;  %2037 = vmatpush.bf16.xpose.msrb.mxu1 %v4487_v30  ;;  %v1958_v30 = vpack.c.bf16 %v1942_v57, %v1942_v57 }
0x13f6   : > { %2050 = vmatpush.bf16.xpose.msrb.mxu2 %v4484_v28  ;;  %2063 = vmatpush.bf16.xpose.msrb.mxu3 %v4486_v46  ;;  %v4024_v28 = vperm.slane %v1797_v14, 1  ;;  %v1949_v14 = vperm.slane %v3949_v22, 6 }
0x13fd   : > { %2025 = vmatpush.bf16.xpose.msrb.mxu0 %v4489_v49  ;;  %2038 = vmatpush.bf16.xpose.msrb.mxu1 %v4491_v44 }
0x13fe   : > { %2051 = vmatpush.bf16.xpose.msrb.mxu2 %v4488_v35  ;;  %2064 = vmatpush.bf16.xpose.msrb.mxu3 %v4490_v15  ;;  %v1959_v35 = vpack.c.bf16 %v1943_v6, %v1943_v6  ;;  %v2121_v15 = vunpack.c.l.bf16 %v163_v24 }
0x1403   : > { %2823 = vmatmul.msk.bf16.gmra.mxu0 %vm616_vm4, %v3935_v62  ;;  %2827 = vmatmul.msk.bf16.gmra.mxu1 %vm616_vm4, %v3935_v62 }
0x1404   : > { %2831 = vmatmul.msk.bf16.gmra.mxu2 %vm616_vm4, %v3935_v62  ;;  %2835 = vmatmul.msk.bf16.gmra.mxu3 %vm616_vm4, %v3935_v62  ;;  %v1799_v62 = vmul.f32 0.3, %v3902_v2 }
0x1406   : > { %v4034_v5 = vperm.slane %v1799_v62, 1 }
0x1413   : > { %2824 = vmatmul.msk.bf16.gmra.mxu0 %vm616_vm4, %v1515_v3  ;;  %2828 = vmatmul.msk.bf16.gmra.mxu1 %vm616_vm4, %v1515_v3 }
0x1414   : > { %2832 = vmatmul.msk.bf16.gmra.mxu2 %vm616_vm4, %v1515_v3  ;;  %2836 = vmatmul.msk.bf16.gmra.mxu3 %vm616_vm4, %v1515_v3  ;;  %v2129_v3 = vunpack.c.l.bf16 %v167_v47 }
0x1420   : > { %v1537_v13 = vpop.f32.mrf.mxu0  ;;  %v1566_v46 = vpop.f32.mrf.mxu1 }
0x1421   : > { %v1804_v49 = vmul.f32 0.7, %v1537_v13  ;;  %v1805_v44 = vmul.f32 0.7, %v1566_v46 }
0x1423   : > { %v1876_v43 = vadd.f32 %v4022_v18, %v1804_v49  ;;  %v1877_v20 = vadd.f32 %v4024_v28, %v1805_v44  ;;  %1974 = vmatmul.bf16.vlgmr.msra.gmra.mxu0 %v1958_v30  ;;  %1987 = vmatmul.bf16.vlgmr.msra.gmra.mxu1 %v1959_v35  ;;  %v171_v35 = vld [vmem:[%s3000_s14 + $0x40] sm:$0xff] }
0x1424   : > { %2000 = vmatmul.bf16.vlgmr.msra.gmra.mxu2 %v1960_v36  ;;  %2013 = vmatmul.bf16.vlgmr.msra.gmra.mxu3 %v1961_v23  ;;  %v1963_v23 = vpack.c.bf16 %v1947_v11, %v1947_v11  ;;  %v2138_v29 = vunpack.c.h.bf16 %v171_v35 }
0x1425   : > { %v2185_v21 = vmul.f32 %v2121_v15, %v1876_v43  ;;  %v2321_v32 = vmul.f32 %v1876_v43, %v1876_v43  ;;  %v2186_v42 = vmul.f32 %v2122_v56, %v1877_v20  ;;  %v2322_v54 = vmul.f32 %v1877_v20, %v1877_v20 }
0x1426   : > { %v2131_v56 = vunpack.c.l.bf16 %v168_v58 }
0x1427   : > { %v2249_v45 = vadd.f32 %v2186_v42, %v2185_v21  ;;  %v2385_v2 = vadd.f32 %v2322_v54, %v2321_v32  ;;  %v1595_v50 = vpop.f32.mrf.mxu2  ;;  %v1624_v17 = vpop.f32.mrf.mxu3  ;;  %v2137_v42 = vunpack.c.l.bf16 %v171_v35 }
0x1428   : > { %v1806_v60 = vmul.f32 0.7, %v1595_v50  ;;  %v1807_v19 = vmul.f32 0.7, %v1624_v17  ;;  %v1539_v16 = vpop.f32.mrf.mxu0  ;;  %v1568_v31 = vpop.f32.mrf.mxu1  ;;  %v1964_v50 = vpack.c.bf16 %v1948_v25, %v1948_v25 }
0x1429   : > { %v1812_v53 = vmul.f32 0.7, %v1539_v16  ;;  %v1813_v12 = vmul.f32 0.7, %v1568_v31  ;;  %v172_v31 = vld [vmem:[%s3000_s14 + $0x48] sm:$0xff] }
0x142a   : > { %v1878_v39 = vadd.f32 %v4032_v26, %v1806_v60  ;;  %v1879_v40 = vadd.f32 %v4034_v5, %v1807_v19 }
0x142b   : > { %v1884_v63 = vadd.f32 %v4022_v18, %v1812_v53  ;;  %v1885_v8 = vadd.f32 %v4024_v28, %v1813_v12 }
0x142c   : > { %v2187_v10 = vmul.f32 %v2123_v41, %v1878_v39  ;;  %v2323_v1 = vmul.f32 %v1878_v39, %v1878_v39  ;;  %v2188_v46 = vmul.f32 %v2124_v7, %v1879_v40  ;;  %v2324_v30 = vmul.f32 %v1879_v40, %v1879_v40 }
0x142d   : > { %v2193_v57 = vmul.f32 %v2129_v3, %v1884_v63  ;;  %v2329_v6 = vmul.f32 %v1884_v63, %v1884_v63  ;;  %v2194_v24 = vmul.f32 %v2130_v59, %v1885_v8  ;;  %v2330_v48 = vmul.f32 %v1885_v8, %v1885_v8  ;;  %v175_v63 = vld [vmem:[%s3000_s14 + $0x60] sm:$0xff] }
0x142e   : > { %v2250_v38 = vadd.f32 %v2249_v45, %v2187_v10  ;;  %v2386_v13 = vadd.f32 %v2385_v2, %v2323_v1  ;;  %v2132_v2 = vunpack.c.h.bf16 %v168_v58  ;;  %v1965_v41 = vpack.c.bf16 %v1949_v14, %v1949_v14 }
0x142f   : > { %v2258_v49 = vadd.f32 %v2194_v24, %v2193_v57  ;;  %v2394_v15 = vadd.f32 %v2330_v48, %v2329_v6  ;;  %v1597_v44 = vpop.f32.mrf.mxu2  ;;  %v1626_v36 = vpop.f32.mrf.mxu3  ;;  %v2139_v10 = vunpack.c.l.bf16 %v172_v31 }
0x1430   : > { %v4046_v0 = vadd.f32 %v2250_v38, %v2188_v46  ;;  %v4048_v62 = vadd.f32 %v2386_v13, %v2324_v30  ;;  %v1814_v22 = vmul.f32 0.7, %v1597_v44  ;;  %v1815_v43 = vmul.f32 0.7, %v1626_v36  ;;  %v1542_v20 = vpop.f32.mrf.mxu0  ;;  %v1571_v21 = vpop.f32.mrf.mxu1 }
0x1431   : > { %v1820_v32 = vmul.f32 0.7, %v1542_v20  ;;  %v1821_v54 = vmul.f32 0.7, %v1571_v21  ;;  %v2145_v38 = vunpack.c.l.bf16 %v175_v63  ;;  %v2146_v46 = vunpack.c.h.bf16 %v175_v63 }
0x1432   : > { %v1886_v47 = vadd.f32 %v4032_v26, %v1814_v22  ;;  %v1887_v45 = vadd.f32 %v4034_v5, %v1815_v43 }
0x1433   : > { %v1892_v17 = vadd.f32 %v4022_v18, %v1820_v32  ;;  %v1893_v60 = vadd.f32 %v4024_v28, %v1821_v54  ;;  %2026 = vmatmul.bf16.vlgmr.msrb.gmra.mxu0 %v1962_v55  ;;  %2039 = vmatmul.bf16.vlgmr.msrb.gmra.mxu1 %v1963_v23  ;;  %v176_v23 = vld [vmem:[%s3000_s14 + $0x68] sm:$0xff] }
0x1434   : > { %v2195_v19 = vmul.f32 %v2131_v56, %v1886_v47  ;;  %v2331_v16 = vmul.f32 %v1886_v47, %v1886_v47  ;;  %2052 = vmatmul.bf16.vlgmr.msrb.gmra.mxu2 %v1964_v50  ;;  %2065 = vmatmul.bf16.vlgmr.msrb.gmra.mxu3 %v1965_v41  ;;  %v2196_v40 = vmul.f32 %v2132_v2, %v1887_v45  ;;  %v179_v47 = vld [vmem:[%s3000_s14 + $0x80] sm:$0xff]  ;;  %v2148_v63 = vunpack.c.h.bf16 %v176_v23 }
0x1435   : > { %v2201_v27 = vmul.f32 %v2137_v42, %v1892_v17  ;;  %v2337_v53 = vmul.f32 %v1892_v17, %v1892_v17  ;;  %v2202_v3 = vmul.f32 %v2138_v29, %v1893_v60  ;;  %v2338_v12 = vmul.f32 %v1893_v60, %v1893_v60 }
0x1436   : > { %v2259_v59 = vadd.f32 %v2258_v49, %v2195_v19  ;;  %v2395_v39 = vadd.f32 %v2394_v15, %v2331_v16  ;;  %v2332_v7 = vmul.f32 %v1887_v45, %v1887_v45  ;;  %v2140_v49 = vunpack.c.h.bf16 %v172_v31 }
0x1437   : > { %v2267_v8 = vadd.f32 %v2202_v3, %v2201_v27  ;;  %v2403_v11 = vadd.f32 %v2338_v12, %v2337_v53  ;;  %v1600_v25 = vpop.f32.mrf.mxu2  ;;  %v1629_v1 = vpop.f32.mrf.mxu3  ;;  %v2147_v17 = vunpack.c.l.bf16 %v176_v23  ;;  %v2153_v12 = vunpack.c.l.bf16 %v179_v47 }
0x1438   : > { %v4056_v58 = vadd.f32 %v2259_v59, %v2196_v40  ;;  %v4058_v55 = vadd.f32 %v2395_v39, %v2332_v7  ;;  %v1822_v14 = vmul.f32 0.7, %v1600_v25  ;;  %v1823_v57 = vmul.f32 0.7, %v1629_v1  ;;  %v1544_v6 = vpop.f32.mrf.mxu0  ;;  %v1573_v24 = vpop.f32.mrf.mxu1  ;;  %v180_v1 = vld [vmem:[%s3000_s14 + $0x88] sm:$0xff] }
0x1439   : > { %v1828_v48 = vmul.f32 0.7, %v1544_v6  ;;  %v1829_v13 = vmul.f32 0.7, %v1573_v24  ;;  %v2154_v39 = vunpack.c.h.bf16 %v179_v47 }
0x143a   : > { %v1894_v30 = vadd.f32 %v4032_v26, %v1822_v14  ;;  %v1895_v35 = vadd.f32 %v4034_v5, %v1823_v57 }
0x143b   : > { %v1900_v15 = vadd.f32 %v4022_v18, %v1828_v48  ;;  %v1901_v44 = vadd.f32 %v4024_v28, %v1829_v13 }
0x143c   : > { %v2203_v56 = vmul.f32 %v2139_v10, %v1894_v30  ;;  %v2339_v36 = vmul.f32 %v1894_v30, %v1894_v30  ;;  %v2204_v54 = vmul.f32 %v2140_v49, %v1895_v35  ;;  %v2340_v29 = vmul.f32 %v1895_v35, %v1895_v35  ;;  %v183_v30 = vld [vmem:[%s3000_s14 + $0xa0] sm:$0xff] }
0x143d   : > { %v2209_v22 = vmul.f32 %v2145_v38, %v1900_v15  ;;  %v2345_v43 = vmul.f32 %v1900_v15, %v1900_v15  ;;  %v2210_v20 = vmul.f32 %v2146_v46, %v1901_v44  ;;  %v2346_v21 = vmul.f32 %v1901_v44, %v1901_v44 }
0x143e   : > { %v2268_v32 = vadd.f32 %v2267_v8, %v2203_v56  ;;  %v2404_v42 = vadd.f32 %v2403_v11, %v2339_v36  ;;  %v2155_v44 = vunpack.c.l.bf16 %v180_v1 }
0x143f   : > { %v2276_v45 = vadd.f32 %v2210_v20, %v2209_v22  ;;  %v2412_v2 = vadd.f32 %v2346_v21, %v2345_v43  ;;  %v1602_v50 = vpop.f32.mrf.mxu2  ;;  %v1631_v60 = vpop.f32.mrf.mxu3 }
0x1440   : > { %v4066_v41 = vadd.f32 %v2268_v32, %v2204_v54  ;;  %v4068_v19 = vadd.f32 %v2404_v42, %v2340_v29  ;;  %v1830_v16 = vmul.f32 0.7, %v1602_v50  ;;  %v1831_v31 = vmul.f32 0.7, %v1631_v60  ;;  %v1547_v27 = vpop.f32.mrf.mxu0  ;;  %v1576_v53 = vpop.f32.mrf.mxu1 }
0x1441   : > { %v1836_v3 = vmul.f32 0.7, %v1547_v27  ;;  %v1837_v59 = vmul.f32 0.7, %v1576_v53  ;;  %v2161_v42 = vunpack.c.l.bf16 %v183_v30  ;;  %v2162_v29 = vunpack.c.h.bf16 %v183_v30 }
0x1442   : > { %v1902_v40 = vadd.f32 %v4032_v26, %v1830_v16  ;;  %v1903_v7 = vadd.f32 %v4034_v5, %v1831_v31  ;;  %v184_v31 = vld [vmem:[%s3000_s14 + $0xa8] sm:$0xff] }
0x1443   : > { %v1908_v8 = vadd.f32 %v4022_v18, %v1836_v3  ;;  %v1909_v11 = vadd.f32 %v4024_v28, %v1837_v59 }
0x1444   : > { %v2211_v25 = vmul.f32 %v2147_v17, %v1902_v40  ;;  %v2347_v10 = vmul.f32 %v1902_v40, %v1902_v40  ;;  %v2212_v13 = vmul.f32 %v2148_v63, %v1903_v7  ;;  %v2348_v46 = vmul.f32 %v1903_v7, %v1903_v7  ;;  %v187_v63 = vld [vmem:[%s3000_s14 + $0xc0] sm:$0xff] }
0x1445   : > { %v2217_v14 = vmul.f32 %v2153_v12, %v1908_v8  ;;  %v2353_v57 = vmul.f32 %v1908_v8, %v1908_v8  ;;  %v2218_v6 = vmul.f32 %v2154_v39, %v1909_v11  ;;  %v2354_v24 = vmul.f32 %v1909_v11, %v1909_v11 }
0x1446   : > { %v2277_v48 = vadd.f32 %v2276_v45, %v2211_v25  ;;  %v2413_v38 = vadd.f32 %v2412_v2, %v2347_v10  ;;  %v2156_v2 = vunpack.c.h.bf16 %v180_v1  ;;  %v2163_v10 = vunpack.c.l.bf16 %v184_v31 }
0x1447   : > { %v2285_v35 = vadd.f32 %v2218_v6, %v2217_v14  ;;  %v2421_v49 = vadd.f32 %v2354_v24, %v2353_v57  ;;  %v1605_v15 = vpop.f32.mrf.mxu2  ;;  %v1634_v56 = vpop.f32.mrf.mxu3 }
0x1448   : > { %v4076_v36 = vadd.f32 %v2277_v48, %v2212_v13  ;;  %v4078_v23 = vadd.f32 %v2413_v38, %v2348_v46  ;;  %v1838_v22 = vmul.f32 0.7, %v1605_v15  ;;  %v1839_v43 = vmul.f32 0.7, %v1634_v56  ;;  %v1549_v20 = vpop.f32.mrf.mxu0  ;;  %v1578_v21 = vpop.f32.mrf.mxu1 }
0x1449   : > { %v1844_v32 = vmul.f32 0.7, %v1549_v20  ;;  %v1845_v54 = vmul.f32 0.7, %v1578_v21  ;;  %v2169_v46 = vunpack.c.l.bf16 %v187_v63  ;;  %v188_v21 = vld [vmem:[%s3000_s14 + $0xc8] sm:$0xff] }
0x144a   : > { %v1910_v47 = vadd.f32 %v4032_v26, %v1838_v22  ;;  %v1911_v45 = vadd.f32 %v4034_v5, %v1839_v43 }
0x144b   : > { %v1916_v50 = vadd.f32 %v4022_v18, %v1844_v32  ;;  %v1917_v17 = vadd.f32 %v4024_v28, %v1845_v54 }
0x144c   : > { %v2219_v60 = vmul.f32 %v2155_v44, %v1910_v47  ;;  %v2355_v16 = vmul.f32 %v1910_v47, %v1910_v47  ;;  %v2220_v40 = vmul.f32 %v2156_v2, %v1911_v45  ;;  %v2356_v7 = vmul.f32 %v1911_v45, %v1911_v45 }
0x144d   : > { %v2225_v27 = vmul.f32 %v2161_v42, %v1916_v50  ;;  %v2361_v53 = vmul.f32 %v1916_v50, %v1916_v50  ;;  %v2226_v3 = vmul.f32 %v2162_v29, %v1917_v17  ;;  %v2362_v12 = vmul.f32 %v1917_v17, %v1917_v17  ;;  %v191_v17 = vld [vmem:[%s3000_s14 + $0xe0] sm:$0xff] }
0x144e   : > { %v2286_v59 = vadd.f32 %v2285_v35, %v2219_v60  ;;  %v2422_v39 = vadd.f32 %v2421_v49, %v2355_v16  ;;  %v2170_v35 = vunpack.c.h.bf16 %v187_v63  ;;  %v2164_v44 = vunpack.c.h.bf16 %v184_v31 }
0x144f   : > { %v2294_v8 = vadd.f32 %v2226_v3, %v2225_v27  ;;  %v2430_v11 = vadd.f32 %v2362_v12, %v2361_v53  ;;  %v1607_v25 = vpop.f32.mrf.mxu2  ;;  %v1636_v1 = vpop.f32.mrf.mxu3  ;;  %v2171_v31 = vunpack.c.l.bf16 %v188_v21 }
0x1450   : > { %v4086_v14 = vadd.f32 %v2286_v59, %v2220_v40  ;;  %v4088_v57 = vadd.f32 %v2422_v39, %v2356_v7  ;;  %v1846_v6 = vmul.f32 0.7, %v1607_v25  ;;  %v1847_v24 = vmul.f32 0.7, %v1636_v1  ;;  %v1552_v48 = vpop.f32.mrf.mxu0  ;;  %v1581_v38 = vpop.f32.mrf.mxu1 }
0x1451   : > { %v1852_v13 = vmul.f32 0.7, %v1552_v48  ;;  %v1853_v30 = vmul.f32 0.7, %v1581_v38  ;;  %v2178_v25 = vunpack.c.h.bf16 %v191_v17  ;;  %v1800_v38 = vmul.f32 0.3, %v3923_v52 }
0x1452   : > { %v1918_v49 = vadd.f32 %v4032_v26, %v1846_v6  ;;  %v1919_v15 = vadd.f32 %v4034_v5, %v1847_v24  ;;  %v2172_v6 = vunpack.c.h.bf16 %v188_v21 }
0x1453   : > { %v1924_v56 = vadd.f32 %v4022_v18, %v1852_v13  ;;  %v1925_v22 = vadd.f32 %v4024_v28, %v1853_v30  ;;  %v1801_v13 = vmul.f32 0.3, %v3908_v9 }
0x1454   : > { %v2227_v43 = vmul.f32 %v2163_v10, %v1918_v49  ;;  %v2363_v20 = vmul.f32 %v1918_v49, %v1918_v49  ;;  %v2228_v2 = vmul.f32 %v2164_v44, %v1919_v15  ;;  %v2364_v50 = vmul.f32 %v1919_v15, %v1919_v15 }
0x1455   : > { %v2233_v32 = vmul.f32 %v2169_v46, %v1924_v56  ;;  %v2369_v42 = vmul.f32 %v1924_v56, %v1924_v56  ;;  %v2234_v54 = vmul.f32 %v2170_v35, %v1925_v22  ;;  %v2370_v29 = vmul.f32 %v1925_v22, %v1925_v22  ;;  %v192_v35 = vld [vmem:[%s3000_s14 + $0xe8] sm:$0xff] }
0x1456   : > { %v2295_v47 = vadd.f32 %v2294_v8, %v2227_v43  ;;  %v2431_v45 = vadd.f32 %v2430_v11, %v2363_v20  ;;  %v2177_v8 = vunpack.c.l.bf16 %v191_v17  ;;  %v2179_v52 = vunpack.c.l.bf16 %v192_v35 }
0x1457   : > { %v2303_v60 = vadd.f32 %v2234_v54, %v2233_v32  ;;  %v2439_v16 = vadd.f32 %v2370_v29, %v2369_v42  ;;  %v1610_v27 = vpop.f32.mrf.mxu2  ;;  %v1639_v53 = vpop.f32.mrf.mxu3  ;;  %v165_v32 = vld [vmem:[%s3000_s14 + $0x10] sm:$0xff] }
0x1458   : > { %v4096_v3 = vadd.f32 %v2295_v47, %v2228_v2  ;;  %v4098_v12 = vadd.f32 %v2431_v45, %v2364_v50  ;;  %v1854_v59 = vmul.f32 0.7, %v1610_v27  ;;  %v1855_v39 = vmul.f32 0.7, %v1639_v53  ;;  %v1554_v40 = vpop.f32.mrf.mxu0  ;;  %v1583_v7 = vpop.f32.mrf.mxu1 }
0x1459   : > { %v1860_v63 = vmul.f32 0.7, %v1554_v40  ;;  %v1861_v11 = vmul.f32 0.7, %v1583_v7  ;;  %v2125_v27 = vunpack.c.l.bf16 %v165_v32  ;;  %v4118_v40 = vperm.slane %v1801_v13, 1 }
0x145a   : > { %v1926_v10 = vadd.f32 %v4032_v26, %v1854_v59  ;;  %v1927_v1 = vadd.f32 %v4034_v5, %v1855_v39  ;;  %v2180_v59 = vunpack.c.h.bf16 %v192_v35  ;;  %v1803_v39 = vmul.f32 0.3, %v3914_v51 }
0x145b   : > { %v1932_v24 = vadd.f32 %v4022_v18, %v1860_v63  ;;  %v1933_v48 = vadd.f32 %v4024_v28, %v1861_v11  ;;  %v1802_v18 = vmul.f32 0.3, %v3911_v34 }
0x145c   : > { %v2235_v46 = vmul.f32 %v2171_v31, %v1926_v10  ;;  %v2371_v30 = vmul.f32 %v1926_v10, %v1926_v10  ;;  %v2236_v20 = vmul.f32 %v2172_v6, %v1927_v1  ;;  %v2372_v21 = vmul.f32 %v1927_v1, %v1927_v1 }
0x145d   : > { %v2241_v49 = vmul.f32 %v2177_v8, %v1932_v24  ;;  %v2377_v15 = vmul.f32 %v1932_v24, %v1932_v24  ;;  %v2242_v44 = vmul.f32 %v2178_v25, %v1933_v48  ;;  %v2378_v56 = vmul.f32 %v1933_v48, %v1933_v48  ;;  %v166_v25 = vld [vmem:[%s3000_s14 + $0x18] sm:$0xff] }
0x145e   : > { %v2304_v22 = vadd.f32 %v2303_v60, %v2235_v46  ;;  %v2440_v43 = vadd.f32 %v2439_v16, %v2371_v30  ;;  %v4113_v60 = vperm.slane %v1800_v38, 1  ;;  %v4121_v63 = vperm.slane %v1802_v18, 1  ;;  %v169_v46 = vld [vmem:[%s3000_s14 + $0x30] sm:$0xff] }
0x145f   : > { %v2312_v42 = vadd.f32 %v2242_v44, %v2241_v49  ;;  %v2448_v28 = vadd.f32 %v2378_v56, %v2377_v15  ;;  %v1612_v54 = vpop.f32.mrf.mxu2  ;;  %v1641_v29 = vpop.f32.mrf.mxu3  ;;  %v4126_v51 = vperm.slane %v1803_v39, 1  ;;  %v2127_v49 = vunpack.c.l.bf16 %v166_v25 }
0x1460   : > { %v4109_v9 = vadd.f32 %v2304_v22, %v2236_v20  ;;  %v4111_v47 = vadd.f32 %v2440_v43, %v2372_v21  ;;  %v1862_v45 = vmul.f32 0.7, %v1612_v54  ;;  %v1863_v2 = vmul.f32 0.7, %v1641_v29  ;;  %v1653_v50 = vpop.f32.mrf.mxu0  ;;  %v1682_v17 = vpop.f32.mrf.mxu1 }
0x1461   : > { %v1808_v16 = vmul.f32 0.7, %v1653_v50  ;;  %v1809_v31 = vmul.f32 0.7, %v1682_v17  ;;  %v2133_v18 = vunpack.c.l.bf16 %v169_v46  ;;  %v170_v50 = vld [vmem:[%s3000_s14 + $0x38] sm:$0xff] }
0x1462   : > { %v1934_v34 = vadd.f32 %v4032_v26, %v1862_v45  ;;  %v1935_v53 = vadd.f32 %v4034_v5, %v1863_v2  ;;  %v2126_v26 = vunpack.c.h.bf16 %v165_v32 }
0x1463   : > { %v1880_v7 = vadd.f32 %v4113_v60, %v1808_v16  ;;  %v1881_v6 = vadd.f32 %v4118_v40, %v1809_v31 }
0x1464   : > { %v2243_v8 = vmul.f32 %v2179_v52, %v1934_v34  ;;  %v2379_v11 = vmul.f32 %v1934_v34, %v1934_v34  ;;  %v2244_v48 = vmul.f32 %v2180_v59, %v1935_v53  ;;  %v2380_v38 = vmul.f32 %v1935_v53, %v1935_v53  ;;  %v173_v59 = vld [vmem:[%s3000_s14 + $0x50] sm:$0xff] }
0x1465   : > { %v2189_v10 = vmul.f32 %v2125_v27, %v1880_v7  ;;  %v2325_v1 = vmul.f32 %v1880_v7, %v1880_v7  ;;  %v2326_v54 = vmul.f32 %v1881_v6, %v1881_v6  ;;  %v2134_v53 = vunpack.c.h.bf16 %v169_v46 }
0x1466   : > { %v2313_v24 = vadd.f32 %v2312_v42, %v2243_v8  ;;  %v2449_v5 = vadd.f32 %v2448_v28, %v2379_v11  ;;  %v2128_v28 = vunpack.c.h.bf16 %v166_v25 }
0x1467   : > { %v2252_v13 = vadd.f32 %v4046_v0, %v2189_v10  ;;  %v2388_v30 = vadd.f32 %v4048_v62, %v2325_v1  ;;  %v1711_v35 = vpop.f32.mrf.mxu2  ;;  %v1740_v15 = vpop.f32.mrf.mxu3  ;;  %v2190_v0 = vmul.f32 %v2126_v26, %v1881_v6  ;;  %v2135_v6 = vunpack.c.l.bf16 %v170_v50 }
0x1468   : > { %v4130_v44 = vadd.f32 %v2313_v24, %v2244_v48  ;;  %v4132_v56 = vadd.f32 %v2449_v5, %v2380_v38  ;;  %v1810_v22 = vmul.f32 0.7, %v1711_v35  ;;  %v1811_v43 = vmul.f32 0.7, %v1740_v15  ;;  %v1655_v20 = vpop.f32.mrf.mxu0  ;;  %v1684_v21 = vpop.f32.mrf.mxu1 }
0x1469   : > { %v1816_v32 = vmul.f32 0.7, %v1655_v20  ;;  %v1817_v42 = vmul.f32 0.7, %v1684_v21  ;;  %v2389_v17 = vadd.f32 %v2388_v30, %v2326_v54  ;;  %v2253_v16 = vadd.f32 %v2252_v13, %v2190_v0 }
0x146a   : > { %v1882_v62 = vadd.f32 %v4121_v63, %v1810_v22  ;;  %v1883_v52 = vadd.f32 %v4126_v51, %v1811_v43  ;;  %v2141_v35 = vunpack.c.l.bf16 %v173_v59  ;;  %v2136_v15 = vunpack.c.h.bf16 %v170_v50 }
0x146b   : > { %v1888_v29 = vadd.f32 %v4113_v60, %v1816_v32  ;;  %v1889_v34 = vadd.f32 %v4118_v40, %v1817_v42 }
0x146c   : > { %v2191_v45 = vmul.f32 %v2127_v49, %v1882_v62  ;;  %v2327_v2 = vmul.f32 %v1882_v62, %v1882_v62  ;;  %v2328_v39 = vmul.f32 %v1883_v52, %v1883_v52  ;;  %v2192_v8 = vmul.f32 %v2128_v28, %v1883_v52 }
0x146d   : > { %v2197_v27 = vmul.f32 %v2133_v18, %v1888_v29  ;;  %v2333_v31 = vmul.f32 %v1888_v29, %v1888_v29  ;;  %v2198_v22 = vmul.f32 %v2134_v53, %v1889_v34  ;;  %v174_v18 = vld [vmem:[%s3000_s14 + $0x58] sm:$0xff]  ;;  %v2142_v52 = vunpack.c.h.bf16 %v173_v59  ;;  %v177_v29 = vld [vmem:[%s3000_s14 + $0x70] sm:$0xff] }
0x146e   : > { %v2390_v7 = vadd.f32 %v2389_v17, %v2327_v2  ;;  %v2254_v11 = vadd.f32 %v2253_v16, %v2191_v45 }
0x146f   : > { %v2261_v25 = vadd.f32 %v4056_v58, %v2197_v27  ;;  %v2397_v10 = vadd.f32 %v4058_v55, %v2333_v31  ;;  %v1713_v1 = vpop.f32.mrf.mxu2  ;;  %v1742_v26 = vpop.f32.mrf.mxu3  ;;  %v2334_v58 = vmul.f32 %v1889_v34, %v1889_v34  ;;  %v2143_v34 = vunpack.c.l.bf16 %v174_v18 }
0x1470   : > { %v1818_v24 = vmul.f32 0.7, %v1713_v1  ;;  %v1819_v5 = vmul.f32 0.7, %v1742_v26  ;;  %v1658_v48 = vpop.f32.mrf.mxu0  ;;  %v1687_v38 = vpop.f32.mrf.mxu1  ;;  %v2391_v13 = vadd.f32 %v2390_v7, %v2328_v39  ;;  %v4142_v30 = vadd.f32 %v2254_v11, %v2192_v8 }
0x1471   : > { %v1824_v46 = vmul.f32 0.7, %v1658_v48  ;;  %v1825_v49 = vmul.f32 0.7, %v1687_v38  ;;  %v2398_v42 = vadd.f32 %v2397_v10, %v2334_v58  ;;  %v2262_v28 = vadd.f32 %v2261_v25, %v2198_v22 }
0x1472   : > { %v1890_v55 = vadd.f32 %v4121_v63, %v1818_v24  ;;  %v1891_v43 = vadd.f32 %v4126_v51, %v1819_v5  ;;  %2392 = vadd.xlane.f32.xlu0 %v2391_v13  ;;  %v2149_v1 = vunpack.c.l.bf16 %v177_v29  ;;  %v2144_v26 = vunpack.c.h.bf16 %v174_v18 }
0x1473   : > { %v1896_v20 = vadd.f32 %v4113_v60, %v1824_v46  ;;  %v1897_v62 = vadd.f32 %v4118_v40, %v1825_v49  ;;  %v178_v46 = vld [vmem:[%s3000_s14 + $0x78] sm:$0xff] }
0x1474   : > { %v2199_v21 = vmul.f32 %v2135_v6, %v1890_v55  ;;  %v2335_v32 = vmul.f32 %v1890_v55, %v1890_v55  ;;  %v2336_v45 = vmul.f32 %v1891_v43, %v1891_v43  ;;  %v2200_v50 = vmul.f32 %v2136_v15, %v1891_v43  ;;  %v181_v43 = vld [vmem:[%s3000_s14 + $0x90] sm:$0xff] }
0x1475   : > { %v2205_v0 = vmul.f32 %v2141_v35, %v1896_v20  ;;  %v2341_v54 = vmul.f32 %v1896_v20, %v1896_v20  ;;  %v2206_v24 = vmul.f32 %v2142_v52, %v1897_v62  ;;  %v2150_v55 = vunpack.c.h.bf16 %v177_v29 }
0x1476   : > { %v2399_v2 = vadd.f32 %v2398_v42, %v2335_v32  ;;  %v2263_v17 = vadd.f32 %v2262_v28, %v2199_v21 }
0x1477   : > { %v2270_v16 = vadd.f32 %v4066_v41, %v2205_v0  ;;  %v2406_v27 = vadd.f32 %v4068_v19, %v2341_v54  ;;  %v1716_v31 = vpop.f32.mrf.mxu2  ;;  %v1745_v53 = vpop.f32.mrf.mxu3  ;;  %v2342_v41 = vmul.f32 %v1897_v62, %v1897_v62  ;;  %v2151_v54 = vunpack.c.l.bf16 %v178_v46 }
0x1478   : > { %v1826_v39 = vmul.f32 0.7, %v1716_v31  ;;  %v1827_v7 = vmul.f32 0.7, %v1745_v53  ;;  %v1660_v8 = vpop.f32.mrf.mxu0  ;;  %v1689_v11 = vpop.f32.mrf.mxu1  ;;  %v2400_v25 = vadd.f32 %v2399_v2, %v2336_v45  ;;  %v4152_v10 = vadd.f32 %v2263_v17, %v2200_v50 }
0x1479   : > { %v1832_v59 = vmul.f32 0.7, %v1660_v8  ;;  %v1833_v6 = vmul.f32 0.7, %v1689_v11  ;;  %v2407_v35 = vadd.f32 %v2406_v27, %v2342_v41  ;;  %v2271_v49 = vadd.f32 %v2270_v16, %v2206_v24 }
0x147a   : > { %v1898_v19 = vadd.f32 %v4121_v63, %v1826_v39  ;;  %v1899_v5 = vadd.f32 %v4126_v51, %v1827_v7  ;;  %2401 = vadd.xlane.f32.xlu1 %v2400_v25  ;;  %v2157_v27 = vunpack.c.l.bf16 %v181_v43  ;;  %v182_v25 = vld [vmem:[%s3000_s14 + $0x98] sm:$0xff]  ;;  %v2158_v41 = vunpack.c.h.bf16 %v181_v43 }
0x147b   : > { %v1904_v48 = vadd.f32 %v4113_v60, %v1832_v59  ;;  %v1905_v58 = vadd.f32 %v4118_v40, %v1833_v6 }
0x147c   : > { %v2207_v38 = vmul.f32 %v2143_v34, %v1898_v19  ;;  %v2343_v13 = vmul.f32 %v1898_v19, %v1898_v19  ;;  %v2344_v20 = vmul.f32 %v1899_v5, %v1899_v5  ;;  %v2208_v32 = vmul.f32 %v2144_v26, %v1899_v5  ;;  %v185_v19 = vld [vmem:[%s3000_s14 + $0xb0] sm:$0xff] }
0x147d   : > { %v2213_v15 = vmul.f32 %v2149_v1, %v1904_v48  ;;  %v2349_v22 = vmul.f32 %v1904_v48, %v1904_v48  ;;  %v2152_v34 = vunpack.c.h.bf16 %v178_v46  ;;  %v2214_v53 = vmul.f32 %v2150_v55, %v1905_v58 }
0x147e   : > { %v2408_v21 = vadd.f32 %v2407_v35, %v2343_v13  ;;  %v2272_v18 = vadd.f32 %v2271_v49, %v2207_v38 }
0x147f   : > { %v2279_v42 = vadd.f32 %v4076_v36, %v2213_v15  ;;  %v2415_v28 = vadd.f32 %v4078_v23, %v2349_v22  ;;  %v1718_v0 = vpop.f32.mrf.mxu2  ;;  %v1747_v62 = vpop.f32.mrf.mxu3  ;;  %v2350_v36 = vmul.f32 %v1905_v58, %v1905_v58  ;;  %v2159_v15 = vunpack.c.l.bf16 %v182_v25 }
0x1480   : > { %v1834_v52 = vmul.f32 0.7, %v1718_v0  ;;  %v1835_v45 = vmul.f32 0.7, %v1747_v62  ;;  %v1663_v2 = vpop.f32.mrf.mxu0  ;;  %v1692_v50 = vpop.f32.mrf.mxu1  ;;  %v2409_v17 = vadd.f32 %v2408_v21, %v2344_v20  ;;  %v4162_v16 = vadd.f32 %v2272_v18, %v2208_v32 }
0x1481   : > { %v1840_v29 = vmul.f32 0.7, %v1663_v2  ;;  %v1841_v31 = vmul.f32 0.7, %v1692_v50  ;;  %v2416_v59 = vadd.f32 %v2415_v28, %v2350_v36  ;;  %v2280_v1 = vadd.f32 %v2279_v42, %v2214_v53  ;;  %v186_v50 = vld [vmem:[%s3000_s14 + $0xb8] sm:$0xff]  ;;  %v189_v36 = vld [vmem:[%s3000_s14 + $0xd0] sm:$0xff] }
0x1482   : > { %v1906_v23 = vadd.f32 %v4121_v63, %v1834_v52  ;;  %v1907_v39 = vadd.f32 %v4126_v51, %v1835_v45  ;;  %2410 = vadd.xlane.f32.xlu2 %v2409_v17  ;;  %v2165_v42 = vunpack.c.l.bf16 %v185_v19  ;;  %v2160_v0 = vunpack.c.h.bf16 %v182_v25 }
0x1483   : > { %v1912_v7 = vadd.f32 %v4113_v60, %v1840_v29  ;;  %v1913_v24 = vadd.f32 %v4118_v40, %v1841_v31  ;;  %v2166_v53 = vunpack.c.h.bf16 %v185_v19 }
0x1484   : > { %v2215_v8 = vmul.f32 %v2151_v54, %v1906_v23  ;;  %v2351_v11 = vmul.f32 %v1906_v23, %v1906_v23  ;;  %v2352_v5 = vmul.f32 %v1907_v39, %v1907_v39  ;;  %v2216_v38 = vmul.f32 %v2152_v34, %v1907_v39 }
0x1485   : > { %v2221_v6 = vmul.f32 %v2157_v27, %v1912_v7  ;;  %v2357_v26 = vmul.f32 %v1912_v7, %v1912_v7  ;;  %v2222_v54 = vmul.f32 %v2158_v41, %v1913_v24 }
0x1486   : > { %v2417_v48 = vadd.f32 %v2416_v59, %v2351_v11  ;;  %v2281_v13 = vadd.f32 %v2280_v1, %v2215_v8  ;;  %v2167_v1 = vunpack.c.l.bf16 %v186_v50 }
0x1487   : > { %v2288_v46 = vadd.f32 %v4086_v14, %v2221_v6  ;;  %v2424_v35 = vadd.f32 %v4088_v57, %v2357_v26  ;;  %v1721_v49 = vpop.f32.mrf.mxu2  ;;  %v1750_v22 = vpop.f32.mrf.mxu3  ;;  %v2358_v14 = vmul.f32 %v1913_v24, %v1913_v24 }
0x1488   : > { %v1842_v58 = vmul.f32 0.7, %v1721_v49  ;;  %v1843_v55 = vmul.f32 0.7, %v1750_v22  ;;  %v1665_v20 = vpop.f32.mrf.mxu0  ;;  %v1694_v21 = vpop.f32.mrf.mxu1  ;;  %v2418_v32 = vadd.f32 %v2417_v48, %v2352_v5  ;;  %v4172_v18 = vadd.f32 %v2281_v13, %v2216_v38 }
0x1489   : > { %v1848_v43 = vmul.f32 0.7, %v1665_v20  ;;  %v1849_v28 = vmul.f32 0.7, %v1694_v21  ;;  %v2425_v17 = vadd.f32 %v2424_v35, %v2358_v14  ;;  %v2289_v29 = vadd.f32 %v2288_v46, %v2222_v54  ;;  %v190_v20 = vld [vmem:[%s3000_s14 + $0xd8] sm:$0xff]  ;;  %v193_v54 = vld [vmem:[%s3000_s14 + $0xf0] sm:$0xff] }
0x148a   : > { %v1914_v57 = vadd.f32 %v4121_v63, %v1842_v58  ;;  %v1915_v62 = vadd.f32 %v4126_v51, %v1843_v55  ;;  %2419 = vadd.xlane.f32.xlu0 %v2418_v32  ;;  %v2173_v13 = vunpack.c.l.bf16 %v189_v36  ;;  %v2168_v35 = vunpack.c.h.bf16 %v186_v50 }
0x148b   : > { %v1920_v52 = vadd.f32 %v4113_v60, %v1848_v43  ;;  %v1921_v34 = vadd.f32 %v4118_v40, %v1849_v28 }
0x148c   : > { %v2223_v45 = vmul.f32 %v2159_v15, %v1914_v57  ;;  %v2359_v2 = vmul.f32 %v1914_v57, %v1914_v57  ;;  %v2360_v23 = vmul.f32 %v1915_v62, %v1915_v62  ;;  %v2224_v7 = vmul.f32 %v2160_v0, %v1915_v62 }
0x148d   : > { %v2229_v27 = vmul.f32 %v2165_v42, %v1920_v52  ;;  %v2365_v31 = vmul.f32 %v1920_v52, %v1920_v52  ;;  %v2230_v49 = vmul.f32 %v2166_v53, %v1921_v34  ;;  %v2174_v0 = vunpack.c.h.bf16 %v189_v36 }
0x148e   : > { %v2426_v39 = vadd.f32 %v2425_v17, %v2359_v2  ;;  %v2290_v8 = vadd.f32 %v2289_v29, %v2223_v45  ;;  %v2175_v17 = vunpack.c.l.bf16 %v190_v20 }
0x148f   : > { %v2297_v11 = vadd.f32 %v4096_v3, %v2229_v27  ;;  %v2433_v25 = vadd.f32 %v4098_v12, %v2365_v31  ;;  %v1723_v59 = vpop.f32.mrf.mxu2  ;;  %v1752_v6 = vpop.f32.mrf.mxu3  ;;  %v2366_v3 = vmul.f32 %v1921_v34, %v1921_v34 }
0x1490   : > { %v1850_v26 = vmul.f32 0.7, %v1723_v59  ;;  %v1851_v24 = vmul.f32 0.7, %v1752_v6  ;;  %v1668_v41 = vpop.f32.mrf.mxu0  ;;  %v1697_v5 = vpop.f32.mrf.mxu1  ;;  %v2427_v48 = vadd.f32 %v2426_v39, %v2360_v23  ;;  %v4182_v38 = vadd.f32 %v2290_v8, %v2224_v7 }
0x1491   : > { %v1856_v19 = vmul.f32 0.7, %v1668_v41  ;;  %v1857_v46 = vmul.f32 0.7, %v1697_v5  ;;  %v2434_v21 = vadd.f32 %v2433_v25, %v2366_v3  ;;  %v2298_v32 = vadd.f32 %v2297_v11, %v2230_v49 }
0x1492   : > { %v1922_v12 = vadd.f32 %v4121_v63, %v1850_v26  ;;  %v1923_v15 = vadd.f32 %v4126_v51, %v1851_v24  ;;  %2428 = vadd.xlane.f32.xlu1 %v2427_v48  ;;  %v2181_v7 = vunpack.c.l.bf16 %v193_v54  ;;  %v2176_v11 = vunpack.c.h.bf16 %v190_v20  ;;  %v194_v24 = vld [vmem:[%s3000_s14 + $0xf8] sm:$0xff] }
0x1493   : > { %v1928_v22 = vadd.f32 %v4113_v60, %v1856_v19  ;;  %v1929_v28 = vadd.f32 %v4118_v40, %v1857_v46  ;;  %v2182_v46 = vunpack.c.h.bf16 %v193_v54 }
0x1494   : > { %v2231_v58 = vmul.f32 %v2167_v1, %v1922_v12  ;;  %v2367_v55 = vmul.f32 %v1922_v12, %v1922_v12  ;;  %v2368_v14 = vmul.f32 %v1923_v15, %v1923_v15  ;;  %v2232_v62 = vmul.f32 %v2168_v35, %v1923_v15 }
0x1495   : > { %v2237_v43 = vmul.f32 %v2173_v13, %v1928_v22  ;;  %v2373_v42 = vmul.f32 %v1928_v22, %v1928_v22  ;;  %v2238_v25 = vmul.f32 %v2174_v0, %v1929_v28  ;;  %v2374_v59 = vmul.f32 %v1929_v28, %v1929_v28 }
0x1496   : > { %v2435_v57 = vadd.f32 %v2434_v21, %v2367_v55  ;;  %v2299_v52 = vadd.f32 %v2298_v32, %v2231_v58 }
0x1497   : > { %v2306_v45 = vadd.f32 %v4109_v9, %v2237_v43  ;;  %v2442_v2 = vadd.f32 %v4111_v47, %v2373_v42  ;;  %v1726_v50 = vpop.f32.mrf.mxu2  ;;  %v1755_v29 = vpop.f32.mrf.mxu3 }
0x1498   : > { %v1858_v27 = vmul.f32 0.7, %v1726_v50  ;;  %v1859_v31 = vmul.f32 0.7, %v1755_v29  ;;  %v1670_v34 = vpop.f32.mrf.mxu0  ;;  %v1699_v53 = vpop.f32.mrf.mxu1  ;;  %v2436_v23 = vadd.f32 %v2435_v57, %v2368_v14  ;;  %v4192_v39 = vadd.f32 %v2299_v52, %v2232_v62 }
0x1499   : > { %v1864_v36 = vmul.f32 0.7, %v1670_v34  ;;  %v1865_v8 = vmul.f32 0.7, %v1699_v53  ;;  %v2443_v41 = vadd.f32 %v2442_v2, %v2374_v59  ;;  %v2307_v5 = vadd.f32 %v2306_v45, %v2238_v25 }
0x149a   : > { %v1930_v9 = vadd.f32 %v4121_v63, %v1858_v27  ;;  %v1931_v47 = vadd.f32 %v4126_v51, %v1859_v31  ;;  %2437 = vadd.xlane.f32.xlu2 %v2436_v23 }
0x149b   : > { %v1936_v1 = vadd.f32 %v4113_v60, %v1864_v36  ;;  %v1937_v13 = vadd.f32 %v4118_v40, %v1865_v8  ;;  %v2183_v60 = vunpack.c.l.bf16 %v194_v24 }
0x149c   : > { %v2239_v6 = vmul.f32 %v2175_v17, %v1930_v9  ;;  %v2375_v26 = vmul.f32 %v1930_v9, %v1930_v9  ;;  %v2376_v35 = vmul.f32 %v1931_v47, %v1931_v47  ;;  %v2240_v3 = vmul.f32 %v2176_v11, %v1931_v47 }
0x149d   : > { %v2245_v48 = vmul.f32 %v2181_v7, %v1936_v1  ;;  %v2381_v19 = vmul.f32 %v1936_v1, %v1936_v1  ;;  %v2246_v0 = vmul.f32 %v2182_v46, %v1937_v13  ;;  %v2382_v54 = vmul.f32 %v1937_v13, %v1937_v13 }
0x149e   : > { %v2444_v49 = vadd.f32 %v2443_v41, %v2375_v26  ;;  %v2308_v12 = vadd.f32 %v2307_v5, %v2239_v6 }
0x149f   : > { %v2315_v15 = vadd.f32 %v4130_v44, %v2245_v48  ;;  %v2451_v22 = vadd.f32 %v4132_v56, %v2381_v19  ;;  %v1728_v58 = vpop.f32.mrf.mxu2  ;;  %v1757_v55 = vpop.f32.mrf.mxu3  ;;  %v2184_v44 = vunpack.c.h.bf16 %v194_v24 }
0x14a0   : > { %v1866_v20 = vmul.f32 0.7, %v1728_v58  ;;  %v1867_v21 = vmul.f32 0.7, %v1757_v55  ;;  %v1975_v32 = vpop.f32.mrf.mxu0  ;;  %v1988_v43 = vpop.f32.mrf.mxu1  ;;  %v2445_v42 = vadd.f32 %v2444_v49, %v2376_v35  ;;  %v2309_v28 = vadd.f32 %v2308_v12, %v2240_v3  ;;  %v4494_v35 = vld [vmem:[#allocation37_spill] sm:$0xff] }
0x14a1   : > { %v1989_v40 = vadd.f32 %v1988_v43, %v1975_v32  ;;  %v2452_v52 = vadd.f32 %v2451_v22, %v2382_v54  ;;  %v2316_v45 = vadd.f32 %v2315_v15, %v2246_v0 }
0x14a2   : > { %v1938_v14 = vadd.f32 %v4121_v63, %v1866_v20  ;;  %v1939_v57 = vadd.f32 %v4126_v51, %v1867_v21  ;;  %2446 = vadd.xlane.f32.xlu0 %v2445_v42  ;;  %2256 = vadd.xlane.f32.xlu2 %v4142_v30  ;;  %v4496_v21 = vld [vmem:[#allocation39_spill] sm:$0xff] }
0x14a4   : > { %v2247_v56 = vmul.f32 %v2183_v60, %v1938_v14  ;;  %v2383_v62 = vmul.f32 %v1938_v14, %v1938_v14  ;;  %v2384_v2 = vmul.f32 %v1939_v57, %v1939_v57  ;;  %v2248_v17 = vmul.f32 %v2184_v44, %v1939_v57 }
0x14a6   : > { %v2453_v50 = vadd.f32 %v2452_v52, %v2383_v62  ;;  %v2317_v29 = vadd.f32 %v2316_v45, %v2247_v56 }
0x14a7   : > { %v2001_v27 = vpop.f32.mrf.mxu2  ;;  %v2014_v31 = vpop.f32.mrf.mxu3 }
0x14a8   : > { %v2002_v34 = vadd.f32 %v2001_v27, %v1989_v40  ;;  %v1977_v53 = vpop.f32.mrf.mxu0  ;;  %v1990_v23 = vpop.f32.mrf.mxu1  ;;  %v2454_v63 = vadd.f32 %v2453_v50, %v2384_v2  ;;  %v2318_v36 = vadd.f32 %v2317_v29, %v2248_v17  ;;  %v4497_v2 = vld [vmem:[#allocation41_spill] sm:$0xff] }
0x14aa   : > { %v2015_v51 = vadd.f32 %v2014_v31, %v2002_v34  ;;  %2455 = vadd.xlane.f32.xlu1 %v2454_v63  ;;  %2265 = vadd.xlane.f32.xlu0 %v4152_v10 }
0x14ab   : > { %2106 = vadd.xlane.f32.xlu2 %v3969_v33 }
0x14af   : > { %v2003_v30 = vpop.f32.mrf.mxu2  ;;  %v2016_v7 = vpop.f32.mrf.mxu3 }
0x14b0   : > { %v2027_v8 = vpop.f32.mrf.mxu0  ;;  %v2040_v11 = vpop.f32.mrf.mxu1 }
0x14b1   : > { %v2028_v25 = vadd.f32 %v2027_v8, %v2015_v51 }
0x14b2   : > { %2274 = vadd.xlane.f32.xlu1 %v4162_v16  ;;  %2283 = vadd.xlane.f32.xlu0 %v4172_v18 }
0x14b3   : > { %v2041_v59 = vadd.f32 %v2040_v11, %v2028_v25  ;;  %2301 = vadd.xlane.f32.xlu2 %v4192_v39 }
0x14b7   : > { %v2053_v9 = vpop.f32.mrf.mxu2  ;;  %v2066_v1 = vpop.f32.mrf.mxu3 }
0x14b8   : > { %v2054_v47 = vadd.f32 %v2053_v9, %v2041_v59  ;;  %v2029_v6 = vpop.f32.mrf.mxu0  ;;  %v2042_v26 = vpop.f32.mrf.mxu1  ;;  %v4498_v59 = vld [vmem:[#allocation40_spill] sm:$0xff] }
0x14ba   : > { %v4209_v10 = vadd.f32 %v2066_v1, %v2054_v47  ;;  %2292 = vadd.xlane.f32.xlu1 %v4182_v38  ;;  %2310 = vadd.xlane.f32.xlu0 %v2309_v28 }
0x14bf   : > { %v2055_v33 = vpop.f32.mrf.mxu2  ;;  %v2068_v24 = vpop.f32.mrf.mxu3 }
0x14c0   : > { %v4499_v33 = vld [vmem:[#allocation36_spill] sm:$0xff] }
0x14c2   : > { %2319 = vadd.xlane.f32.xlu1 %v2318_v36 }
0x14e5   : > { %v2393_v41 = vpop.xlane.xlu0 %2392 }
0x14e6   : > { %v2457_v5 = vmul.f32 %v2393_v41, %v3525_v37 }
0x14e8   : > { %v2465_v13 = vmax.f32 %v2457_v5, 1e-16 }
0x14ea   : > { %vm2479_vm11 = vweird.f32 %v2465_v13 }
0x14ed   : > { %v2402_v16 = vpop.xlane.xlu1 %2401 }
0x14ee   : > { %v2458_v18 = vmul.f32 %v2402_v16, %v3527_v4  ;;  %v4495_v4 = vld [vmem:[#allocation38_spill] sm:$0xff] }
0x14f0   : > { %v2466_v48 = vmax.f32 %v2458_v18, 1e-16 }
0x14f2   : > { %2942 = vrsqrt.f32 %v2466_v48  ;;  %vm2489_vm13 = vweird.f32 %v2466_v48 }
0x14f3   : > { %2944 = vrsqrt.f32 %v2465_v13 }
0x14f5   : > { %v2411_v39 = vpop.xlane.xlu2 %2410 }
0x14f6   : > { %v2459_v46 = vmul.f32 %v2411_v39, %v3529_v61 }
0x14f8   : > { %v4216_v38 = vmax.f32 %v2459_v46, 1e-16  ;;  %v2943_v15 = vpop.eup %2942 }
0x14f9   : > { %v2945_v22 = vpop.eup %2944  ;;  %v2484_v58 = vmul.f32 %v2943_v15, %v2466_v48  ;;  %vm2490_vm8 = vweird.f32 %v2943_v15 }
0x14fa   : > { %2946 = vrsqrt.f32 %v4216_v38  ;;  %v2474_v60 = vmul.f32 %v2945_v22, %v2465_v13  ;;  %vm2480_vm7 = vweird.f32 %v2945_v22  ;;  %vm2491_vm14 = vmor %vm2489_vm13, %vm2490_vm8  ;;  %vm2499_vm5 = vweird.f32 %v4216_v38 }
0x14fb   : > { %v2485_v42 = vmul.f32 %v2943_v15, %v2484_v58  ;;  %vm2481_vm15 = vmor %vm2479_vm11, %vm2480_vm7 }
0x14fc   : > { %v2475_v28 = vmul.f32 %v2945_v22, %v2474_v60 }
0x14fd   : > { %v2420_v19 = vpop.xlane.xlu0 %2419  ;;  %v2486_v14 = vmul.f32 0.5, %v2485_v42 }
0x14fe   : > { %v2460_v49 = vmul.f32 %v2420_v19, %v4494_v35  ;;  %v2476_v57 = vmul.f32 0.5, %v2475_v28 }
0x14ff   : > { %v2487_v17 = vsub.f32 1.5, %v2486_v14 }
0x1500   : > { %v4218_v3 = vmax.f32 %v2460_v49, 1e-16  ;;  %v4225_v20 = vpop.eup %2946  ;;  %v2477_v31 = vsub.f32 1.5, %v2476_v57 }
0x1501   : > { %v2494_v40 = vmul.f32 %v4225_v20, %v4216_v38  ;;  %v2488_v51 = vmul.f32 %v2943_v15, %v2487_v17  ;;  %vm2500_vm9 = vweird.f32 %v4225_v20 }
0x1502   : > { %2948 = vrsqrt.f32 %v4218_v3  ;;  %v2478_v30 = vmul.f32 %v2945_v22, %v2477_v31  ;;  %vm2501_vm6 = vmor %vm2499_vm5, %vm2500_vm9  ;;  %vm2509_vm10 = vweird.f32 %v4218_v3 }
0x1503   : > { %v2495_v44 = vmul.f32 %v4225_v20, %v2494_v40  ;;  %v2492_v26 = vsel %vm2491_vm14, %v2943_v15, %v2488_v51 }
0x1504   : > { %v2482_v16 = vsel %vm2481_vm15, %v2945_v22, %v2478_v30 }
0x1505   : > { %v2429_v12 = vpop.xlane.xlu1 %2428  ;;  %v2496_v34 = vmul.f32 0.5, %v2495_v44 }
0x1506   : > { %v2461_v37 = vmul.f32 %v2429_v12, %v4495_v4  ;;  %v4501_v4 = vld [vmem:[#allocation29_spill] sm:$0xff] }
0x1507   : > { %v2497_v25 = vsub.f32 1.5, %v2496_v34 }
0x1508   : > { %v4223_v61 = vmax.f32 %v2461_v37, 1e-16  ;;  %v4228_v43 = vpop.eup %2948 }
0x1509   : > { %v2504_v54 = vmul.f32 %v4228_v43, %v4218_v3  ;;  %v2498_v13 = vmul.f32 %v4225_v20, %v2497_v25  ;;  %vm2510_vm3 = vweird.f32 %v4228_v43 }
0x150a   : > { %2950 = vrsqrt.f32 %v4223_v61  ;;  %vm2511_vm0 = vmor %vm2509_vm10, %vm2510_vm3  ;;  %vm2519_vm11 = vweird.f32 %v4223_v61 }
0x150b   : > { %v2505_v45 = vmul.f32 %v4228_v43, %v2504_v54  ;;  %v2502_v58 = vsel %vm2501_vm6, %v4225_v20, %v2498_v13  ;;  %v4503_v20 = vld [vmem:[#allocation30_spill] sm:$0xff] }
0x150c   : > { %vm4504_vm8 = vcmp.eq.s32.totalorder %v4503_v20, %v4501_v4 }
0x150d   : > { %v2438_v55 = vpop.xlane.xlu2 %2437  ;;  %v2506_v63 = vmul.f32 0.5, %v2505_v45 }
0x150e   : > { %v2462_v32 = vmul.f32 %v2438_v55, %v4496_v21 }
0x150f   : > { %v2507_v1 = vsub.f32 1.5, %v2506_v63  ;;  %v4505_v63 = vld [vmem:[#allocation31_spill] sm:$0xff] }
0x1510   : > { %v4231_v0 = vmax.f32 %v2462_v32, 1e-16  ;;  %v4239_v52 = vpop.eup %2950  ;;  %v4502_v32 = vld [vmem:[#allocation27_spill] sm:$0xff]  ;;  %vm4506_vm15 = vcmp.eq.s32.totalorder %v4505_v63, %v4501_v4 }
0x1511   : > { %v2514_v53 = vmul.f32 %v4239_v52, %v4223_v61  ;;  %v2508_v35 = vmul.f32 %v4228_v43, %v2507_v1  ;;  %v4507_v1 = vld [vmem:[#allocation33_spill] sm:$0xff] }
0x1512   : > { %2952 = vrsqrt.f32 %v4231_v0  ;;  %vm2529_vm7 = vweird.f32 %v4231_v0  ;;  %vm4508_vm6 = vcmp.eq.s32.totalorder %v4507_v1, %v4501_v4 }
0x1513   : > { %v2515_v7 = vmul.f32 %v4239_v52, %v2514_v53  ;;  %v2512_v28 = vsel %vm2511_vm0, %v4228_v43, %v2508_v35 }
0x1515   : > { %v2447_v56 = vpop.xlane.xlu0 %2446  ;;  %v2257_v62 = vpop.xlane.xlu2 %2256  ;;  %v2516_v39 = vmul.f32 0.5, %v2515_v7 }
0x1516   : > { %v2463_v50 = vmul.f32 %v2447_v56, %v4497_v2  ;;  %v2553_v46 = vmul.f32 %v2482_v16, %v2257_v62 }
0x1517   : > { %v2517_v21 = vsub.f32 1.5, %v2516_v39 }
0x1518   : > { %v4243_v29 = vpop.eup %2952  ;;  %v4245_v27 = vmax.f32 %v2463_v50, 1e-16  ;;  %v2561_v42 = vsel %vm600_vm2, %v2553_v46, 0.0  ;;  %vm2520_vm2 = vweird.f32 %v4239_v52 }
0x1519   : > { %v2524_v23 = vmul.f32 %v4243_v29, %v4231_v0  ;;  %v2569_v43 = vsel %vm616_vm4, %v2561_v42, 0.0  ;;  %v2518_v50 = vmul.f32 %v4239_v52, %v2517_v21  ;;  %vm2521_vm9 = vmor %vm2519_vm11, %vm2520_vm2 }
0x151a   : > { %2954 = vrsqrt.f32 %v4245_v27  ;;  %vm2539_vm3 = vweird.f32 %v4245_v27 }
0x151b   : > { %v2525_v36 = vmul.f32 %v4243_v29, %v2524_v23  ;;  %v2522_v61 = vsel %vm2521_vm9, %v4239_v52, %v2518_v50  ;;  %v4509_v52 = vld [vmem:[#allocation32_spill] sm:$0xff] }
0x151c   : > { %vm4510_vm10 = vcmp.eq.s32.totalorder %v4509_v52, %v4501_v4 }
0x151d   : > { %v2456_v8 = vpop.xlane.xlu1 %2455  ;;  %v2266_v11 = vpop.xlane.xlu0 %2265  ;;  %v2526_v6 = vmul.f32 0.5, %v2525_v36 }
0x151e   : > { %v2464_v9 = vmul.f32 %v2456_v8, %v4498_v59  ;;  %v2107_v47 = vpop.xlane.xlu2 %2106  ;;  %v2554_v5 = vmul.f32 %v2492_v26, %v2266_v11 }
0x151f   : > { %v2108_v24 = vmul.f32 %v2107_v47, %v4499_v33  ;;  %v2527_v12 = vsub.f32 1.5, %v2526_v6 }
0x1520   : > { %v4256_v41 = vpop.eup %2954  ;;  %v4258_v18 = vmax.f32 %v2464_v9, 1e-16  ;;  %v2562_v37 = vsel %vm601_vm1, %v2554_v5, 0.0  ;;  %vm2530_vm1 = vweird.f32 %v4243_v29 }
0x1521   : > { %v2534_v48 = vmul.f32 %v4256_v41, %v4245_v27  ;;  %v4263_v19 = vmax.f32 %v2108_v24, 1e-16  ;;  %v2570_v40 = vsel %vm616_vm4, %v2562_v37, 0.0  ;;  %v2528_v54 = vmul.f32 %v4243_v29, %v2527_v12  ;;  %vm2531_vm13 = vmor %vm2529_vm7, %vm2530_vm1 }
0x1522   : > { %2956 = vrsqrt.f32 %v4258_v18  ;;  %v2571_v17 = vadd.f32 %v2570_v40, %v2569_v43  ;;  %vm2540_vm14 = vweird.f32 %v4256_v41  ;;  %vm2549_vm1 = vweird.f32 %v4258_v18 }
0x1523   : > { %v2535_v49 = vmul.f32 %v4256_v41, %v2534_v48  ;;  %2958 = vrsqrt.f32 %v4263_v19  ;;  %v2532_v34 = vsel %vm2531_vm13, %v4243_v29, %v2528_v54  ;;  %vm2541_vm5 = vmor %vm2539_vm3, %vm2540_vm14  ;;  %vm2116_vm11 = vweird.f32 %v4263_v19 }
0x1525   : > { %v2536_v22 = vmul.f32 0.5, %v2535_v49  ;;  %v2275_v60 = vpop.xlane.xlu1 %2274  ;;  %v2284_v55 = vpop.xlane.xlu0 %2283 }
0x1526   : > { %v2555_v38 = vmul.f32 %v2502_v58, %v2275_v60  ;;  %v2556_v44 = vmul.f32 %v2512_v28, %v2284_v55  ;;  %v2302_v2 = vpop.xlane.xlu2 %2301 }
0x1527   : > { %v2537_v3 = vsub.f32 1.5, %v2536_v22  ;;  %v2558_v51 = vmul.f32 %v2532_v34, %v2302_v2  ;;  %v4513_v22 = vld [vmem:[#allocation35_spill] sm:$0xff] }
0x1528   : > { %v2957_v14 = vpop.eup %2956  ;;  %v2563_v57 = vsel %vm4504_vm8, %v2555_v38, 0.0  ;;  %v2564_v36 = vsel %vm4506_vm15, %v2556_v44, 0.0  ;;  %vm4514_vm2 = vcmp.eq.s32.totalorder %v4513_v22, %v4501_v4 }
0x1529   : > { %v2959_v56 = vpop.eup %2958  ;;  %v2544_v62 = vmul.f32 %v2957_v14, %v4258_v18  ;;  %v2572_v45 = vsel %vm616_vm4, %v2563_v57, 0.0  ;;  %v2538_v53 = vmul.f32 %v4256_v41, %v2537_v3  ;;  %v2574_v25 = vsel %vm616_vm4, %v2564_v36, 0.0 }
0x152a   : > { %v2111_v0 = vmul.f32 %v2959_v56, %v4263_v19  ;;  %v2573_v23 = vadd.f32 %v2572_v45, %v2571_v17  ;;  %v2566_v6 = vsel %vm4508_vm6, %v2558_v51, 0.0  ;;  %vm2550_vm0 = vweird.f32 %v2957_v14 }
0x152b   : > { %v2545_v31 = vmul.f32 %v2957_v14, %v2544_v62  ;;  %v2542_v59 = vsel %vm2541_vm5, %v4256_v41, %v2538_v53  ;;  %v2578_v39 = vsel %vm616_vm4, %v2566_v6, 0.0  ;;  %v4511_v41 = vld [vmem:[#allocation34_spill] sm:$0xff]  ;;  %vm2551_vm7 = vmor %vm2549_vm1, %vm2550_vm0  ;;  %vm2117_vm13 = vweird.f32 %v2959_v56 }
0x152c   : > { %v2112_v29 = vmul.f32 %v2959_v56, %v2111_v0  ;;  %v2575_v47 = vadd.f32 %v2574_v25, %v2573_v23  ;;  %vm4512_vm8 = vcmp.eq.s32.totalorder %v4511_v41, %v4501_v4  ;;  %vm2118_vm14 = vmor %vm2116_vm11, %vm2117_vm13 }
0x152d   : > { %v2546_v30 = vmul.f32 0.5, %v2545_v31  ;;  %v2293_v7 = vpop.xlane.xlu1 %2292  ;;  %v2311_v8 = vpop.xlane.xlu0 %2310 }
0x152e   : > { %v2557_v11 = vmul.f32 %v2522_v61, %v2293_v7  ;;  %v2559_v26 = vmul.f32 %v2542_v59, %v2311_v8  ;;  %v2113_v5 = vmul.f32 0.5, %v2112_v29 }
0x152f   : > { %v2547_v9 = vsub.f32 1.5, %v2546_v30 }
0x1530   : > { %v2565_v27 = vsel %vm4510_vm10, %v2557_v11, 0.0  ;;  %v2567_v48 = vsel %vm4512_vm8, %v2559_v26, 0.0  ;;  %v2114_v12 = vsub.f32 1.5, %v2113_v5 }
0x1531   : > { %v2576_v33 = vsel %vm616_vm4, %v2565_v27, 0.0  ;;  %v2548_v24 = vmul.f32 %v2957_v14, %v2547_v9  ;;  %v2580_v15 = vsel %vm616_vm4, %v2567_v48, 0.0 }
0x1532   : > { %v2577_v16 = vadd.f32 %v2576_v33, %v2575_v47  ;;  %v2115_v55 = vmul.f32 %v2959_v56, %v2114_v12 }
0x1533   : > { %v2552_v46 = vsel %vm2551_vm7, %v2957_v14, %v2548_v24 }
0x1534   : > { %v2579_v13 = vadd.f32 %v2578_v39, %v2577_v16  ;;  %v2119_v38 = vsel %vm2118_vm14, %v2959_v56, %v2115_v55 }
0x1535   : > { %v2320_v35 = vpop.xlane.xlu1 %2319  ;;  %v2120_v40 = vmul.f32 %v2119_v38, %v4209_v10 }
0x1536   : > { %v2560_v49 = vmul.f32 %v2552_v46, %v2320_v35  ;;  %v2581_v37 = vadd.f32 %v2580_v15, %v2579_v13 }
0x1537   : > { %v2590_v14 = vperm.slane %v2120_v40, 0 }
0x1538   : > { %v2568_v58 = vsel %vm4514_vm2, %v2560_v49, 0.0 }
0x1539   : > { %v2582_v18 = vsel %vm616_vm4, %v2568_v58, 0.0  ;;  %vm4515_vm4 = vcmp.eq.s32.totalorder %v4502_v32, 0 }
0x153a   : > { %v2583_v60 = vadd.f32 %v2582_v18, %v2581_v37 }
0x153c   : > { %v2584_v21 = vrot.slane %v2583_v60, 4 }
0x153e   : > { %v2585_v42 = vadd.f32 %v2584_v21, %v2583_v60 }
0x1540   : > { %v2586_v28 = vrot.slane %v2585_v42, 2 }
0x1542   : > { %v2587_v54 = vadd.f32 %v2586_v28, %v2585_v42 }
0x1544   : > { %v2588_v3 = vrot.slane %v2587_v54, 1 }
0x1546   : > { %v2589_v4 = vadd.f32 %v2588_v3, %v2587_v54 }
0x1548   : > { %v2591_v20 = vsel %vm4515_vm4, %v2589_v4, %v2590_v14 }
0x1549   : > { %v2592_v57 = vmul.f32 10.0, %v2591_v20 }
0x154b   : > { %2593 = vst.msk [vmem:[%s161_s22] sm:$0x3] %vm873_vm12, %v2592_v57 }
0x154c PF: > { %s12_s9 = sadd.s32 1, %s2966_s9  }
0x154d   : > { %p9_p4 = scmp.ge.s32.totalorder %s12_s9, 4  }
0x154f   :  { %11 = sbr.rel (!%p9_p4) target bundleno = 1 (0x1), region = 63 }

</bundles_post_ra>
